<compile_context>
chip_gen: v7x
topology: tpu7x:2x2x1
jax: 0.10.0
libtpu: 0.0.40
codegen_flags: <defaults>
</compile_context>

<pallas_src>
import functools
import math

import jax
import jax.numpy as jnp
from jax import lax
from jax.experimental import pallas as pl
from jax.experimental.pallas import tpu as pltpu


# ----------------------------------------------------------------------------
# Tiling helpers
# ----------------------------------------------------------------------------
def _pick_tile(dim, cap, quantum):
    """Largest multiple of `quantum` that divides `dim` and is <= cap (or dim)."""
    if dim <= cap:
        return dim
    best = None
    for cand in range(quantum, cap + 1, quantum):
        if dim % cand == 0:
            best = cand
    return best if best is not None else dim


def _pick_t_blk(T, cap=32):
    """Timestep block for the recurrence (prefer multiples of 16, then 8)."""
    if T <= cap:
        return T
    for q in (16, 8):
        best = 0
        for cand in range(q, cap + 1, q):
            if T % cand == 0:
                best = cand
        if best:
            return best
    for cand in range(cap, 0, -1):      # TODO(synk): ragged/padded T blocks for prime T
        if T % cand == 0:
            return cand
    return 1


def _pick_t_tile(T, cap=64):
    """Time tile for the vocab projection.  It is the second-minor dim of the
    (B, t_tile, tn) output block, so it must be a multiple of 8 or equal T."""
    best = 0
    for cand in range(8, min(cap, T) + 1, 8):
        if T % cand == 0:
            best = cand
    return best if best else T


def _sigmoid(x):
    # sigmoid(x) == 0.5 * tanh(0.5 * x) + 0.5 : single EUP pass, no divide.
    return 0.5 * jnp.tanh(0.5 * x) + 0.5


# ----------------------------------------------------------------------------
# Fused LSTM layer kernel.
#   Per grid step (b, tb):
#     gx = x_block @ W_ih^T + bias           (one MXU matmul, f32, VMEM scratch)
#     for i in [0, t_blk):  gates = gx[i] + h @ W_hh^T ; LSTM cell update
#   (h, c) are carried across the "arbitrary" time axis in f32 VMEM scratch.
#   PyTorch nn.LSTM gate order is (i, f, g, o).
# ----------------------------------------------------------------------------
def _lstm_kernel(x_ref, wih_ref, whh_ref, bias_ref, h0_ref, c0_ref,
                 y_ref, hN_ref, cN_ref,
                 gx_sc, h_sc, c_sc, *, t_blk, unroll):
    tb = pl.program_id(1)

    @pl.when(tb == 0)
    def _():
        h_sc[...] = h0_ref[...].astype(jnp.float32)
        c_sc[...] = c0_ref[...].astype(jnp.float32)

    Bc = h0_ref.shape[0]
    H = h0_ref.shape[1]
    E = x_ref.shape[-1]

    # Block-level input projection (off the per-timestep serial path).
    x2 = x_ref[...].reshape(t_blk * Bc, E)
    gx = jnp.dot(x2, wih_ref[...], preferred_element_type=jnp.float32)
    gx = gx + bias_ref[...].astype(jnp.float32)
    gx_sc[...] = gx.reshape(t_blk, Bc, 4 * H)

    def step(i, carry):
        h, c = carry
        gates = gx_sc[i] + jnp.dot(h.astype(whh_ref.dtype), whh_ref[...],
                                   preferred_element_type=jnp.float32)   # (Bc, 4H)
        i_g = _sigmoid(gates[:, 0 * H:1 * H])
        f_g = _sigmoid(gates[:, 1 * H:2 * H])
        g_g = jnp.tanh(gates[:, 2 * H:3 * H])
        o_g = _sigmoid(gates[:, 3 * H:4 * H])
        c = f_g * c + i_g * g_g
        h = o_g * jnp.tanh(c)
        y_ref[i] = h.astype(y_ref.dtype)          # dense full-(Bc, H) store
        return (h, c)

    h, c = lax.fori_loop(0, t_blk, step, (h_sc[...], c_sc[...]), unroll=unroll)
    h_sc[...] = h
    c_sc[...] = c

    @pl.when(tb == pl.num_programs(1) - 1)
    def _():
        hN_ref[...] = h_sc[...]
        cN_ref[...] = c_sc[...]


def lstm_layer(x_tm, w_ih_t, w_hh_t, bias, h0, c0, *, t_blk, y_dtype):
    """x_tm: (T, B, E) time-major inputs.  Returns (y (T,B,H), hN (B,H), cN (B,H))."""
    T, B, E = x_tm.shape
    H = h0.shape[-1]
    G = 4 * H
    n_tb = T // t_blk

    # Batch-split "parallel" axis (each chunk keeps an 8-row sublane quantum):
    # shards the serial recurrence across TensorCores on multi-TC chips (v7x).
    n_bc = 2 if (B % 16 == 0) else 1
    Bc = B // n_bc
    unroll = max(1, min(t_blk, 8))      # bounded unroll -> bounded vreg pressure

    kernel = functools.partial(_lstm_kernel, t_blk=t_blk, unroll=unroll)
    # Whole-array VMEM residents: fetched once, single copy (no double buffering).
    resident = pl.BlockSpec(memory_space=pltpu.MemorySpace.VMEM)

    return pl.pallas_call(
        kernel,
        out_shape=(
            jax.ShapeDtypeStruct((T, B, H), y_dtype),    # per-step hidden outputs
            jax.ShapeDtypeStruct((B, H), jnp.float32),   # final h
            jax.ShapeDtypeStruct((B, H), jnp.float32),   # final c
        ),
        grid_spec=pltpu.PrefetchScalarGridSpec(
            num_scalar_prefetch=0,
            grid=(n_bc, n_tb),
            in_specs=[
                pl.BlockSpec((t_blk, Bc, E), lambda b, t: (t, b, 0)),   # x block
                resident,                                               # W_ih^T (E,4H)
                resident,                                               # W_hh^T (H,4H)
                resident,                                               # bias (1,4H) f32
                pl.BlockSpec((Bc, H), lambda b, t: (b, 0)),             # h0 chunk
                pl.BlockSpec((Bc, H), lambda b, t: (b, 0)),             # c0 chunk
            ],
            out_specs=[
                pl.BlockSpec((t_blk, Bc, H), lambda b, t: (t, b, 0)),   # y block
                pl.BlockSpec((Bc, H), lambda b, t: (b, 0)),             # hN (resident)
                pl.BlockSpec((Bc, H), lambda b, t: (b, 0)),             # cN (resident)
            ],
            scratch_shapes=[
                pltpu.VMEM((t_blk, Bc, G), jnp.float32),   # f32 gate pre-activations
                pltpu.VMEM((Bc, H), jnp.float32),          # h carry
                pltpu.VMEM((Bc, H), jnp.float32),          # c carry
            ],
        ),
        compiler_params=pltpu.CompilerParams(
            dimension_semantics=("parallel", "arbitrary"),
            vmem_limit_bytes=32 * 1024 * 1024),
        cost_estimate=pl.CostEstimate(
            flops=2 * T * B * (E + H) * G + 10 * T * B * H,
            transcendentals=5 * T * B * H,
            bytes_accessed=(T * B * E + E * G + H * G) * x_tm.dtype.itemsize
                           + T * B * H * jnp.dtype(y_dtype).itemsize
                           + 4 * B * H * 4),
    )(x_tm, w_ih_t, w_hh_t, bias, h0, c0)


# ----------------------------------------------------------------------------
# Vocab projection:  time-major (T, B, H) -> batch-first logits (B, T, V) f32.
# The batch-first relayout is fused into the kernel (dense lane-wide stores);
# both grid axes are "parallel" (megacore-shardable).
# ----------------------------------------------------------------------------
def _vocab_proj_kernel(x_ref, w_ref, b_ref, o_ref):
    t_tile, B, H = x_ref.shape
    x2 = x_ref[...].reshape(t_tile * B, H)                 # rows ordered (t, b)
    acc = jnp.dot(x2, w_ref[...], preferred_element_type=jnp.float32)
    acc = (acc + b_ref[...].astype(jnp.float32)).reshape(t_tile, B, -1)
    # Per-batch dense (t_tile, tn) stores into the (B, t_tile, tn) output block.
    for b_i in range(B):
        o_ref[b_i] = acc[:, b_i, :]


def vocab_projection(x_tm, w_t, b, *, tt_cap=64, tn_cap=1024):
    T, B, H = x_tm.shape
    V = w_t.shape[-1]
    Vp = ((V + 127) // 128) * 128          # pad vocab to a lane-dense 128 multiple
    if Vp != V:
        w_t = jnp.pad(w_t, ((0, 0), (0, Vp - V)))
        b = jnp.pad(b, ((0, 0), (0, Vp - V)))
    tt = _pick_t_tile(T, tt_cap)
    tn = _pick_tile(Vp, tn_cap, 128)
    grid = (T // tt, Vp // tn)

    logits = pl.pallas_call(
        _vocab_proj_kernel,
        out_shape=jax.ShapeDtypeStruct((B, T, Vp), jnp.float32),
        grid_spec=pltpu.PrefetchScalarGridSpec(
            num_scalar_prefetch=0,
            grid=grid,
            in_specs=[
                pl.BlockSpec((tt, B, H), lambda t, v: (t, 0, 0)),
                pl.BlockSpec((H, tn), lambda t, v: (0, v)),
                pl.BlockSpec((1, tn), lambda t, v: (0, v)),
            ],
            out_specs=pl.BlockSpec((B, tt, tn), lambda t, v: (0, t, v)),
        ),
        compiler_params=pltpu.CompilerParams(
            dimension_semantics=("parallel", "parallel"),
            vmem_limit_bytes=32 * 1024 * 1024),
        cost_estimate=pl.CostEstimate(
            flops=2 * T * B * H * Vp,
            transcendentals=0,
            bytes_accessed=(T * B * H + H * Vp) * x_tm.dtype.itemsize
                           + B * T * Vp * 4),
    )(x_tm, w_t, b)

    if Vp != V:
        logits = logits[..., :V]
    return logits


# ----------------------------------------------------------------------------
# RNNLM forward (LSTM variant)
# ----------------------------------------------------------------------------
def rnnlm_forward(params, x_ids, hidden_states):
    """x_ids: (B, T) int32 ids.  hidden_states: (h0, c0) each (L, B, H).

    Returns (logits (B, T, V) f32, (hN, cN)) — matches PyTorch RNNLM.forward
    in eval mode (dropout = identity)."""
    h0_all, c0_all = hidden_states
    B, T = x_ids.shape
    num_layers = len(params["lstm"])
    cdt = params["embed"].dtype

    # Embedding lookup (XLA gather), directly into time-major (T, B, E).
    x_tm = jnp.take(params["embed"], x_ids.T, axis=0)

    t_blk = _pick_t_blk(T)

    hN_list, cN_list = [], []
    for layer in range(num_layers):
        lp = params["lstm"][layer]
        y, hN, cN = lstm_layer(x_tm, lp["w_ih_t"], lp["w_hh_t"], lp["bias"],
                               h0_all[layer], c0_all[layer],
                               t_blk=t_blk, y_dtype=cdt)
        hN_list.append(hN)
        cN_list.append(cN)
        x_tm = y                                   # time-major throughout

    logits = vocab_projection(x_tm, params["lin_w_t"], params["lin_b"])

    hN = jnp.stack(hN_list, axis=0)                # (L, B, H) f32
    cN = jnp.stack(cN_list, axis=0)
    return logits, (hN, cN)


# ----------------------------------------------------------------------------
# Deterministic parameter init (xavier-uniform, gain sqrt(2), like the module)
# ----------------------------------------------------------------------------
def _xavier(key, shape, gain=math.sqrt(2.0)):
    fan_out, fan_in = shape
    bound = gain * math.sqrt(6.0 / (fan_in + fan_out))
    return jax.random.uniform(key, shape, jnp.float32, -bound, bound)


def init_params(key, vocab_size, embed_size, hidden_size, num_layers,
                dtype=jnp.bfloat16):
    keys = jax.random.split(key, 2 + num_layers)
    params = {"embed": _xavier(keys[0], (vocab_size, embed_size)).astype(dtype)}

    stdv = 1.0 / math.sqrt(hidden_size)
    lstm_layers = []
    for layer in range(num_layers):
        in_size = embed_size if layer == 0 else hidden_size
        k_ih, k_hh, k_bi, k_bh = jax.random.split(keys[2 + layer], 4)
        w_ih = _xavier(k_ih, (4 * hidden_size, in_size))        # PyTorch layout
        w_hh = _xavier(k_hh, (4 * hidden_size, hidden_size))
        b_ih = jax.random.uniform(k_bi, (4 * hidden_size,), jnp.float32, -stdv, stdv)
        b_hh = jax.random.uniform(k_bh, (4 * hidden_size,), jnp.float32, -stdv, stdv)
        lstm_layers.append({
            "w_ih_t": jnp.transpose(w_ih).astype(dtype),        # (E or H, 4H) bf16
            "w_hh_t": jnp.transpose(w_hh).astype(dtype),        # (H, 4H) bf16
            "bias": (b_ih + b_hh).reshape(1, -1),               # folded bias, f32
        })
    params["lstm"] = lstm_layers

    k_lw, k_lb = jax.random.split(keys[1], 2)
    lin_w = _xavier(k_lw, (vocab_size, hidden_size))            # PyTorch (V, H)
    params["lin_w_t"] = jnp.transpose(lin_w).astype(dtype)      # (H, V) bf16
    params["lin_b"] = jax.random.uniform(k_lb, (1, vocab_size), jnp.float32,
                                         -stdv, stdv)
    return params


if __name__ == "__main__":
    # Small, TPU-tile-friendly shapes.
    VOCAB, EMBED, HIDDEN, LAYERS = 256, 128, 128, 2
    BATCH, SEQ = 8, 8

    key = jax.random.PRNGKey(0)
    k_params, k_ids = jax.random.split(key)

    params = init_params(k_params, VOCAB, EMBED, HIDDEN, LAYERS)
    x_ids = jax.random.randint(k_ids, (BATCH, SEQ), 0, VOCAB, dtype=jnp.int32)

    # init_hidden_states (LSTM): zeros of shape (num_layers, batch, hidden)
    h0 = jnp.zeros((LAYERS, BATCH, HIDDEN), jnp.float32)
    c0 = jnp.zeros((LAYERS, BATCH, HIDDEN), jnp.float32)

    logits, (hN, cN) = jax.jit(rnnlm_forward)(params, x_ids, (h0, c0))
    jax.block_until_ready((logits, hN, cN))

    assert logits.shape == (BATCH, SEQ, VOCAB)
    assert hN.shape == (LAYERS, BATCH, HIDDEN)
    assert cN.shape == (LAYERS, BATCH, HIDDEN)
    print("KERNEL_OK")
</pallas_src>

<mosaic_0001>
module attributes {stable_mosaic.version = 11 : i64} {
  func.func @_vocab_proj_kernel(%arg0: i32, %arg1: i32, %arg2: memref<8x8x128xbf16, #tpu.memory_space<vmem>>, %arg3: memref<128x256xbf16, #tpu.memory_space<vmem>>, %arg4: memref<1x256xf32, #tpu.memory_space<vmem>>, %arg5: memref<8x8x256xf32, #tpu.memory_space<vmem>>) attributes {dimension_semantics = [#tpu.dimension_semantics<parallel>, #tpu.dimension_semantics<parallel>], iteration_bounds = array<i64: 1, 1>, scalar_prefetch = 0 : i64, scratch_operands = 0 : i64, tpu.core_type = #tpu.core_type<tc>, window_params = [{transform_indices = @transform_0, window_bounds = array<i64: 8, 8, 128>}, {transform_indices = @transform_1, window_bounds = array<i64: 128, 256>}, {transform_indices = @transform_2, window_bounds = array<i64: 1, 256>}, {transform_indices = @transform_3, window_bounds = array<i64: 8, 8, 256>}]} {
    %c0 = arith.constant 0 : index
    %c0_0 = arith.constant 0 : index
    %c0_1 = arith.constant 0 : index
    %0 = vector.load %arg2[%c0, %c0_0, %c0_1] : memref<8x8x128xbf16, #tpu.memory_space<vmem>>, vector<8x8x128xbf16>
    %1 = vector.shape_cast %0 : vector<8x8x128xbf16> to vector<64x128xbf16>
    %c0_2 = arith.constant 0 : index
    %c0_3 = arith.constant 0 : index
    %2 = vector.load %arg3[%c0_2, %c0_3] : memref<128x256xbf16, #tpu.memory_space<vmem>>, vector<128x256xbf16>
    %cst = arith.constant dense<0.000000e+00> : vector<64x256xf32>
    %3 = tpu.matmul %1, %2, %cst {dimension_numbers = #tpu.dot_dimension_numbers<[1], [0], [0], [1], [0, 0, 1, 1], [], []>} : vector<64x128xbf16>, vector<128x256xbf16>, vector<64x256xf32> -> vector<64x256xf32>
    %c0_4 = arith.constant 0 : index
    %c0_5 = arith.constant 0 : index
    %4 = vector.load %arg4[%c0_4, %c0_5] : memref<1x256xf32, #tpu.memory_space<vmem>>, vector<1x256xf32>
    %5 = vector.broadcast %4 : vector<1x256xf32> to vector<64x256xf32>
    %6 = arith.addf %3, %5 : vector<64x256xf32>
    %7 = vector.shape_cast %6 : vector<64x256xf32> to vector<8x8x256xf32>
    %8 = vector.extract_strided_slice %7 {offsets = [0, 0, 0], sizes = [8, 1, 256], strides = [1, 1, 1]} : vector<8x8x256xf32> to vector<8x1x256xf32>
    %9 = vector.shape_cast %8 : vector<8x1x256xf32> to vector<8x256xf32>
    %c0_6 = arith.constant 0 : index
    %c0_7 = arith.constant 0 : index
    %c0_8 = arith.constant 0 : index
    %10 = vector.load %arg5[%c0_6, %c0_7, %c0_8] : memref<8x8x256xf32, #tpu.memory_space<vmem>>, vector<1x8x256xf32>
    %11 = vector.shape_cast %10 : vector<1x8x256xf32> to vector<8x256xf32>
    %12 = vector.shape_cast %9 : vector<8x256xf32> to vector<1x8x256xf32>
    tpu.vector_store %arg5[%c0_6, %c0_7, %c0_8], %12 {strides = array<i32>} : memref<8x8x256xf32, #tpu.memory_space<vmem>>, vector<1x8x256xf32>,
    %13 = vector.extract_strided_slice %7 {offsets = [0, 1, 0], sizes = [8, 1, 256], strides = [1, 1, 1]} : vector<8x8x256xf32> to vector<8x1x256xf32>
    %14 = vector.shape_cast %13 : vector<8x1x256xf32> to vector<8x256xf32>
    %c1 = arith.constant 1 : index
    %c0_9 = arith.constant 0 : index
    %c0_10 = arith.constant 0 : index
    %15 = vector.load %arg5[%c1, %c0_9, %c0_10] : memref<8x8x256xf32, #tpu.memory_space<vmem>>, vector<1x8x256xf32>
    %16 = vector.shape_cast %15 : vector<1x8x256xf32> to vector<8x256xf32>
    %17 = vector.shape_cast %14 : vector<8x256xf32> to vector<1x8x256xf32>
    tpu.vector_store %arg5[%c1, %c0_9, %c0_10], %17 {strides = array<i32>} : memref<8x8x256xf32, #tpu.memory_space<vmem>>, vector<1x8x256xf32>,
    %18 = vector.extract_strided_slice %7 {offsets = [0, 2, 0], sizes = [8, 1, 256], strides = [1, 1, 1]} : vector<8x8x256xf32> to vector<8x1x256xf32>
    %19 = vector.shape_cast %18 : vector<8x1x256xf32> to vector<8x256xf32>
    %c2 = arith.constant 2 : index
    %c0_11 = arith.constant 0 : index
    %c0_12 = arith.constant 0 : index
    %20 = vector.load %arg5[%c2, %c0_11, %c0_12] : memref<8x8x256xf32, #tpu.memory_space<vmem>>, vector<1x8x256xf32>
    %21 = vector.shape_cast %20 : vector<1x8x256xf32> to vector<8x256xf32>
    %22 = vector.shape_cast %19 : vector<8x256xf32> to vector<1x8x256xf32>
    tpu.vector_store %arg5[%c2, %c0_11, %c0_12], %22 {strides = array<i32>} : memref<8x8x256xf32, #tpu.memory_space<vmem>>, vector<1x8x256xf32>,
    %23 = vector.extract_strided_slice %7 {offsets = [0, 3, 0], sizes = [8, 1, 256], strides = [1, 1, 1]} : vector<8x8x256xf32> to vector<8x1x256xf32>
    %24 = vector.shape_cast %23 : vector<8x1x256xf32> to vector<8x256xf32>
    %c3 = arith.constant 3 : index
    %c0_13 = arith.constant 0 : index
    %c0_14 = arith.constant 0 : index
    %25 = vector.load %arg5[%c3, %c0_13, %c0_14] : memref<8x8x256xf32, #tpu.memory_space<vmem>>, vector<1x8x256xf32>
    %26 = vector.shape_cast %25 : vector<1x8x256xf32> to vector<8x256xf32>
    %27 = vector.shape_cast %24 : vector<8x256xf32> to vector<1x8x256xf32>
    tpu.vector_store %arg5[%c3, %c0_13, %c0_14], %27 {strides = array<i32>} : memref<8x8x256xf32, #tpu.memory_space<vmem>>, vector<1x8x256xf32>,
    %28 = vector.extract_strided_slice %7 {offsets = [0, 4, 0], sizes = [8, 1, 256], strides = [1, 1, 1]} : vector<8x8x256xf32> to vector<8x1x256xf32>
    %29 = vector.shape_cast %28 : vector<8x1x256xf32> to vector<8x256xf32>
    %c4 = arith.constant 4 : index
    %c0_15 = arith.constant 0 : index
    %c0_16 = arith.constant 0 : index
    %30 = vector.load %arg5[%c4, %c0_15, %c0_16] : memref<8x8x256xf32, #tpu.memory_space<vmem>>, vector<1x8x256xf32>
    %31 = vector.shape_cast %30 : vector<1x8x256xf32> to vector<8x256xf32>
    %32 = vector.shape_cast %29 : vector<8x256xf32> to vector<1x8x256xf32>
    tpu.vector_store %arg5[%c4, %c0_15, %c0_16], %32 {strides = array<i32>} : memref<8x8x256xf32, #tpu.memory_space<vmem>>, vector<1x8x256xf32>,
    %33 = vector.extract_strided_slice %7 {offsets = [0, 5, 0], sizes = [8, 1, 256], strides = [1, 1, 1]} : vector<8x8x256xf32> to vector<8x1x256xf32>
    %34 = vector.shape_cast %33 : vector<8x1x256xf32> to vector<8x256xf32>
    %c5 = arith.constant 5 : index
    %c0_17 = arith.constant 0 : index
    %c0_18 = arith.constant 0 : index
    %35 = vector.load %arg5[%c5, %c0_17, %c0_18] : memref<8x8x256xf32, #tpu.memory_space<vmem>>, vector<1x8x256xf32>
    %36 = vector.shape_cast %35 : vector<1x8x256xf32> to vector<8x256xf32>
    %37 = vector.shape_cast %34 : vector<8x256xf32> to vector<1x8x256xf32>
    tpu.vector_store %arg5[%c5, %c0_17, %c0_18], %37 {strides = array<i32>} : memref<8x8x256xf32, #tpu.memory_space<vmem>>, vector<1x8x256xf32>,
    %38 = vector.extract_strided_slice %7 {offsets = [0, 6, 0], sizes = [8, 1, 256], strides = [1, 1, 1]} : vector<8x8x256xf32> to vector<8x1x256xf32>
    %39 = vector.shape_cast %38 : vector<8x1x256xf32> to vector<8x256xf32>
    %c6 = arith.constant 6 : index
    %c0_19 = arith.constant 0 : index
    %c0_20 = arith.constant 0 : index
    %40 = vector.load %arg5[%c6, %c0_19, %c0_20] : memref<8x8x256xf32, #tpu.memory_space<vmem>>, vector<1x8x256xf32>
    %41 = vector.shape_cast %40 : vector<1x8x256xf32> to vector<8x256xf32>
    %42 = vector.shape_cast %39 : vector<8x256xf32> to vector<1x8x256xf32>
    tpu.vector_store %arg5[%c6, %c0_19, %c0_20], %42 {strides = array<i32>} : memref<8x8x256xf32, #tpu.memory_space<vmem>>, vector<1x8x256xf32>,
    %43 = vector.extract_strided_slice %7 {offsets = [0, 7, 0], sizes = [8, 1, 256], strides = [1, 1, 1]} : vector<8x8x256xf32> to vector<8x1x256xf32>
    %44 = vector.shape_cast %43 : vector<8x1x256xf32> to vector<8x256xf32>
    %c7 = arith.constant 7 : index
    %c0_21 = arith.constant 0 : index
    %c0_22 = arith.constant 0 : index
    %45 = vector.load %arg5[%c7, %c0_21, %c0_22] : memref<8x8x256xf32, #tpu.memory_space<vmem>>, vector<1x8x256xf32>
    %46 = vector.shape_cast %45 : vector<1x8x256xf32> to vector<8x256xf32>
    %47 = vector.shape_cast %44 : vector<8x256xf32> to vector<1x8x256xf32>
    tpu.vector_store %arg5[%c7, %c0_21, %c0_22], %47 {strides = array<i32>} : memref<8x8x256xf32, #tpu.memory_space<vmem>>, vector<1x8x256xf32>,
    return
  }
  func.func @transform_0(%arg0: i32, %arg1: i32) -> (i32, i32, i32) {
    %c0_i32 = arith.constant 0 : i32
    %c0_i32_0 = arith.constant 0 : i32
    %c0_i32_1 = arith.constant 0 : i32
    return %arg0, %c0_i32, %c0_i32_0 : i32, i32, i32
  }
  func.func @transform_1(%arg0: i32, %arg1: i32) -> (i32, i32) {
    %c0_i32 = arith.constant 0 : i32
    %c0_i32_0 = arith.constant 0 : i32
    return %c0_i32, %arg1 : i32, i32
  }
  func.func @transform_2(%arg0: i32, %arg1: i32) -> (i32, i32) {
    %c0_i32 = arith.constant 0 : i32
    %c0_i32_0 = arith.constant 0 : i32
    return %c0_i32, %arg1 : i32, i32
  }
  func.func @transform_3(%arg0: i32, %arg1: i32) -> (i32, i32, i32) {
    %c0_i32 = arith.constant 0 : i32
    %c0_i32_0 = arith.constant 0 : i32
    return %c0_i32, %arg0, %arg1 : i32, i32, i32
  }
}

module attributes {stable_mosaic.version = 11 : i64} {
  func.func @_lstm_kernel(%arg0: i32, %arg1: i32, %arg2: memref<8x8x128xbf16, #tpu.memory_space<vmem>>, %arg3: memref<128x512xbf16, #tpu.memory_space<vmem>>, %arg4: memref<128x512xbf16, #tpu.memory_space<vmem>>, %arg5: memref<1x512xf32, #tpu.memory_space<vmem>>, %arg6: memref<8x128xf32, #tpu.memory_space<vmem>>, %arg7: memref<8x128xf32, #tpu.memory_space<vmem>>, %arg8: memref<8x8x128xbf16, #tpu.memory_space<vmem>>, %arg9: memref<8x128xf32, #tpu.memory_space<vmem>>, %arg10: memref<8x128xf32, #tpu.memory_space<vmem>>, %arg11: memref<8x8x512xf32, #tpu.memory_space<vmem>>, %arg12: memref<8x128xf32, #tpu.memory_space<vmem>>, %arg13: memref<8x128xf32, #tpu.memory_space<vmem>>) attributes {dimension_semantics = [#tpu.dimension_semantics<parallel>, #tpu.dimension_semantics<arbitrary>], iteration_bounds = array<i64: 1, 1>, scalar_prefetch = 0 : i64, scratch_operands = 3 : i64, tpu.core_type = #tpu.core_type<tc>, window_params = [{transform_indices = @transform_0, window_bounds = array<i64: 8, 8, 128>}, {pipeline_mode = #tpu.pipeline_mode<synchronous>, transform_indices = @transform_1, window_bounds = array<i64: 128, 512>}, {pipeline_mode = #tpu.pipeline_mode<synchronous>, transform_indices = @transform_2, window_bounds = array<i64: 128, 512>}, {pipeline_mode = #tpu.pipeline_mode<synchronous>, transform_indices = @transform_3, window_bounds = array<i64: 1, 512>}, {transform_indices = @transform_4, window_bounds = array<i64: 8, 128>}, {transform_indices = @transform_5, window_bounds = array<i64: 8, 128>}, {transform_indices = @transform_6, window_bounds = array<i64: 8, 8, 128>}, {transform_indices = @transform_7, window_bounds = array<i64: 8, 128>}, {transform_indices = @transform_8, window_bounds = array<i64: 8, 128>}]} {
    %c0_i32 = arith.constant 0 : i32
    %0 = arith.cmpi eq, %arg1, %c0_i32 : i32
    %1 = arith.extui %0 : i1 to i32
    %c0_i32_0 = arith.constant 0 : i32
    %2 = arith.cmpi ne, %1, %c0_i32_0 : i32
    scf.if %2 {
      %c0_149 = arith.constant 0 : index
      %c0_150 = arith.constant 0 : index
      %363 = vector.load %arg6[%c0_149, %c0_150] : memref<8x128xf32, #tpu.memory_space<vmem>>, vector<8x128xf32>
      %c0_151 = arith.constant 0 : index
      %c0_152 = arith.constant 0 : index
      %364 = vector.load %arg12[%c0_151, %c0_152] : memref<8x128xf32, #tpu.memory_space<vmem>>, vector<8x128xf32>
      tpu.vector_store %arg12[%c0_151, %c0_152], %363 {strides = array<i32>} : memref<8x128xf32, #tpu.memory_space<vmem>>, vector<8x128xf32>,
      %c0_153 = arith.constant 0 : index
      %c0_154 = arith.constant 0 : index
      %365 = vector.load %arg7[%c0_153, %c0_154] : memref<8x128xf32, #tpu.memory_space<vmem>>, vector<8x128xf32>
      %c0_155 = arith.constant 0 : index
      %c0_156 = arith.constant 0 : index
      %366 = vector.load %arg13[%c0_155, %c0_156] : memref<8x128xf32, #tpu.memory_space<vmem>>, vector<8x128xf32>
      tpu.vector_store %arg13[%c0_155, %c0_156], %365 {strides = array<i32>} : memref<8x128xf32, #tpu.memory_space<vmem>>, vector<8x128xf32>,
    } else {
    }
    %c0 = arith.constant 0 : index
    %c0_1 = arith.constant 0 : index
    %c0_2 = arith.constant 0 : index
    %3 = vector.load %arg2[%c0, %c0_1, %c0_2] : memref<8x8x128xbf16, #tpu.memory_space<vmem>>, vector<8x8x128xbf16>
    %4 = vector.shape_cast %3 : vector<8x8x128xbf16> to vector<64x128xbf16>
    %c0_3 = arith.constant 0 : index
    %c0_4 = arith.constant 0 : index
    %5 = vector.load %arg3[%c0_3, %c0_4] : memref<128x512xbf16, #tpu.memory_space<vmem>>, vector<128x512xbf16>
    %cst = arith.constant dense<0.000000e+00> : vector<64x512xf32>
    %6 = tpu.matmul %4, %5, %cst {dimension_numbers = #tpu.dot_dimension_numbers<[1], [0], [0], [1], [0, 0, 1, 1], [], []>} : vector<64x128xbf16>, vector<128x512xbf16>, vector<64x512xf32> -> vector<64x512xf32>
    %c0_5 = arith.constant 0 : index
    %c0_6 = arith.constant 0 : index
    %7 = vector.load %arg5[%c0_5, %c0_6] : memref<1x512xf32, #tpu.memory_space<vmem>>, vector<1x512xf32>
    %8 = vector.broadcast %7 : vector<1x512xf32> to vector<64x512xf32>
    %9 = arith.addf %6, %8 : vector<64x512xf32>
    %10 = vector.shape_cast %9 : vector<64x512xf32> to vector<8x8x512xf32>
    %c0_7 = arith.constant 0 : index
    %c0_8 = arith.constant 0 : index
    %c0_9 = arith.constant 0 : index
    %11 = vector.load %arg11[%c0_7, %c0_8, %c0_9] : memref<8x8x512xf32, #tpu.memory_space<vmem>>, vector<8x8x512xf32>
    tpu.vector_store %arg11[%c0_7, %c0_8, %c0_9], %10 {strides = array<i32>} : memref<8x8x512xf32, #tpu.memory_space<vmem>>, vector<8x8x512xf32>,
    %c0_10 = arith.constant 0 : index
    %c0_11 = arith.constant 0 : index
    %12 = vector.load %arg12[%c0_10, %c0_11] : memref<8x128xf32, #tpu.memory_space<vmem>>, vector<8x128xf32>
    %c0_12 = arith.constant 0 : index
    %c0_13 = arith.constant 0 : index
    %13 = vector.load %arg13[%c0_12, %c0_13] : memref<8x128xf32, #tpu.memory_space<vmem>>, vector<8x128xf32>
    %c0_i32_14 = arith.constant 0 : i32
    %14 = arith.index_cast %c0_i32_14 : i32 to index
    %c0_15 = arith.constant 0 : index
    %c0_16 = arith.constant 0 : index
    %15 = vector.load %arg11[%14, %c0_15, %c0_16] : memref<8x8x512xf32, #tpu.memory_space<vmem>>, vector<1x8x512xf32>
    %16 = vector.shape_cast %15 : vector<1x8x512xf32> to vector<8x512xf32>
    %17 = arith.truncf %12 : vector<8x128xf32> to vector<8x128xbf16>
    %c0_17 = arith.constant 0 : index
    %c0_18 = arith.constant 0 : index
    %18 = vector.load %arg4[%c0_17, %c0_18] : memref<128x512xbf16, #tpu.memory_space<vmem>>, vector<128x512xbf16>
    %cst_19 = arith.constant dense<0.000000e+00> : vector<8x512xf32>
    %19 = tpu.matmul %17, %18, %cst_19 {dimension_numbers = #tpu.dot_dimension_numbers<[1], [0], [0], [1], [0, 0, 1, 1], [], []>} : vector<8x128xbf16>, vector<128x512xbf16>, vector<8x512xf32> -> vector<8x512xf32>
    %20 = arith.addf %16, %19 : vector<8x512xf32>
    %21 = vector.extract_strided_slice %20 {offsets = [0, 0], sizes = [8, 128], strides = [1, 1]} : vector<8x512xf32> to vector<8x128xf32>
    %cst_20 = arith.constant 5.000000e-01 : f32
    %22 = vector.broadcast %cst_20 : f32 to vector<8x128xf32>
    %23 = arith.mulf %22, %21 : vector<8x128xf32>
    %24 = math.tanh %23 : vector<8x128xf32>
    %cst_21 = arith.constant 5.000000e-01 : f32
    %25 = vector.broadcast %cst_21 : f32 to vector<8x128xf32>
    %26 = arith.mulf %25, %24 : vector<8x128xf32>
    %cst_22 = arith.constant 5.000000e-01 : f32
    %27 = vector.broadcast %cst_22 : f32 to vector<8x128xf32>
    %28 = arith.addf %26, %27 : vector<8x128xf32>
    %29 = vector.extract_strided_slice %20 {offsets = [0, 128], sizes = [8, 128], strides = [1, 1]} : vector<8x512xf32> to vector<8x128xf32>
    %cst_23 = arith.constant 5.000000e-01 : f32
    %30 = vector.broadcast %cst_23 : f32 to vector<8x128xf32>
    %31 = arith.mulf %30, %29 : vector<8x128xf32>
    %32 = math.tanh %31 : vector<8x128xf32>
    %cst_24 = arith.constant 5.000000e-01 : f32
    %33 = vector.broadcast %cst_24 : f32 to vector<8x128xf32>
    %34 = arith.mulf %33, %32 : vector<8x128xf32>
    %cst_25 = arith.constant 5.000000e-01 : f32
    %35 = vector.broadcast %cst_25 : f32 to vector<8x128xf32>
    %36 = arith.addf %34, %35 : vector<8x128xf32>
    %37 = vector.extract_strided_slice %20 {offsets = [0, 256], sizes = [8, 128], strides = [1, 1]} : vector<8x512xf32> to vector<8x128xf32>
    %38 = math.tanh %37 : vector<8x128xf32>
    %39 = vector.extract_strided_slice %20 {offsets = [0, 384], sizes = [8, 128], strides = [1, 1]} : vector<8x512xf32> to vector<8x128xf32>
    %cst_26 = arith.constant 5.000000e-01 : f32
    %40 = vector.broadcast %cst_26 : f32 to vector<8x128xf32>
    %41 = arith.mulf %40, %39 : vector<8x128xf32>
    %42 = math.tanh %41 : vector<8x128xf32>
    %cst_27 = arith.constant 5.000000e-01 : f32
    %43 = vector.broadcast %cst_27 : f32 to vector<8x128xf32>
    %44 = arith.mulf %43, %42 : vector<8x128xf32>
    %cst_28 = arith.constant 5.000000e-01 : f32
    %45 = vector.broadcast %cst_28 : f32 to vector<8x128xf32>
    %46 = arith.addf %44, %45 : vector<8x128xf32>
    %47 = arith.mulf %36, %13 : vector<8x128xf32>
    %48 = arith.mulf %28, %38 : vector<8x128xf32>
    %49 = arith.addf %47, %48 : vector<8x128xf32>
    %50 = math.tanh %49 : vector<8x128xf32>
    %51 = arith.mulf %46, %50 : vector<8x128xf32>
    %52 = arith.truncf %51 : vector<8x128xf32> to vector<8x128xbf16>
    %53 = arith.index_cast %c0_i32_14 : i32 to index
    %c0_29 = arith.constant 0 : index
    %c0_30 = arith.constant 0 : index
    %54 = vector.load %arg8[%53, %c0_29, %c0_30] : memref<8x8x128xbf16, #tpu.memory_space<vmem>>, vector<1x8x128xbf16>
    %55 = vector.shape_cast %54 : vector<1x8x128xbf16> to vector<8x128xbf16>
    %56 = vector.shape_cast %52 : vector<8x128xbf16> to vector<1x8x128xbf16>
    tpu.vector_store %arg8[%53, %c0_29, %c0_30], %56 {strides = array<i32>} : memref<8x8x128xbf16, #tpu.memory_space<vmem>>, vector<1x8x128xbf16>,
    %c1_i32 = arith.constant 1 : i32
    %57 = arith.index_cast %c1_i32 : i32 to index
    %c0_31 = arith.constant 0 : index
    %c0_32 = arith.constant 0 : index
    %58 = vector.load %arg11[%57, %c0_31, %c0_32] : memref<8x8x512xf32, #tpu.memory_space<vmem>>, vector<1x8x512xf32>
    %59 = vector.shape_cast %58 : vector<1x8x512xf32> to vector<8x512xf32>
    %60 = arith.truncf %51 : vector<8x128xf32> to vector<8x128xbf16>
    %c0_33 = arith.constant 0 : index
    %c0_34 = arith.constant 0 : index
    %61 = vector.load %arg4[%c0_33, %c0_34] : memref<128x512xbf16, #tpu.memory_space<vmem>>, vector<128x512xbf16>
    %cst_35 = arith.constant dense<0.000000e+00> : vector<8x512xf32>
    %62 = tpu.matmul %60, %61, %cst_35 {dimension_numbers = #tpu.dot_dimension_numbers<[1], [0], [0], [1], [0, 0, 1, 1], [], []>} : vector<8x128xbf16>, vector<128x512xbf16>, vector<8x512xf32> -> vector<8x512xf32>
    %63 = arith.addf %59, %62 : vector<8x512xf32>
    %64 = vector.extract_strided_slice %63 {offsets = [0, 0], sizes = [8, 128], strides = [1, 1]} : vector<8x512xf32> to vector<8x128xf32>
    %cst_36 = arith.constant 5.000000e-01 : f32
    %65 = vector.broadcast %cst_36 : f32 to vector<8x128xf32>
    %66 = arith.mulf %65, %64 : vector<8x128xf32>
    %67 = math.tanh %66 : vector<8x128xf32>
    %cst_37 = arith.constant 5.000000e-01 : f32
    %68 = vector.broadcast %cst_37 : f32 to vector<8x128xf32>
    %69 = arith.mulf %68, %67 : vector<8x128xf32>
    %cst_38 = arith.constant 5.000000e-01 : f32
    %70 = vector.broadcast %cst_38 : f32 to vector<8x128xf32>
    %71 = arith.addf %69, %70 : vector<8x128xf32>
    %72 = vector.extract_strided_slice %63 {offsets = [0, 128], sizes = [8, 128], strides = [1, 1]} : vector<8x512xf32> to vector<8x128xf32>
    %cst_39 = arith.constant 5.000000e-01 : f32
    %73 = vector.broadcast %cst_39 : f32 to vector<8x128xf32>
    %74 = arith.mulf %73, %72 : vector<8x128xf32>
    %75 = math.tanh %74 : vector<8x128xf32>
    %cst_40 = arith.constant 5.000000e-01 : f32
    %76 = vector.broadcast %cst_40 : f32 to vector<8x128xf32>
    %77 = arith.mulf %76, %75 : vector<8x128xf32>
    %cst_41 = arith.constant 5.000000e-01 : f32
    %78 = vector.broadcast %cst_41 : f32 to vector<8x128xf32>
    %79 = arith.addf %77, %78 : vector<8x128xf32>
    %80 = vector.extract_strided_slice %63 {offsets = [0, 256], sizes = [8, 128], strides = [1, 1]} : vector<8x512xf32> to vector<8x128xf32>
    %81 = math.tanh %80 : vector<8x128xf32>
    %82 = vector.extract_strided_slice %63 {offsets = [0, 384], sizes = [8, 128], strides = [1, 1]} : vector<8x512xf32> to vector<8x128xf32>
    %cst_42 = arith.constant 5.000000e-01 : f32
    %83 = vector.broadcast %cst_42 : f32 to vector<8x128xf32>
    %84 = arith.mulf %83, %82 : vector<8x128xf32>
    %85 = math.tanh %84 : vector<8x128xf32>
    %cst_43 = arith.constant 5.000000e-01 : f32
    %86 = vector.broadcast %cst_43 : f32 to vector<8x128xf32>
    %87 = arith.mulf %86, %85 : vector<8x128xf32>
    %cst_44 = arith.constant 5.000000e-01 : f32
    %88 = vector.broadcast %cst_44 : f32 to vector<8x128xf32>
    %89 = arith.addf %87, %88 : vector<8x128xf32>
    %90 = arith.mulf %79, %49 : vector<8x128xf32>
    %91 = arith.mulf %71, %81 : vector<8x128xf32>
    %92 = arith.addf %90, %91 : vector<8x128xf32>
    %93 = math.tanh %92 : vector<8x128xf32>
    %94 = arith.mulf %89, %93 : vector<8x128xf32>
    %95 = arith.truncf %94 : vector<8x128xf32> to vector<8x128xbf16>
    %96 = arith.index_cast %c1_i32 : i32 to index
    %c0_45 = arith.constant 0 : index
    %c0_46 = arith.constant 0 : index
    %97 = vector.load %arg8[%96, %c0_45, %c0_46] : memref<8x8x128xbf16, #tpu.memory_space<vmem>>, vector<1x8x128xbf16>
    %98 = vector.shape_cast %97 : vector<1x8x128xbf16> to vector<8x128xbf16>
    %99 = vector.shape_cast %95 : vector<8x128xbf16> to vector<1x8x128xbf16>
    tpu.vector_store %arg8[%96, %c0_45, %c0_46], %99 {strides = array<i32>} : memref<8x8x128xbf16, #tpu.memory_space<vmem>>, vector<1x8x128xbf16>,
    %c2_i32 = arith.constant 2 : i32
    %100 = arith.index_cast %c2_i32 : i32 to index
    %c0_47 = arith.constant 0 : index
    %c0_48 = arith.constant 0 : index
    %101 = vector.load %arg11[%100, %c0_47, %c0_48] : memref<8x8x512xf32, #tpu.memory_space<vmem>>, vector<1x8x512xf32>
    %102 = vector.shape_cast %101 : vector<1x8x512xf32> to vector<8x512xf32>
    %103 = arith.truncf %94 : vector<8x128xf32> to vector<8x128xbf16>
    %c0_49 = arith.constant 0 : index
    %c0_50 = arith.constant 0 : index
    %104 = vector.load %arg4[%c0_49, %c0_50] : memref<128x512xbf16, #tpu.memory_space<vmem>>, vector<128x512xbf16>
    %cst_51 = arith.constant dense<0.000000e+00> : vector<8x512xf32>
    %105 = tpu.matmul %103, %104, %cst_51 {dimension_numbers = #tpu.dot_dimension_numbers<[1], [0], [0], [1], [0, 0, 1, 1], [], []>} : vector<8x128xbf16>, vector<128x512xbf16>, vector<8x512xf32> -> vector<8x512xf32>
    %106 = arith.addf %102, %105 : vector<8x512xf32>
    %107 = vector.extract_strided_slice %106 {offsets = [0, 0], sizes = [8, 128], strides = [1, 1]} : vector<8x512xf32> to vector<8x128xf32>
    %cst_52 = arith.constant 5.000000e-01 : f32
    %108 = vector.broadcast %cst_52 : f32 to vector<8x128xf32>
    %109 = arith.mulf %108, %107 : vector<8x128xf32>
    %110 = math.tanh %109 : vector<8x128xf32>
    %cst_53 = arith.constant 5.000000e-01 : f32
    %111 = vector.broadcast %cst_53 : f32 to vector<8x128xf32>
    %112 = arith.mulf %111, %110 : vector<8x128xf32>
    %cst_54 = arith.constant 5.000000e-01 : f32
    %113 = vector.broadcast %cst_54 : f32 to vector<8x128xf32>
    %114 = arith.addf %112, %113 : vector<8x128xf32>
    %115 = vector.extract_strided_slice %106 {offsets = [0, 128], sizes = [8, 128], strides = [1, 1]} : vector<8x512xf32> to vector<8x128xf32>
    %cst_55 = arith.constant 5.000000e-01 : f32
    %116 = vector.broadcast %cst_55 : f32 to vector<8x128xf32>
    %117 = arith.mulf %116, %115 : vector<8x128xf32>
    %118 = math.tanh %117 : vector<8x128xf32>
    %cst_56 = arith.constant 5.000000e-01 : f32
    %119 = vector.broadcast %cst_56 : f32 to vector<8x128xf32>
    %120 = arith.mulf %119, %118 : vector<8x128xf32>
    %cst_57 = arith.constant 5.000000e-01 : f32
    %121 = vector.broadcast %cst_57 : f32 to vector<8x128xf32>
    %122 = arith.addf %120, %121 : vector<8x128xf32>
    %123 = vector.extract_strided_slice %106 {offsets = [0, 256], sizes = [8, 128], strides = [1, 1]} : vector<8x512xf32> to vector<8x128xf32>
    %124 = math.tanh %123 : vector<8x128xf32>
    %125 = vector.extract_strided_slice %106 {offsets = [0, 384], sizes = [8, 128], strides = [1, 1]} : vector<8x512xf32> to vector<8x128xf32>
    %cst_58 = arith.constant 5.000000e-01 : f32
    %126 = vector.broadcast %cst_58 : f32 to vector<8x128xf32>
    %127 = arith.mulf %126, %125 : vector<8x128xf32>
    %128 = math.tanh %127 : vector<8x128xf32>
    %cst_59 = arith.constant 5.000000e-01 : f32
    %129 = vector.broadcast %cst_59 : f32 to vector<8x128xf32>
    %130 = arith.mulf %129, %128 : vector<8x128xf32>
    %cst_60 = arith.constant 5.000000e-01 : f32
    %131 = vector.broadcast %cst_60 : f32 to vector<8x128xf32>
    %132 = arith.addf %130, %131 : vector<8x128xf32>
    %133 = arith.mulf %122, %92 : vector<8x128xf32>
    %134 = arith.mulf %114, %124 : vector<8x128xf32>
    %135 = arith.addf %133, %134 : vector<8x128xf32>
    %136 = math.tanh %135 : vector<8x128xf32>
    %137 = arith.mulf %132, %136 : vector<8x128xf32>
    %138 = arith.truncf %137 : vector<8x128xf32> to vector<8x128xbf16>
    %139 = arith.index_cast %c2_i32 : i32 to index
    %c0_61 = arith.constant 0 : index
    %c0_62 = arith.constant 0 : index
    %140 = vector.load %arg8[%139, %c0_61, %c0_62] : memref<8x8x128xbf16, #tpu.memory_space<vmem>>, vector<1x8x128xbf16>
    %141 = vector.shape_cast %140 : vector<1x8x128xbf16> to vector<8x128xbf16>
    %142 = vector.shape_cast %138 : vector<8x128xbf16> to vector<1x8x128xbf16>
    tpu.vector_store %arg8[%139, %c0_61, %c0_62], %142 {strides = array<i32>} : memref<8x8x128xbf16, #tpu.memory_space<vmem>>, vector<1x8x128xbf16>,
    %c3_i32 = arith.constant 3 : i32
    %143 = arith.index_cast %c3_i32 : i32 to index
    %c0_63 = arith.constant 0 : index
    %c0_64 = arith.constant 0 : index
    %144 = vector.load %arg11[%143, %c0_63, %c0_64] : memref<8x8x512xf32, #tpu.memory_space<vmem>>, vector<1x8x512xf32>
    %145 = vector.shape_cast %144 : vector<1x8x512xf32> to vector<8x512xf32>
    %146 = arith.truncf %137 : vector<8x128xf32> to vector<8x128xbf16>
    %c0_65 = arith.constant 0 : index
    %c0_66 = arith.constant 0 : index
    %147 = vector.load %arg4[%c0_65, %c0_66] : memref<128x512xbf16, #tpu.memory_space<vmem>>, vector<128x512xbf16>
    %cst_67 = arith.constant dense<0.000000e+00> : vector<8x512xf32>
    %148 = tpu.matmul %146, %147, %cst_67 {dimension_numbers = #tpu.dot_dimension_numbers<[1], [0], [0], [1], [0, 0, 1, 1], [], []>} : vector<8x128xbf16>, vector<128x512xbf16>, vector<8x512xf32> -> vector<8x512xf32>
    %149 = arith.addf %145, %148 : vector<8x512xf32>
    %150 = vector.extract_strided_slice %149 {offsets = [0, 0], sizes = [8, 128], strides = [1, 1]} : vector<8x512xf32> to vector<8x128xf32>
    %cst_68 = arith.constant 5.000000e-01 : f32
    %151 = vector.broadcast %cst_68 : f32 to vector<8x128xf32>
    %152 = arith.mulf %151, %150 : vector<8x128xf32>
    %153 = math.tanh %152 : vector<8x128xf32>
    %cst_69 = arith.constant 5.000000e-01 : f32
    %154 = vector.broadcast %cst_69 : f32 to vector<8x128xf32>
    %155 = arith.mulf %154, %153 : vector<8x128xf32>
    %cst_70 = arith.constant 5.000000e-01 : f32
    %156 = vector.broadcast %cst_70 : f32 to vector<8x128xf32>
    %157 = arith.addf %155, %156 : vector<8x128xf32>
    %158 = vector.extract_strided_slice %149 {offsets = [0, 128], sizes = [8, 128], strides = [1, 1]} : vector<8x512xf32> to vector<8x128xf32>
    %cst_71 = arith.constant 5.000000e-01 : f32
    %159 = vector.broadcast %cst_71 : f32 to vector<8x128xf32>
    %160 = arith.mulf %159, %158 : vector<8x128xf32>
    %161 = math.tanh %160 : vector<8x128xf32>
    %cst_72 = arith.constant 5.000000e-01 : f32
    %162 = vector.broadcast %cst_72 : f32 to vector<8x128xf32>
    %163 = arith.mulf %162, %161 : vector<8x128xf32>
    %cst_73 = arith.constant 5.000000e-01 : f32
    %164 = vector.broadcast %cst_73 : f32 to vector<8x128xf32>
    %165 = arith.addf %163, %164 : vector<8x128xf32>
    %166 = vector.extract_strided_slice %149 {offsets = [0, 256], sizes = [8, 128], strides = [1, 1]} : vector<8x512xf32> to vector<8x128xf32>
    %167 = math.tanh %166 : vector<8x128xf32>
    %168 = vector.extract_strided_slice %149 {offsets = [0, 384], sizes = [8, 128], strides = [1, 1]} : vector<8x512xf32> to vector<8x128xf32>
    %cst_74 = arith.constant 5.000000e-01 : f32
    %169 = vector.broadcast %cst_74 : f32 to vector<8x128xf32>
    %170 = arith.mulf %169, %168 : vector<8x128xf32>
    %171 = math.tanh %170 : vector<8x128xf32>
    %cst_75 = arith.constant 5.000000e-01 : f32
    %172 = vector.broadcast %cst_75 : f32 to vector<8x128xf32>
    %173 = arith.mulf %172, %171 : vector<8x128xf32>
    %cst_76 = arith.constant 5.000000e-01 : f32
    %174 = vector.broadcast %cst_76 : f32 to vector<8x128xf32>
    %175 = arith.addf %173, %174 : vector<8x128xf32>
    %176 = arith.mulf %165, %135 : vector<8x128xf32>
    %177 = arith.mulf %157, %167 : vector<8x128xf32>
    %178 = arith.addf %176, %177 : vector<8x128xf32>
    %179 = math.tanh %178 : vector<8x128xf32>
    %180 = arith.mulf %175, %179 : vector<8x128xf32>
    %181 = arith.truncf %180 : vector<8x128xf32> to vector<8x128xbf16>
    %182 = arith.index_cast %c3_i32 : i32 to index
    %c0_77 = arith.constant 0 : index
    %c0_78 = arith.constant 0 : index
    %183 = vector.load %arg8[%182, %c0_77, %c0_78] : memref<8x8x128xbf16, #tpu.memory_space<vmem>>, vector<1x8x128xbf16>
    %184 = vector.shape_cast %183 : vector<1x8x128xbf16> to vector<8x128xbf16>
    %185 = vector.shape_cast %181 : vector<8x128xbf16> to vector<1x8x128xbf16>
    tpu.vector_store %arg8[%182, %c0_77, %c0_78], %185 {strides = array<i32>} : memref<8x8x128xbf16, #tpu.memory_space<vmem>>, vector<1x8x128xbf16>,
    %c4_i32 = arith.constant 4 : i32
    %186 = arith.index_cast %c4_i32 : i32 to index
    %c0_79 = arith.constant 0 : index
    %c0_80 = arith.constant 0 : index
    %187 = vector.load %arg11[%186, %c0_79, %c0_80] : memref<8x8x512xf32, #tpu.memory_space<vmem>>, vector<1x8x512xf32>
    %188 = vector.shape_cast %187 : vector<1x8x512xf32> to vector<8x512xf32>
    %189 = arith.truncf %180 : vector<8x128xf32> to vector<8x128xbf16>
    %c0_81 = arith.constant 0 : index
    %c0_82 = arith.constant 0 : index
    %190 = vector.load %arg4[%c0_81, %c0_82] : memref<128x512xbf16, #tpu.memory_space<vmem>>, vector<128x512xbf16>
    %cst_83 = arith.constant dense<0.000000e+00> : vector<8x512xf32>
    %191 = tpu.matmul %189, %190, %cst_83 {dimension_numbers = #tpu.dot_dimension_numbers<[1], [0], [0], [1], [0, 0, 1, 1], [], []>} : vector<8x128xbf16>, vector<128x512xbf16>, vector<8x512xf32> -> vector<8x512xf32>
    %192 = arith.addf %188, %191 : vector<8x512xf32>
    %193 = vector.extract_strided_slice %192 {offsets = [0, 0], sizes = [8, 128], strides = [1, 1]} : vector<8x512xf32> to vector<8x128xf32>
    %cst_84 = arith.constant 5.000000e-01 : f32
    %194 = vector.broadcast %cst_84 : f32 to vector<8x128xf32>
    %195 = arith.mulf %194, %193 : vector<8x128xf32>
    %196 = math.tanh %195 : vector<8x128xf32>
    %cst_85 = arith.constant 5.000000e-01 : f32
    %197 = vector.broadcast %cst_85 : f32 to vector<8x128xf32>
    %198 = arith.mulf %197, %196 : vector<8x128xf32>
    %cst_86 = arith.constant 5.000000e-01 : f32
    %199 = vector.broadcast %cst_86 : f32 to vector<8x128xf32>
    %200 = arith.addf %198, %199 : vector<8x128xf32>
    %201 = vector.extract_strided_slice %192 {offsets = [0, 128], sizes = [8, 128], strides = [1, 1]} : vector<8x512xf32> to vector<8x128xf32>
    %cst_87 = arith.constant 5.000000e-01 : f32
    %202 = vector.broadcast %cst_87 : f32 to vector<8x128xf32>
    %203 = arith.mulf %202, %201 : vector<8x128xf32>
    %204 = math.tanh %203 : vector<8x128xf32>
    %cst_88 = arith.constant 5.000000e-01 : f32
    %205 = vector.broadcast %cst_88 : f32 to vector<8x128xf32>
    %206 = arith.mulf %205, %204 : vector<8x128xf32>
    %cst_89 = arith.constant 5.000000e-01 : f32
    %207 = vector.broadcast %cst_89 : f32 to vector<8x128xf32>
    %208 = arith.addf %206, %207 : vector<8x128xf32>
    %209 = vector.extract_strided_slice %192 {offsets = [0, 256], sizes = [8, 128], strides = [1, 1]} : vector<8x512xf32> to vector<8x128xf32>
    %210 = math.tanh %209 : vector<8x128xf32>
    %211 = vector.extract_strided_slice %192 {offsets = [0, 384], sizes = [8, 128], strides = [1, 1]} : vector<8x512xf32> to vector<8x128xf32>
    %cst_90 = arith.constant 5.000000e-01 : f32
    %212 = vector.broadcast %cst_90 : f32 to vector<8x128xf32>
    %213 = arith.mulf %212, %211 : vector<8x128xf32>
    %214 = math.tanh %213 : vector<8x128xf32>
    %cst_91 = arith.constant 5.000000e-01 : f32
    %215 = vector.broadcast %cst_91 : f32 to vector<8x128xf32>
    %216 = arith.mulf %215, %214 : vector<8x128xf32>
    %cst_92 = arith.constant 5.000000e-01 : f32
    %217 = vector.broadcast %cst_92 : f32 to vector<8x128xf32>
    %218 = arith.addf %216, %217 : vector<8x128xf32>
    %219 = arith.mulf %208, %178 : vector<8x128xf32>
    %220 = arith.mulf %200, %210 : vector<8x128xf32>
    %221 = arith.addf %219, %220 : vector<8x128xf32>
    %222 = math.tanh %221 : vector<8x128xf32>
    %223 = arith.mulf %218, %222 : vector<8x128xf32>
    %224 = arith.truncf %223 : vector<8x128xf32> to vector<8x128xbf16>
    %225 = arith.index_cast %c4_i32 : i32 to index
    %c0_93 = arith.constant 0 : index
    %c0_94 = arith.constant 0 : index
    %226 = vector.load %arg8[%225, %c0_93, %c0_94] : memref<8x8x128xbf16, #tpu.memory_space<vmem>>, vector<1x8x128xbf16>
    %227 = vector.shape_cast %226 : vector<1x8x128xbf16> to vector<8x128xbf16>
    %228 = vector.shape_cast %224 : vector<8x128xbf16> to vector<1x8x128xbf16>
    tpu.vector_store %arg8[%225, %c0_93, %c0_94], %228 {strides = array<i32>} : memref<8x8x128xbf16, #tpu.memory_space<vmem>>, vector<1x8x128xbf16>,
    %c5_i32 = arith.constant 5 : i32
    %229 = arith.index_cast %c5_i32 : i32 to index
    %c0_95 = arith.constant 0 : index
    %c0_96 = arith.constant 0 : index
    %230 = vector.load %arg11[%229, %c0_95, %c0_96] : memref<8x8x512xf32, #tpu.memory_space<vmem>>, vector<1x8x512xf32>
    %231 = vector.shape_cast %230 : vector<1x8x512xf32> to vector<8x512xf32>
    %232 = arith.truncf %223 : vector<8x128xf32> to vector<8x128xbf16>
    %c0_97 = arith.constant 0 : index
    %c0_98 = arith.constant 0 : index
    %233 = vector.load %arg4[%c0_97, %c0_98] : memref<128x512xbf16, #tpu.memory_space<vmem>>, vector<128x512xbf16>
    %cst_99 = arith.constant dense<0.000000e+00> : vector<8x512xf32>
    %234 = tpu.matmul %232, %233, %cst_99 {dimension_numbers = #tpu.dot_dimension_numbers<[1], [0], [0], [1], [0, 0, 1, 1], [], []>} : vector<8x128xbf16>, vector<128x512xbf16>, vector<8x512xf32> -> vector<8x512xf32>
    %235 = arith.addf %231, %234 : vector<8x512xf32>
    %236 = vector.extract_strided_slice %235 {offsets = [0, 0], sizes = [8, 128], strides = [1, 1]} : vector<8x512xf32> to vector<8x128xf32>
    %cst_100 = arith.constant 5.000000e-01 : f32
    %237 = vector.broadcast %cst_100 : f32 to vector<8x128xf32>
    %238 = arith.mulf %237, %236 : vector<8x128xf32>
    %239 = math.tanh %238 : vector<8x128xf32>
    %cst_101 = arith.constant 5.000000e-01 : f32
    %240 = vector.broadcast %cst_101 : f32 to vector<8x128xf32>
    %241 = arith.mulf %240, %239 : vector<8x128xf32>
    %cst_102 = arith.constant 5.000000e-01 : f32
    %242 = vector.broadcast %cst_102 : f32 to vector<8x128xf32>
    %243 = arith.addf %241, %242 : vector<8x128xf32>
    %244 = vector.extract_strided_slice %235 {offsets = [0, 128], sizes = [8, 128], strides = [1, 1]} : vector<8x512xf32> to vector<8x128xf32>
    %cst_103 = arith.constant 5.000000e-01 : f32
    %245 = vector.broadcast %cst_103 : f32 to vector<8x128xf32>
    %246 = arith.mulf %245, %244 : vector<8x128xf32>
    %247 = math.tanh %246 : vector<8x128xf32>
    %cst_104 = arith.constant 5.000000e-01 : f32
    %248 = vector.broadcast %cst_104 : f32 to vector<8x128xf32>
    %249 = arith.mulf %248, %247 : vector<8x128xf32>
    %cst_105 = arith.constant 5.000000e-01 : f32
    %250 = vector.broadcast %cst_105 : f32 to vector<8x128xf32>
    %251 = arith.addf %249, %250 : vector<8x128xf32>
    %252 = vector.extract_strided_slice %235 {offsets = [0, 256], sizes = [8, 128], strides = [1, 1]} : vector<8x512xf32> to vector<8x128xf32>
    %253 = math.tanh %252 : vector<8x128xf32>
    %254 = vector.extract_strided_slice %235 {offsets = [0, 384], sizes = [8, 128], strides = [1, 1]} : vector<8x512xf32> to vector<8x128xf32>
    %cst_106 = arith.constant 5.000000e-01 : f32
    %255 = vector.broadcast %cst_106 : f32 to vector<8x128xf32>
    %256 = arith.mulf %255, %254 : vector<8x128xf32>
    %257 = math.tanh %256 : vector<8x128xf32>
    %cst_107 = arith.constant 5.000000e-01 : f32
    %258 = vector.broadcast %cst_107 : f32 to vector<8x128xf32>
    %259 = arith.mulf %258, %257 : vector<8x128xf32>
    %cst_108 = arith.constant 5.000000e-01 : f32
    %260 = vector.broadcast %cst_108 : f32 to vector<8x128xf32>
    %261 = arith.addf %259, %260 : vector<8x128xf32>
    %262 = arith.mulf %251, %221 : vector<8x128xf32>
    %263 = arith.mulf %243, %253 : vector<8x128xf32>
    %264 = arith.addf %262, %263 : vector<8x128xf32>
    %265 = math.tanh %264 : vector<8x128xf32>
    %266 = arith.mulf %261, %265 : vector<8x128xf32>
    %267 = arith.truncf %266 : vector<8x128xf32> to vector<8x128xbf16>
    %268 = arith.index_cast %c5_i32 : i32 to index
    %c0_109 = arith.constant 0 : index
    %c0_110 = arith.constant 0 : index
    %269 = vector.load %arg8[%268, %c0_109, %c0_110] : memref<8x8x128xbf16, #tpu.memory_space<vmem>>, vector<1x8x128xbf16>
    %270 = vector.shape_cast %269 : vector<1x8x128xbf16> to vector<8x128xbf16>
    %271 = vector.shape_cast %267 : vector<8x128xbf16> to vector<1x8x128xbf16>
    tpu.vector_store %arg8[%268, %c0_109, %c0_110], %271 {strides = array<i32>} : memref<8x8x128xbf16, #tpu.memory_space<vmem>>, vector<1x8x128xbf16>,
    %c6_i32 = arith.constant 6 : i32
    %272 = arith.index_cast %c6_i32 : i32 to index
    %c0_111 = arith.constant 0 : index
    %c0_112 = arith.constant 0 : index
    %273 = vector.load %arg11[%272, %c0_111, %c0_112] : memref<8x8x512xf32, #tpu.memory_space<vmem>>, vector<1x8x512xf32>
    %274 = vector.shape_cast %273 : vector<1x8x512xf32> to vector<8x512xf32>
    %275 = arith.truncf %266 : vector<8x128xf32> to vector<8x128xbf16>
    %c0_113 = arith.constant 0 : index
    %c0_114 = arith.constant 0 : index
    %276 = vector.load %arg4[%c0_113, %c0_114] : memref<128x512xbf16, #tpu.memory_space<vmem>>, vector<128x512xbf16>
    %cst_115 = arith.constant dense<0.000000e+00> : vector<8x512xf32>
    %277 = tpu.matmul %275, %276, %cst_115 {dimension_numbers = #tpu.dot_dimension_numbers<[1], [0], [0], [1], [0, 0, 1, 1], [], []>} : vector<8x128xbf16>, vector<128x512xbf16>, vector<8x512xf32> -> vector<8x512xf32>
    %278 = arith.addf %274, %277 : vector<8x512xf32>
    %279 = vector.extract_strided_slice %278 {offsets = [0, 0], sizes = [8, 128], strides = [1, 1]} : vector<8x512xf32> to vector<8x128xf32>
    %cst_116 = arith.constant 5.000000e-01 : f32
    %280 = vector.broadcast %cst_116 : f32 to vector<8x128xf32>
    %281 = arith.mulf %280, %279 : vector<8x128xf32>
    %282 = math.tanh %281 : vector<8x128xf32>
    %cst_117 = arith.constant 5.000000e-01 : f32
    %283 = vector.broadcast %cst_117 : f32 to vector<8x128xf32>
    %284 = arith.mulf %283, %282 : vector<8x128xf32>
    %cst_118 = arith.constant 5.000000e-01 : f32
    %285 = vector.broadcast %cst_118 : f32 to vector<8x128xf32>
    %286 = arith.addf %284, %285 : vector<8x128xf32>
    %287 = vector.extract_strided_slice %278 {offsets = [0, 128], sizes = [8, 128], strides = [1, 1]} : vector<8x512xf32> to vector<8x128xf32>
    %cst_119 = arith.constant 5.000000e-01 : f32
    %288 = vector.broadcast %cst_119 : f32 to vector<8x128xf32>
    %289 = arith.mulf %288, %287 : vector<8x128xf32>
    %290 = math.tanh %289 : vector<8x128xf32>
    %cst_120 = arith.constant 5.000000e-01 : f32
    %291 = vector.broadcast %cst_120 : f32 to vector<8x128xf32>
    %292 = arith.mulf %291, %290 : vector<8x128xf32>
    %cst_121 = arith.constant 5.000000e-01 : f32
    %293 = vector.broadcast %cst_121 : f32 to vector<8x128xf32>
    %294 = arith.addf %292, %293 : vector<8x128xf32>
    %295 = vector.extract_strided_slice %278 {offsets = [0, 256], sizes = [8, 128], strides = [1, 1]} : vector<8x512xf32> to vector<8x128xf32>
    %296 = math.tanh %295 : vector<8x128xf32>
    %297 = vector.extract_strided_slice %278 {offsets = [0, 384], sizes = [8, 128], strides = [1, 1]} : vector<8x512xf32> to vector<8x128xf32>
    %cst_122 = arith.constant 5.000000e-01 : f32
    %298 = vector.broadcast %cst_122 : f32 to vector<8x128xf32>
    %299 = arith.mulf %298, %297 : vector<8x128xf32>
    %300 = math.tanh %299 : vector<8x128xf32>
    %cst_123 = arith.constant 5.000000e-01 : f32
    %301 = vector.broadcast %cst_123 : f32 to vector<8x128xf32>
    %302 = arith.mulf %301, %300 : vector<8x128xf32>
    %cst_124 = arith.constant 5.000000e-01 : f32
    %303 = vector.broadcast %cst_124 : f32 to vector<8x128xf32>
    %304 = arith.addf %302, %303 : vector<8x128xf32>
    %305 = arith.mulf %294, %264 : vector<8x128xf32>
    %306 = arith.mulf %286, %296 : vector<8x128xf32>
    %307 = arith.addf %305, %306 : vector<8x128xf32>
    %308 = math.tanh %307 : vector<8x128xf32>
    %309 = arith.mulf %304, %308 : vector<8x128xf32>
    %310 = arith.truncf %309 : vector<8x128xf32> to vector<8x128xbf16>
    %311 = arith.index_cast %c6_i32 : i32 to index
    %c0_125 = arith.constant 0 : index
    %c0_126 = arith.constant 0 : index
    %312 = vector.load %arg8[%311, %c0_125, %c0_126] : memref<8x8x128xbf16, #tpu.memory_space<vmem>>, vector<1x8x128xbf16>
    %313 = vector.shape_cast %312 : vector<1x8x128xbf16> to vector<8x128xbf16>
    %314 = vector.shape_cast %310 : vector<8x128xbf16> to vector<1x8x128xbf16>
    tpu.vector_store %arg8[%311, %c0_125, %c0_126], %314 {strides = array<i32>} : memref<8x8x128xbf16, #tpu.memory_space<vmem>>, vector<1x8x128xbf16>,
    %c7_i32 = arith.constant 7 : i32
    %315 = arith.index_cast %c7_i32 : i32 to index
    %c0_127 = arith.constant 0 : index
    %c0_128 = arith.constant 0 : index
    %316 = vector.load %arg11[%315, %c0_127, %c0_128] : memref<8x8x512xf32, #tpu.memory_space<vmem>>, vector<1x8x512xf32>
    %317 = vector.shape_cast %316 : vector<1x8x512xf32> to vector<8x512xf32>
    %318 = arith.truncf %309 : vector<8x128xf32> to vector<8x128xbf16>
    %c0_129 = arith.constant 0 : index
    %c0_130 = arith.constant 0 : index
    %319 = vector.load %arg4[%c0_129, %c0_130] : memref<128x512xbf16, #tpu.memory_space<vmem>>, vector<128x512xbf16>
    %cst_131 = arith.constant dense<0.000000e+00> : vector<8x512xf32>
    %320 = tpu.matmul %318, %319, %cst_131 {dimension_numbers = #tpu.dot_dimension_numbers<[1], [0], [0], [1], [0, 0, 1, 1], [], []>} : vector<8x128xbf16>, vector<128x512xbf16>, vector<8x512xf32> -> vector<8x512xf32>
    %321 = arith.addf %317, %320 : vector<8x512xf32>
    %322 = vector.extract_strided_slice %321 {offsets = [0, 0], sizes = [8, 128], strides = [1, 1]} : vector<8x512xf32> to vector<8x128xf32>
    %cst_132 = arith.constant 5.000000e-01 : f32
    %323 = vector.broadcast %cst_132 : f32 to vector<8x128xf32>
    %324 = arith.mulf %323, %322 : vector<8x128xf32>
    %325 = math.tanh %324 : vector<8x128xf32>
    %cst_133 = arith.constant 5.000000e-01 : f32
    %326 = vector.broadcast %cst_133 : f32 to vector<8x128xf32>
    %327 = arith.mulf %326, %325 : vector<8x128xf32>
    %cst_134 = arith.constant 5.000000e-01 : f32
    %328 = vector.broadcast %cst_134 : f32 to vector<8x128xf32>
    %329 = arith.addf %327, %328 : vector<8x128xf32>
    %330 = vector.extract_strided_slice %321 {offsets = [0, 128], sizes = [8, 128], strides = [1, 1]} : vector<8x512xf32> to vector<8x128xf32>
    %cst_135 = arith.constant 5.000000e-01 : f32
    %331 = vector.broadcast %cst_135 : f32 to vector<8x128xf32>
    %332 = arith.mulf %331, %330 : vector<8x128xf32>
    %333 = math.tanh %332 : vector<8x128xf32>
    %cst_136 = arith.constant 5.000000e-01 : f32
    %334 = vector.broadcast %cst_136 : f32 to vector<8x128xf32>
    %335 = arith.mulf %334, %333 : vector<8x128xf32>
    %cst_137 = arith.constant 5.000000e-01 : f32
    %336 = vector.broadcast %cst_137 : f32 to vector<8x128xf32>
    %337 = arith.addf %335, %336 : vector<8x128xf32>
    %338 = vector.extract_strided_slice %321 {offsets = [0, 256], sizes = [8, 128], strides = [1, 1]} : vector<8x512xf32> to vector<8x128xf32>
    %339 = math.tanh %338 : vector<8x128xf32>
    %340 = vector.extract_strided_slice %321 {offsets = [0, 384], sizes = [8, 128], strides = [1, 1]} : vector<8x512xf32> to vector<8x128xf32>
    %cst_138 = arith.constant 5.000000e-01 : f32
    %341 = vector.broadcast %cst_138 : f32 to vector<8x128xf32>
    %342 = arith.mulf %341, %340 : vector<8x128xf32>
    %343 = math.tanh %342 : vector<8x128xf32>
    %cst_139 = arith.constant 5.000000e-01 : f32
    %344 = vector.broadcast %cst_139 : f32 to vector<8x128xf32>
    %345 = arith.mulf %344, %343 : vector<8x128xf32>
    %cst_140 = arith.constant 5.000000e-01 : f32
    %346 = vector.broadcast %cst_140 : f32 to vector<8x128xf32>
    %347 = arith.addf %345, %346 : vector<8x128xf32>
    %348 = arith.mulf %337, %307 : vector<8x128xf32>
    %349 = arith.mulf %329, %339 : vector<8x128xf32>
    %350 = arith.addf %348, %349 : vector<8x128xf32>
    %351 = math.tanh %350 : vector<8x128xf32>
    %352 = arith.mulf %347, %351 : vector<8x128xf32>
    %353 = arith.truncf %352 : vector<8x128xf32> to vector<8x128xbf16>
    %354 = arith.index_cast %c7_i32 : i32 to index
    %c0_141 = arith.constant 0 : index
    %c0_142 = arith.constant 0 : index
    %355 = vector.load %arg8[%354, %c0_141, %c0_142] : memref<8x8x128xbf16, #tpu.memory_space<vmem>>, vector<1x8x128xbf16>
    %356 = vector.shape_cast %355 : vector<1x8x128xbf16> to vector<8x128xbf16>
    %357 = vector.shape_cast %353 : vector<8x128xbf16> to vector<1x8x128xbf16>
    tpu.vector_store %arg8[%354, %c0_141, %c0_142], %357 {strides = array<i32>} : memref<8x8x128xbf16, #tpu.memory_space<vmem>>, vector<1x8x128xbf16>,
    %c8_i32 = arith.constant 8 : i32
    %c0_143 = arith.constant 0 : index
    %c0_144 = arith.constant 0 : index
    %358 = vector.load %arg12[%c0_143, %c0_144] : memref<8x128xf32, #tpu.memory_space<vmem>>, vector<8x128xf32>
    tpu.vector_store %arg12[%c0_143, %c0_144], %352 {strides = array<i32>} : memref<8x128xf32, #tpu.memory_space<vmem>>, vector<8x128xf32>,
    %c0_145 = arith.constant 0 : index
    %c0_146 = arith.constant 0 : index
    %359 = vector.load %arg13[%c0_145, %c0_146] : memref<8x128xf32, #tpu.memory_space<vmem>>, vector<8x128xf32>
    tpu.vector_store %arg13[%c0_145, %c0_146], %350 {strides = array<i32>} : memref<8x128xf32, #tpu.memory_space<vmem>>, vector<8x128xf32>,
    %c0_i32_147 = arith.constant 0 : i32
    %360 = arith.cmpi eq, %arg1, %c0_i32_147 : i32
    %361 = arith.extui %360 : i1 to i32
    %c0_i32_148 = arith.constant 0 : i32
    %362 = arith.cmpi ne, %361, %c0_i32_148 : i32
    scf.if %362 {
      %c0_149 = arith.constant 0 : index
      %c0_150 = arith.constant 0 : index
      %363 = vector.load %arg12[%c0_149, %c0_150] : memref<8x128xf32, #tpu.memory_space<vmem>>, vector<8x128xf32>
      %c0_151 = arith.constant 0 : index
      %c0_152 = arith.constant 0 : index
      %364 = vector.load %arg9[%c0_151, %c0_152] : memref<8x128xf32, #tpu.memory_space<vmem>>, vector<8x128xf32>
      tpu.vector_store %arg9[%c0_151, %c0_152], %363 {strides = array<i32>} : memref<8x128xf32, #tpu.memory_space<vmem>>, vector<8x128xf32>,
      %c0_153 = arith.constant 0 : index
      %c0_154 = arith.constant 0 : index
      %365 = vector.load %arg13[%c0_153, %c0_154] : memref<8x128xf32, #tpu.memory_space<vmem>>, vector<8x128xf32>
      %c0_155 = arith.constant 0 : index
      %c0_156 = arith.constant 0 : index
      %366 = vector.load %arg10[%c0_155, %c0_156] : memref<8x128xf32, #tpu.memory_space<vmem>>, vector<8x128xf32>
      tpu.vector_store %arg10[%c0_155, %c0_156], %365 {strides = array<i32>} : memref<8x128xf32, #tpu.memory_space<vmem>>, vector<8x128xf32>,
    } else {
    }
    return
  }
  func.func @transform_0(%arg0: i32, %arg1: i32) -> (i32, i32, i32) {
    %c0_i32 = arith.constant 0 : i32
    %c0_i32_0 = arith.constant 0 : i32
    return %arg1, %arg0, %c0_i32 : i32, i32, i32
  }
  func.func @transform_1(%arg0: i32, %arg1: i32) -> (i32, i32) {
    %c0_i32 = arith.constant 0 : i32
    %c0_i32_0 = arith.constant 0 : i32
    %c0_i32_1 = arith.constant 0 : i32
    return %c0_i32, %c0_i32_0 : i32, i32
  }
  func.func @transform_2(%arg0: i32, %arg1: i32) -> (i32, i32) {
    %c0_i32 = arith.constant 0 : i32
    %c0_i32_0 = arith.constant 0 : i32
    %c0_i32_1 = arith.constant 0 : i32
    return %c0_i32, %c0_i32_0 : i32, i32
  }
  func.func @transform_3(%arg0: i32, %arg1: i32) -> (i32, i32) {
    %c0_i32 = arith.constant 0 : i32
    %c0_i32_0 = arith.constant 0 : i32
    %c0_i32_1 = arith.constant 0 : i32
    return %c0_i32, %c0_i32_0 : i32, i32
  }
  func.func @transform_4(%arg0: i32, %arg1: i32) -> (i32, i32) {
    %c0_i32 = arith.constant 0 : i32
    %c0_i32_0 = arith.constant 0 : i32
    return %arg0, %c0_i32 : i32, i32
  }
  func.func @transform_5(%arg0: i32, %arg1: i32) -> (i32, i32) {
    %c0_i32 = arith.constant 0 : i32
    %c0_i32_0 = arith.constant 0 : i32
    return %arg0, %c0_i32 : i32, i32
  }
  func.func @transform_6(%arg0: i32, %arg1: i32) -> (i32, i32, i32) {
    %c0_i32 = arith.constant 0 : i32
    %c0_i32_0 = arith.constant 0 : i32
    return %arg1, %arg0, %c0_i32 : i32, i32, i32
  }
  func.func @transform_7(%arg0: i32, %arg1: i32) -> (i32, i32) {
    %c0_i32 = arith.constant 0 : i32
    %c0_i32_0 = arith.constant 0 : i32
    return %arg0, %c0_i32 : i32, i32
  }
  func.func @transform_8(%arg0: i32, %arg1: i32) -> (i32, i32) {
    %c0_i32 = arith.constant 0 : i32
    %c0_i32_0 = arith.constant 0 : i32
    return %arg0, %c0_i32 : i32, i32
  }
}

module attributes {stable_mosaic.version = 11 : i64} {
  func.func @_lstm_kernel(%arg0: i32, %arg1: i32, %arg2: memref<8x8x128xbf16, #tpu.memory_space<vmem>>, %arg3: memref<128x512xbf16, #tpu.memory_space<vmem>>, %arg4: memref<128x512xbf16, #tpu.memory_space<vmem>>, %arg5: memref<1x512xf32, #tpu.memory_space<vmem>>, %arg6: memref<8x128xf32, #tpu.memory_space<vmem>>, %arg7: memref<8x128xf32, #tpu.memory_space<vmem>>, %arg8: memref<8x8x128xbf16, #tpu.memory_space<vmem>>, %arg9: memref<8x128xf32, #tpu.memory_space<vmem>>, %arg10: memref<8x128xf32, #tpu.memory_space<vmem>>, %arg11: memref<8x8x512xf32, #tpu.memory_space<vmem>>, %arg12: memref<8x128xf32, #tpu.memory_space<vmem>>, %arg13: memref<8x128xf32, #tpu.memory_space<vmem>>) attributes {dimension_semantics = [#tpu.dimension_semantics<parallel>, #tpu.dimension_semantics<arbitrary>], iteration_bounds = array<i64: 1, 1>, scalar_prefetch = 0 : i64, scratch_operands = 3 : i64, tpu.core_type = #tpu.core_type<tc>, window_params = [{transform_indices = @transform_0, window_bounds = array<i64: 8, 8, 128>}, {pipeline_mode = #tpu.pipeline_mode<synchronous>, transform_indices = @transform_1, window_bounds = array<i64: 128, 512>}, {pipeline_mode = #tpu.pipeline_mode<synchronous>, transform_indices = @transform_2, window_bounds = array<i64: 128, 512>}, {pipeline_mode = #tpu.pipeline_mode<synchronous>, transform_indices = @transform_3, window_bounds = array<i64: 1, 512>}, {transform_indices = @transform_4, window_bounds = array<i64: 8, 128>}, {transform_indices = @transform_5, window_bounds = array<i64: 8, 128>}, {transform_indices = @transform_6, window_bounds = array<i64: 8, 8, 128>}, {transform_indices = @transform_7, window_bounds = array<i64: 8, 128>}, {transform_indices = @transform_8, window_bounds = array<i64: 8, 128>}]} {
    %c0_i32 = arith.constant 0 : i32
    %0 = arith.cmpi eq, %arg1, %c0_i32 : i32
    %1 = arith.extui %0 : i1 to i32
    %c0_i32_0 = arith.constant 0 : i32
    %2 = arith.cmpi ne, %1, %c0_i32_0 : i32
    scf.if %2 {
      %c0_149 = arith.constant 0 : index
      %c0_150 = arith.constant 0 : index
      %363 = vector.load %arg6[%c0_149, %c0_150] : memref<8x128xf32, #tpu.memory_space<vmem>>, vector<8x128xf32>
      %c0_151 = arith.constant 0 : index
      %c0_152 = arith.constant 0 : index
      %364 = vector.load %arg12[%c0_151, %c0_152] : memref<8x128xf32, #tpu.memory_space<vmem>>, vector<8x128xf32>
      tpu.vector_store %arg12[%c0_151, %c0_152], %363 {strides = array<i32>} : memref<8x128xf32, #tpu.memory_space<vmem>>, vector<8x128xf32>,
      %c0_153 = arith.constant 0 : index
      %c0_154 = arith.constant 0 : index
      %365 = vector.load %arg7[%c0_153, %c0_154] : memref<8x128xf32, #tpu.memory_space<vmem>>, vector<8x128xf32>
      %c0_155 = arith.constant 0 : index
      %c0_156 = arith.constant 0 : index
      %366 = vector.load %arg13[%c0_155, %c0_156] : memref<8x128xf32, #tpu.memory_space<vmem>>, vector<8x128xf32>
      tpu.vector_store %arg13[%c0_155, %c0_156], %365 {strides = array<i32>} : memref<8x128xf32, #tpu.memory_space<vmem>>, vector<8x128xf32>,
    } else {
    }
    %c0 = arith.constant 0 : index
    %c0_1 = arith.constant 0 : index
    %c0_2 = arith.constant 0 : index
    %3 = vector.load %arg2[%c0, %c0_1, %c0_2] : memref<8x8x128xbf16, #tpu.memory_space<vmem>>, vector<8x8x128xbf16>
    %4 = vector.shape_cast %3 : vector<8x8x128xbf16> to vector<64x128xbf16>
    %c0_3 = arith.constant 0 : index
    %c0_4 = arith.constant 0 : index
    %5 = vector.load %arg3[%c0_3, %c0_4] : memref<128x512xbf16, #tpu.memory_space<vmem>>, vector<128x512xbf16>
    %cst = arith.constant dense<0.000000e+00> : vector<64x512xf32>
    %6 = tpu.matmul %4, %5, %cst {dimension_numbers = #tpu.dot_dimension_numbers<[1], [0], [0], [1], [0, 0, 1, 1], [], []>} : vector<64x128xbf16>, vector<128x512xbf16>, vector<64x512xf32> -> vector<64x512xf32>
    %c0_5 = arith.constant 0 : index
    %c0_6 = arith.constant 0 : index
    %7 = vector.load %arg5[%c0_5, %c0_6] : memref<1x512xf32, #tpu.memory_space<vmem>>, vector<1x512xf32>
    %8 = vector.broadcast %7 : vector<1x512xf32> to vector<64x512xf32>
    %9 = arith.addf %6, %8 : vector<64x512xf32>
    %10 = vector.shape_cast %9 : vector<64x512xf32> to vector<8x8x512xf32>
    %c0_7 = arith.constant 0 : index
    %c0_8 = arith.constant 0 : index
    %c0_9 = arith.constant 0 : index
    %11 = vector.load %arg11[%c0_7, %c0_8, %c0_9] : memref<8x8x512xf32, #tpu.memory_space<vmem>>, vector<8x8x512xf32>
    tpu.vector_store %arg11[%c0_7, %c0_8, %c0_9], %10 {strides = array<i32>} : memref<8x8x512xf32, #tpu.memory_space<vmem>>, vector<8x8x512xf32>,
    %c0_10 = arith.constant 0 : index
    %c0_11 = arith.constant 0 : index
    %12 = vector.load %arg12[%c0_10, %c0_11] : memref<8x128xf32, #tpu.memory_space<vmem>>, vector<8x128xf32>
    %c0_12 = arith.constant 0 : index
    %c0_13 = arith.constant 0 : index
    %13 = vector.load %arg13[%c0_12, %c0_13] : memref<8x128xf32, #tpu.memory_space<vmem>>, vector<8x128xf32>
    %c0_i32_14 = arith.constant 0 : i32
    %14 = arith.index_cast %c0_i32_14 : i32 to index
    %c0_15 = arith.constant 0 : index
    %c0_16 = arith.constant 0 : index
    %15 = vector.load %arg11[%14, %c0_15, %c0_16] : memref<8x8x512xf32, #tpu.memory_space<vmem>>, vector<1x8x512xf32>
    %16 = vector.shape_cast %15 : vector<1x8x512xf32> to vector<8x512xf32>
    %17 = arith.truncf %12 : vector<8x128xf32> to vector<8x128xbf16>
    %c0_17 = arith.constant 0 : index
    %c0_18 = arith.constant 0 : index
    %18 = vector.load %arg4[%c0_17, %c0_18] : memref<128x512xbf16, #tpu.memory_space<vmem>>, vector<128x512xbf16>
    %cst_19 = arith.constant dense<0.000000e+00> : vector<8x512xf32>
    %19 = tpu.matmul %17, %18, %cst_19 {dimension_numbers = #tpu.dot_dimension_numbers<[1], [0], [0], [1], [0, 0, 1, 1], [], []>} : vector<8x128xbf16>, vector<128x512xbf16>, vector<8x512xf32> -> vector<8x512xf32>
    %20 = arith.addf %16, %19 : vector<8x512xf32>
    %21 = vector.extract_strided_slice %20 {offsets = [0, 0], sizes = [8, 128], strides = [1, 1]} : vector<8x512xf32> to vector<8x128xf32>
    %cst_20 = arith.constant 5.000000e-01 : f32
    %22 = vector.broadcast %cst_20 : f32 to vector<8x128xf32>
    %23 = arith.mulf %22, %21 : vector<8x128xf32>
    %24 = math.tanh %23 : vector<8x128xf32>
    %cst_21 = arith.constant 5.000000e-01 : f32
    %25 = vector.broadcast %cst_21 : f32 to vector<8x128xf32>
    %26 = arith.mulf %25, %24 : vector<8x128xf32>
    %cst_22 = arith.constant 5.000000e-01 : f32
    %27 = vector.broadcast %cst_22 : f32 to vector<8x128xf32>
    %28 = arith.addf %26, %27 : vector<8x128xf32>
    %29 = vector.extract_strided_slice %20 {offsets = [0, 128], sizes = [8, 128], strides = [1, 1]} : vector<8x512xf32> to vector<8x128xf32>
    %cst_23 = arith.constant 5.000000e-01 : f32
    %30 = vector.broadcast %cst_23 : f32 to vector<8x128xf32>
    %31 = arith.mulf %30, %29 : vector<8x128xf32>
    %32 = math.tanh %31 : vector<8x128xf32>
    %cst_24 = arith.constant 5.000000e-01 : f32
    %33 = vector.broadcast %cst_24 : f32 to vector<8x128xf32>
    %34 = arith.mulf %33, %32 : vector<8x128xf32>
    %cst_25 = arith.constant 5.000000e-01 : f32
    %35 = vector.broadcast %cst_25 : f32 to vector<8x128xf32>
    %36 = arith.addf %34, %35 : vector<8x128xf32>
    %37 = vector.extract_strided_slice %20 {offsets = [0, 256], sizes = [8, 128], strides = [1, 1]} : vector<8x512xf32> to vector<8x128xf32>
    %38 = math.tanh %37 : vector<8x128xf32>
    %39 = vector.extract_strided_slice %20 {offsets = [0, 384], sizes = [8, 128], strides = [1, 1]} : vector<8x512xf32> to vector<8x128xf32>
    %cst_26 = arith.constant 5.000000e-01 : f32
    %40 = vector.broadcast %cst_26 : f32 to vector<8x128xf32>
    %41 = arith.mulf %40, %39 : vector<8x128xf32>
    %42 = math.tanh %41 : vector<8x128xf32>
    %cst_27 = arith.constant 5.000000e-01 : f32
    %43 = vector.broadcast %cst_27 : f32 to vector<8x128xf32>
    %44 = arith.mulf %43, %42 : vector<8x128xf32>
    %cst_28 = arith.constant 5.000000e-01 : f32
    %45 = vector.broadcast %cst_28 : f32 to vector<8x128xf32>
    %46 = arith.addf %44, %45 : vector<8x128xf32>
    %47 = arith.mulf %36, %13 : vector<8x128xf32>
    %48 = arith.mulf %28, %38 : vector<8x128xf32>
    %49 = arith.addf %47, %48 : vector<8x128xf32>
    %50 = math.tanh %49 : vector<8x128xf32>
    %51 = arith.mulf %46, %50 : vector<8x128xf32>
    %52 = arith.truncf %51 : vector<8x128xf32> to vector<8x128xbf16>
    %53 = arith.index_cast %c0_i32_14 : i32 to index
    %c0_29 = arith.constant 0 : index
    %c0_30 = arith.constant 0 : index
    %54 = vector.load %arg8[%53, %c0_29, %c0_30] : memref<8x8x128xbf16, #tpu.memory_space<vmem>>, vector<1x8x128xbf16>
    %55 = vector.shape_cast %54 : vector<1x8x128xbf16> to vector<8x128xbf16>
    %56 = vector.shape_cast %52 : vector<8x128xbf16> to vector<1x8x128xbf16>
    tpu.vector_store %arg8[%53, %c0_29, %c0_30], %56 {strides = array<i32>} : memref<8x8x128xbf16, #tpu.memory_space<vmem>>, vector<1x8x128xbf16>,
    %c1_i32 = arith.constant 1 : i32
    %57 = arith.index_cast %c1_i32 : i32 to index
    %c0_31 = arith.constant 0 : index
    %c0_32 = arith.constant 0 : index
    %58 = vector.load %arg11[%57, %c0_31, %c0_32] : memref<8x8x512xf32, #tpu.memory_space<vmem>>, vector<1x8x512xf32>
    %59 = vector.shape_cast %58 : vector<1x8x512xf32> to vector<8x512xf32>
    %60 = arith.truncf %51 : vector<8x128xf32> to vector<8x128xbf16>
    %c0_33 = arith.constant 0 : index
    %c0_34 = arith.constant 0 : index
    %61 = vector.load %arg4[%c0_33, %c0_34] : memref<128x512xbf16, #tpu.memory_space<vmem>>, vector<128x512xbf16>
    %cst_35 = arith.constant dense<0.000000e+00> : vector<8x512xf32>
    %62 = tpu.matmul %60, %61, %cst_35 {dimension_numbers = #tpu.dot_dimension_numbers<[1], [0], [0], [1], [0, 0, 1, 1], [], []>} : vector<8x128xbf16>, vector<128x512xbf16>, vector<8x512xf32> -> vector<8x512xf32>
    %63 = arith.addf %59, %62 : vector<8x512xf32>
    %64 = vector.extract_strided_slice %63 {offsets = [0, 0], sizes = [8, 128], strides = [1, 1]} : vector<8x512xf32> to vector<8x128xf32>
    %cst_36 = arith.constant 5.000000e-01 : f32
    %65 = vector.broadcast %cst_36 : f32 to vector<8x128xf32>
    %66 = arith.mulf %65, %64 : vector<8x128xf32>
    %67 = math.tanh %66 : vector<8x128xf32>
    %cst_37 = arith.constant 5.000000e-01 : f32
    %68 = vector.broadcast %cst_37 : f32 to vector<8x128xf32>
    %69 = arith.mulf %68, %67 : vector<8x128xf32>
    %cst_38 = arith.constant 5.000000e-01 : f32
    %70 = vector.broadcast %cst_38 : f32 to vector<8x128xf32>
    %71 = arith.addf %69, %70 : vector<8x128xf32>
    %72 = vector.extract_strided_slice %63 {offsets = [0, 128], sizes = [8, 128], strides = [1, 1]} : vector<8x512xf32> to vector<8x128xf32>
    %cst_39 = arith.constant 5.000000e-01 : f32
    %73 = vector.broadcast %cst_39 : f32 to vector<8x128xf32>
    %74 = arith.mulf %73, %72 : vector<8x128xf32>
    %75 = math.tanh %74 : vector<8x128xf32>
    %cst_40 = arith.constant 5.000000e-01 : f32
    %76 = vector.broadcast %cst_40 : f32 to vector<8x128xf32>
    %77 = arith.mulf %76, %75 : vector<8x128xf32>
    %cst_41 = arith.constant 5.000000e-01 : f32
    %78 = vector.broadcast %cst_41 : f32 to vector<8x128xf32>
    %79 = arith.addf %77, %78 : vector<8x128xf32>
    %80 = vector.extract_strided_slice %63 {offsets = [0, 256], sizes = [8, 128], strides = [1, 1]} : vector<8x512xf32> to vector<8x128xf32>
    %81 = math.tanh %80 : vector<8x128xf32>
    %82 = vector.extract_strided_slice %63 {offsets = [0, 384], sizes = [8, 128], strides = [1, 1]} : vector<8x512xf32> to vector<8x128xf32>
    %cst_42 = arith.constant 5.000000e-01 : f32
    %83 = vector.broadcast %cst_42 : f32 to vector<8x128xf32>
    %84 = arith.mulf %83, %82 : vector<8x128xf32>
    %85 = math.tanh %84 : vector<8x128xf32>
    %cst_43 = arith.constant 5.000000e-01 : f32
    %86 = vector.broadcast %cst_43 : f32 to vector<8x128xf32>
    %87 = arith.mulf %86, %85 : vector<8x128xf32>
    %cst_44 = arith.constant 5.000000e-01 : f32
    %88 = vector.broadcast %cst_44 : f32 to vector<8x128xf32>
    %89 = arith.addf %87, %88 : vector<8x128xf32>
    %90 = arith.mulf %79, %49 : vector<8x128xf32>
    %91 = arith.mulf %71, %81 : vector<8x128xf32>
    %92 = arith.addf %90, %91 : vector<8x128xf32>
    %93 = math.tanh %92 : vector<8x128xf32>
    %94 = arith.mulf %89, %93 : vector<8x128xf32>
    %95 = arith.truncf %94 : vector<8x128xf32> to vector<8x128xbf16>
    %96 = arith.index_cast %c1_i32 : i32 to index
    %c0_45 = arith.constant 0 : index
    %c0_46 = arith.constant 0 : index
    %97 = vector.load %arg8[%96, %c0_45, %c0_46] : memref<8x8x128xbf16, #tpu.memory_space<vmem>>, vector<1x8x128xbf16>
    %98 = vector.shape_cast %97 : vector<1x8x128xbf16> to vector<8x128xbf16>
    %99 = vector.shape_cast %95 : vector<8x128xbf16> to vector<1x8x128xbf16>
    tpu.vector_store %arg8[%96, %c0_45, %c0_46], %99 {strides = array<i32>} : memref<8x8x128xbf16, #tpu.memory_space<vmem>>, vector<1x8x128xbf16>,
    %c2_i32 = arith.constant 2 : i32
    %100 = arith.index_cast %c2_i32 : i32 to index
    %c0_47 = arith.constant 0 : index
    %c0_48 = arith.constant 0 : index
    %101 = vector.load %arg11[%100, %c0_47, %c0_48] : memref<8x8x512xf32, #tpu.memory_space<vmem>>, vector<1x8x512xf32>
    %102 = vector.shape_cast %101 : vector<1x8x512xf32> to vector<8x512xf32>
    %103 = arith.truncf %94 : vector<8x128xf32> to vector<8x128xbf16>
    %c0_49 = arith.constant 0 : index
    %c0_50 = arith.constant 0 : index
    %104 = vector.load %arg4[%c0_49, %c0_50] : memref<128x512xbf16, #tpu.memory_space<vmem>>, vector<128x512xbf16>
    %cst_51 = arith.constant dense<0.000000e+00> : vector<8x512xf32>
    %105 = tpu.matmul %103, %104, %cst_51 {dimension_numbers = #tpu.dot_dimension_numbers<[1], [0], [0], [1], [0, 0, 1, 1], [], []>} : vector<8x128xbf16>, vector<128x512xbf16>, vector<8x512xf32> -> vector<8x512xf32>
    %106 = arith.addf %102, %105 : vector<8x512xf32>
    %107 = vector.extract_strided_slice %106 {offsets = [0, 0], sizes = [8, 128], strides = [1, 1]} : vector<8x512xf32> to vector<8x128xf32>
    %cst_52 = arith.constant 5.000000e-01 : f32
    %108 = vector.broadcast %cst_52 : f32 to vector<8x128xf32>
    %109 = arith.mulf %108, %107 : vector<8x128xf32>
    %110 = math.tanh %109 : vector<8x128xf32>
    %cst_53 = arith.constant 5.000000e-01 : f32
    %111 = vector.broadcast %cst_53 : f32 to vector<8x128xf32>
    %112 = arith.mulf %111, %110 : vector<8x128xf32>
    %cst_54 = arith.constant 5.000000e-01 : f32
    %113 = vector.broadcast %cst_54 : f32 to vector<8x128xf32>
    %114 = arith.addf %112, %113 : vector<8x128xf32>
    %115 = vector.extract_strided_slice %106 {offsets = [0, 128], sizes = [8, 128], strides = [1, 1]} : vector<8x512xf32> to vector<8x128xf32>
    %cst_55 = arith.constant 5.000000e-01 : f32
    %116 = vector.broadcast %cst_55 : f32 to vector<8x128xf32>
    %117 = arith.mulf %116, %115 : vector<8x128xf32>
    %118 = math.tanh %117 : vector<8x128xf32>
    %cst_56 = arith.constant 5.000000e-01 : f32
    %119 = vector.broadcast %cst_56 : f32 to vector<8x128xf32>
    %120 = arith.mulf %119, %118 : vector<8x128xf32>
    %cst_57 = arith.constant 5.000000e-01 : f32
    %121 = vector.broadcast %cst_57 : f32 to vector<8x128xf32>
    %122 = arith.addf %120, %121 : vector<8x128xf32>
    %123 = vector.extract_strided_slice %106 {offsets = [0, 256], sizes = [8, 128], strides = [1, 1]} : vector<8x512xf32> to vector<8x128xf32>
    %124 = math.tanh %123 : vector<8x128xf32>
    %125 = vector.extract_strided_slice %106 {offsets = [0, 384], sizes = [8, 128], strides = [1, 1]} : vector<8x512xf32> to vector<8x128xf32>
    %cst_58 = arith.constant 5.000000e-01 : f32
    %126 = vector.broadcast %cst_58 : f32 to vector<8x128xf32>
    %127 = arith.mulf %126, %125 : vector<8x128xf32>
    %128 = math.tanh %127 : vector<8x128xf32>
    %cst_59 = arith.constant 5.000000e-01 : f32
    %129 = vector.broadcast %cst_59 : f32 to vector<8x128xf32>
    %130 = arith.mulf %129, %128 : vector<8x128xf32>
    %cst_60 = arith.constant 5.000000e-01 : f32
    %131 = vector.broadcast %cst_60 : f32 to vector<8x128xf32>
    %132 = arith.addf %130, %131 : vector<8x128xf32>
    %133 = arith.mulf %122, %92 : vector<8x128xf32>
    %134 = arith.mulf %114, %124 : vector<8x128xf32>
    %135 = arith.addf %133, %134 : vector<8x128xf32>
    %136 = math.tanh %135 : vector<8x128xf32>
    %137 = arith.mulf %132, %136 : vector<8x128xf32>
    %138 = arith.truncf %137 : vector<8x128xf32> to vector<8x128xbf16>
    %139 = arith.index_cast %c2_i32 : i32 to index
    %c0_61 = arith.constant 0 : index
    %c0_62 = arith.constant 0 : index
    %140 = vector.load %arg8[%139, %c0_61, %c0_62] : memref<8x8x128xbf16, #tpu.memory_space<vmem>>, vector<1x8x128xbf16>
    %141 = vector.shape_cast %140 : vector<1x8x128xbf16> to vector<8x128xbf16>
    %142 = vector.shape_cast %138 : vector<8x128xbf16> to vector<1x8x128xbf16>
    tpu.vector_store %arg8[%139, %c0_61, %c0_62], %142 {strides = array<i32>} : memref<8x8x128xbf16, #tpu.memory_space<vmem>>, vector<1x8x128xbf16>,
    %c3_i32 = arith.constant 3 : i32
    %143 = arith.index_cast %c3_i32 : i32 to index
    %c0_63 = arith.constant 0 : index
    %c0_64 = arith.constant 0 : index
    %144 = vector.load %arg11[%143, %c0_63, %c0_64] : memref<8x8x512xf32, #tpu.memory_space<vmem>>, vector<1x8x512xf32>
    %145 = vector.shape_cast %144 : vector<1x8x512xf32> to vector<8x512xf32>
    %146 = arith.truncf %137 : vector<8x128xf32> to vector<8x128xbf16>
    %c0_65 = arith.constant 0 : index
    %c0_66 = arith.constant 0 : index
    %147 = vector.load %arg4[%c0_65, %c0_66] : memref<128x512xbf16, #tpu.memory_space<vmem>>, vector<128x512xbf16>
    %cst_67 = arith.constant dense<0.000000e+00> : vector<8x512xf32>
    %148 = tpu.matmul %146, %147, %cst_67 {dimension_numbers = #tpu.dot_dimension_numbers<[1], [0], [0], [1], [0, 0, 1, 1], [], []>} : vector<8x128xbf16>, vector<128x512xbf16>, vector<8x512xf32> -> vector<8x512xf32>
    %149 = arith.addf %145, %148 : vector<8x512xf32>
    %150 = vector.extract_strided_slice %149 {offsets = [0, 0], sizes = [8, 128], strides = [1, 1]} : vector<8x512xf32> to vector<8x128xf32>
    %cst_68 = arith.constant 5.000000e-01 : f32
    %151 = vector.broadcast %cst_68 : f32 to vector<8x128xf32>
    %152 = arith.mulf %151, %150 : vector<8x128xf32>
    %153 = math.tanh %152 : vector<8x128xf32>
    %cst_69 = arith.constant 5.000000e-01 : f32
    %154 = vector.broadcast %cst_69 : f32 to vector<8x128xf32>
    %155 = arith.mulf %154, %153 : vector<8x128xf32>
    %cst_70 = arith.constant 5.000000e-01 : f32
    %156 = vector.broadcast %cst_70 : f32 to vector<8x128xf32>
    %157 = arith.addf %155, %156 : vector<8x128xf32>
    %158 = vector.extract_strided_slice %149 {offsets = [0, 128], sizes = [8, 128], strides = [1, 1]} : vector<8x512xf32> to vector<8x128xf32>
    %cst_71 = arith.constant 5.000000e-01 : f32
    %159 = vector.broadcast %cst_71 : f32 to vector<8x128xf32>
    %160 = arith.mulf %159, %158 : vector<8x128xf32>
    %161 = math.tanh %160 : vector<8x128xf32>
    %cst_72 = arith.constant 5.000000e-01 : f32
    %162 = vector.broadcast %cst_72 : f32 to vector<8x128xf32>
    %163 = arith.mulf %162, %161 : vector<8x128xf32>
    %cst_73 = arith.constant 5.000000e-01 : f32
    %164 = vector.broadcast %cst_73 : f32 to vector<8x128xf32>
    %165 = arith.addf %163, %164 : vector<8x128xf32>
    %166 = vector.extract_strided_slice %149 {offsets = [0, 256], sizes = [8, 128], strides = [1, 1]} : vector<8x512xf32> to vector<8x128xf32>
    %167 = math.tanh %166 : vector<8x128xf32>
    %168 = vector.extract_strided_slice %149 {offsets = [0, 384], sizes = [8, 128], strides = [1, 1]} : vector<8x512xf32> to vector<8x128xf32>
    %cst_74 = arith.constant 5.000000e-01 : f32
    %169 = vector.broadcast %cst_74 : f32 to vector<8x128xf32>
    %170 = arith.mulf %169, %168 : vector<8x128xf32>
    %171 = math.tanh %170 : vector<8x128xf32>
    %cst_75 = arith.constant 5.000000e-01 : f32
    %172 = vector.broadcast %cst_75 : f32 to vector<8x128xf32>
    %173 = arith.mulf %172, %171 : vector<8x128xf32>
    %cst_76 = arith.constant 5.000000e-01 : f32
    %174 = vector.broadcast %cst_76 : f32 to vector<8x128xf32>
    %175 = arith.addf %173, %174 : vector<8x128xf32>
    %176 = arith.mulf %165, %135 : vector<8x128xf32>
    %177 = arith.mulf %157, %167 : vector<8x128xf32>
    %178 = arith.addf %176, %177 : vector<8x128xf32>
    %179 = math.tanh %178 : vector<8x128xf32>
    %180 = arith.mulf %175, %179 : vector<8x128xf32>
    %181 = arith.truncf %180 : vector<8x128xf32> to vector<8x128xbf16>
    %182 = arith.index_cast %c3_i32 : i32 to index
    %c0_77 = arith.constant 0 : index
    %c0_78 = arith.constant 0 : index
    %183 = vector.load %arg8[%182, %c0_77, %c0_78] : memref<8x8x128xbf16, #tpu.memory_space<vmem>>, vector<1x8x128xbf16>
    %184 = vector.shape_cast %183 : vector<1x8x128xbf16> to vector<8x128xbf16>
    %185 = vector.shape_cast %181 : vector<8x128xbf16> to vector<1x8x128xbf16>
    tpu.vector_store %arg8[%182, %c0_77, %c0_78], %185 {strides = array<i32>} : memref<8x8x128xbf16, #tpu.memory_space<vmem>>, vector<1x8x128xbf16>,
    %c4_i32 = arith.constant 4 : i32
    %186 = arith.index_cast %c4_i32 : i32 to index
    %c0_79 = arith.constant 0 : index
    %c0_80 = arith.constant 0 : index
    %187 = vector.load %arg11[%186, %c0_79, %c0_80] : memref<8x8x512xf32, #tpu.memory_space<vmem>>, vector<1x8x512xf32>
    %188 = vector.shape_cast %187 : vector<1x8x512xf32> to vector<8x512xf32>
    %189 = arith.truncf %180 : vector<8x128xf32> to vector<8x128xbf16>
    %c0_81 = arith.constant 0 : index
    %c0_82 = arith.constant 0 : index
    %190 = vector.load %arg4[%c0_81, %c0_82] : memref<128x512xbf16, #tpu.memory_space<vmem>>, vector<128x512xbf16>
    %cst_83 = arith.constant dense<0.000000e+00> : vector<8x512xf32>
    %191 = tpu.matmul %189, %190, %cst_83 {dimension_numbers = #tpu.dot_dimension_numbers<[1], [0], [0], [1], [0, 0, 1, 1], [], []>} : vector<8x128xbf16>, vector<128x512xbf16>, vector<8x512xf32> -> vector<8x512xf32>
    %192 = arith.addf %188, %191 : vector<8x512xf32>
    %193 = vector.extract_strided_slice %192 {offsets = [0, 0], sizes = [8, 128], strides = [1, 1]} : vector<8x512xf32> to vector<8x128xf32>
    %cst_84 = arith.constant 5.000000e-01 : f32
    %194 = vector.broadcast %cst_84 : f32 to vector<8x128xf32>
    %195 = arith.mulf %194, %193 : vector<8x128xf32>
    %196 = math.tanh %195 : vector<8x128xf32>
    %cst_85 = arith.constant 5.000000e-01 : f32
    %197 = vector.broadcast %cst_85 : f32 to vector<8x128xf32>
    %198 = arith.mulf %197, %196 : vector<8x128xf32>
    %cst_86 = arith.constant 5.000000e-01 : f32
    %199 = vector.broadcast %cst_86 : f32 to vector<8x128xf32>
    %200 = arith.addf %198, %199 : vector<8x128xf32>
    %201 = vector.extract_strided_slice %192 {offsets = [0, 128], sizes = [8, 128], strides = [1, 1]} : vector<8x512xf32> to vector<8x128xf32>
    %cst_87 = arith.constant 5.000000e-01 : f32
    %202 = vector.broadcast %cst_87 : f32 to vector<8x128xf32>
    %203 = arith.mulf %202, %201 : vector<8x128xf32>
    %204 = math.tanh %203 : vector<8x128xf32>
    %cst_88 = arith.constant 5.000000e-01 : f32
    %205 = vector.broadcast %cst_88 : f32 to vector<8x128xf32>
    %206 = arith.mulf %205, %204 : vector<8x128xf32>
    %cst_89 = arith.constant 5.000000e-01 : f32
    %207 = vector.broadcast %cst_89 : f32 to vector<8x128xf32>
    %208 = arith.addf %206, %207 : vector<8x128xf32>
    %209 = vector.extract_strided_slice %192 {offsets = [0, 256], sizes = [8, 128], strides = [1, 1]} : vector<8x512xf32> to vector<8x128xf32>
    %210 = math.tanh %209 : vector<8x128xf32>
    %211 = vector.extract_strided_slice %192 {offsets = [0, 384], sizes = [8, 128], strides = [1, 1]} : vector<8x512xf32> to vector<8x128xf32>
    %cst_90 = arith.constant 5.000000e-01 : f32
    %212 = vector.broadcast %cst_90 : f32 to vector<8x128xf32>
    %213 = arith.mulf %212, %211 : vector<8x128xf32>
    %214 = math.tanh %213 : vector<8x128xf32>
    %cst_91 = arith.constant 5.000000e-01 : f32
    %215 = vector.broadcast %cst_91 : f32 to vector<8x128xf32>
    %216 = arith.mulf %215, %214 : vector<8x128xf32>
    %cst_92 = arith.constant 5.000000e-01 : f32
    %217 = vector.broadcast %cst_92 : f32 to vector<8x128xf32>
    %218 = arith.addf %216, %217 : vector<8x128xf32>
    %219 = arith.mulf %208, %178 : vector<8x128xf32>
    %220 = arith.mulf %200, %210 : vector<8x128xf32>
    %221 = arith.addf %219, %220 : vector<8x128xf32>
    %222 = math.tanh %221 : vector<8x128xf32>
    %223 = arith.mulf %218, %222 : vector<8x128xf32>
    %224 = arith.truncf %223 : vector<8x128xf32> to vector<8x128xbf16>
    %225 = arith.index_cast %c4_i32 : i32 to index
    %c0_93 = arith.constant 0 : index
    %c0_94 = arith.constant 0 : index
    %226 = vector.load %arg8[%225, %c0_93, %c0_94] : memref<8x8x128xbf16, #tpu.memory_space<vmem>>, vector<1x8x128xbf16>
    %227 = vector.shape_cast %226 : vector<1x8x128xbf16> to vector<8x128xbf16>
    %228 = vector.shape_cast %224 : vector<8x128xbf16> to vector<1x8x128xbf16>
    tpu.vector_store %arg8[%225, %c0_93, %c0_94], %228 {strides = array<i32>} : memref<8x8x128xbf16, #tpu.memory_space<vmem>>, vector<1x8x128xbf16>,
    %c5_i32 = arith.constant 5 : i32
    %229 = arith.index_cast %c5_i32 : i32 to index
    %c0_95 = arith.constant 0 : index
    %c0_96 = arith.constant 0 : index
    %230 = vector.load %arg11[%229, %c0_95, %c0_96] : memref<8x8x512xf32, #tpu.memory_space<vmem>>, vector<1x8x512xf32>
    %231 = vector.shape_cast %230 : vector<1x8x512xf32> to vector<8x512xf32>
    %232 = arith.truncf %223 : vector<8x128xf32> to vector<8x128xbf16>
    %c0_97 = arith.constant 0 : index
    %c0_98 = arith.constant 0 : index
    %233 = vector.load %arg4[%c0_97, %c0_98] : memref<128x512xbf16, #tpu.memory_space<vmem>>, vector<128x512xbf16>
    %cst_99 = arith.constant dense<0.000000e+00> : vector<8x512xf32>
    %234 = tpu.matmul %232, %233, %cst_99 {dimension_numbers = #tpu.dot_dimension_numbers<[1], [0], [0], [1], [0, 0, 1, 1], [], []>} : vector<8x128xbf16>, vector<128x512xbf16>, vector<8x512xf32> -> vector<8x512xf32>
    %235 = arith.addf %231, %234 : vector<8x512xf32>
    %236 = vector.extract_strided_slice %235 {offsets = [0, 0], sizes = [8, 128], strides = [1, 1]} : vector<8x512xf32> to vector<8x128xf32>
    %cst_100 = arith.constant 5.000000e-01 : f32
    %237 = vector.broadcast %cst_100 : f32 to vector<8x128xf32>
    %238 = arith.mulf %237, %236 : vector<8x128xf32>
    %239 = math.tanh %238 : vector<8x128xf32>
    %cst_101 = arith.constant 5.000000e-01 : f32
    %240 = vector.broadcast %cst_101 : f32 to vector<8x128xf32>
    %241 = arith.mulf %240, %239 : vector<8x128xf32>
    %cst_102 = arith.constant 5.000000e-01 : f32
    %242 = vector.broadcast %cst_102 : f32 to vector<8x128xf32>
    %243 = arith.addf %241, %242 : vector<8x128xf32>
    %244 = vector.extract_strided_slice %235 {offsets = [0, 128], sizes = [8, 128], strides = [1, 1]} : vector<8x512xf32> to vector<8x128xf32>
    %cst_103 = arith.constant 5.000000e-01 : f32
    %245 = vector.broadcast %cst_103 : f32 to vector<8x128xf32>
    %246 = arith.mulf %245, %244 : vector<8x128xf32>
    %247 = math.tanh %246 : vector<8x128xf32>
    %cst_104 = arith.constant 5.000000e-01 : f32
    %248 = vector.broadcast %cst_104 : f32 to vector<8x128xf32>
    %249 = arith.mulf %248, %247 : vector<8x128xf32>
    %cst_105 = arith.constant 5.000000e-01 : f32
    %250 = vector.broadcast %cst_105 : f32 to vector<8x128xf32>
    %251 = arith.addf %249, %250 : vector<8x128xf32>
    %252 = vector.extract_strided_slice %235 {offsets = [0, 256], sizes = [8, 128], strides = [1, 1]} : vector<8x512xf32> to vector<8x128xf32>
    %253 = math.tanh %252 : vector<8x128xf32>
    %254 = vector.extract_strided_slice %235 {offsets = [0, 384], sizes = [8, 128], strides = [1, 1]} : vector<8x512xf32> to vector<8x128xf32>
    %cst_106 = arith.constant 5.000000e-01 : f32
    %255 = vector.broadcast %cst_106 : f32 to vector<8x128xf32>
    %256 = arith.mulf %255, %254 : vector<8x128xf32>
    %257 = math.tanh %256 : vector<8x128xf32>
    %cst_107 = arith.constant 5.000000e-01 : f32
    %258 = vector.broadcast %cst_107 : f32 to vector<8x128xf32>
    %259 = arith.mulf %258, %257 : vector<8x128xf32>
    %cst_108 = arith.constant 5.000000e-01 : f32
    %260 = vector.broadcast %cst_108 : f32 to vector<8x128xf32>
    %261 = arith.addf %259, %260 : vector<8x128xf32>
    %262 = arith.mulf %251, %221 : vector<8x128xf32>
    %263 = arith.mulf %243, %253 : vector<8x128xf32>
    %264 = arith.addf %262, %263 : vector<8x128xf32>
    %265 = math.tanh %264 : vector<8x128xf32>
    %266 = arith.mulf %261, %265 : vector<8x128xf32>
    %267 = arith.truncf %266 : vector<8x128xf32> to vector<8x128xbf16>
    %268 = arith.index_cast %c5_i32 : i32 to index
    %c0_109 = arith.constant 0 : index
    %c0_110 = arith.constant 0 : index
    %269 = vector.load %arg8[%268, %c0_109, %c0_110] : memref<8x8x128xbf16, #tpu.memory_space<vmem>>, vector<1x8x128xbf16>
    %270 = vector.shape_cast %269 : vector<1x8x128xbf16> to vector<8x128xbf16>
    %271 = vector.shape_cast %267 : vector<8x128xbf16> to vector<1x8x128xbf16>
    tpu.vector_store %arg8[%268, %c0_109, %c0_110], %271 {strides = array<i32>} : memref<8x8x128xbf16, #tpu.memory_space<vmem>>, vector<1x8x128xbf16>,
    %c6_i32 = arith.constant 6 : i32
    %272 = arith.index_cast %c6_i32 : i32 to index
    %c0_111 = arith.constant 0 : index
    %c0_112 = arith.constant 0 : index
    %273 = vector.load %arg11[%272, %c0_111, %c0_112] : memref<8x8x512xf32, #tpu.memory_space<vmem>>, vector<1x8x512xf32>
    %274 = vector.shape_cast %273 : vector<1x8x512xf32> to vector<8x512xf32>
    %275 = arith.truncf %266 : vector<8x128xf32> to vector<8x128xbf16>
    %c0_113 = arith.constant 0 : index
    %c0_114 = arith.constant 0 : index
    %276 = vector.load %arg4[%c0_113, %c0_114] : memref<128x512xbf16, #tpu.memory_space<vmem>>, vector<128x512xbf16>
    %cst_115 = arith.constant dense<0.000000e+00> : vector<8x512xf32>
    %277 = tpu.matmul %275, %276, %cst_115 {dimension_numbers = #tpu.dot_dimension_numbers<[1], [0], [0], [1], [0, 0, 1, 1], [], []>} : vector<8x128xbf16>, vector<128x512xbf16>, vector<8x512xf32> -> vector<8x512xf32>
    %278 = arith.addf %274, %277 : vector<8x512xf32>
    %279 = vector.extract_strided_slice %278 {offsets = [0, 0], sizes = [8, 128], strides = [1, 1]} : vector<8x512xf32> to vector<8x128xf32>
    %cst_116 = arith.constant 5.000000e-01 : f32
    %280 = vector.broadcast %cst_116 : f32 to vector<8x128xf32>
    %281 = arith.mulf %280, %279 : vector<8x128xf32>
    %282 = math.tanh %281 : vector<8x128xf32>
    %cst_117 = arith.constant 5.000000e-01 : f32
    %283 = vector.broadcast %cst_117 : f32 to vector<8x128xf32>
    %284 = arith.mulf %283, %282 : vector<8x128xf32>
    %cst_118 = arith.constant 5.000000e-01 : f32
    %285 = vector.broadcast %cst_118 : f32 to vector<8x128xf32>
    %286 = arith.addf %284, %285 : vector<8x128xf32>
    %287 = vector.extract_strided_slice %278 {offsets = [0, 128], sizes = [8, 128], strides = [1, 1]} : vector<8x512xf32> to vector<8x128xf32>
    %cst_119 = arith.constant 5.000000e-01 : f32
    %288 = vector.broadcast %cst_119 : f32 to vector<8x128xf32>
    %289 = arith.mulf %288, %287 : vector<8x128xf32>
    %290 = math.tanh %289 : vector<8x128xf32>
    %cst_120 = arith.constant 5.000000e-01 : f32
    %291 = vector.broadcast %cst_120 : f32 to vector<8x128xf32>
    %292 = arith.mulf %291, %290 : vector<8x128xf32>
    %cst_121 = arith.constant 5.000000e-01 : f32
    %293 = vector.broadcast %cst_121 : f32 to vector<8x128xf32>
    %294 = arith.addf %292, %293 : vector<8x128xf32>
    %295 = vector.extract_strided_slice %278 {offsets = [0, 256], sizes = [8, 128], strides = [1, 1]} : vector<8x512xf32> to vector<8x128xf32>
    %296 = math.tanh %295 : vector<8x128xf32>
    %297 = vector.extract_strided_slice %278 {offsets = [0, 384], sizes = [8, 128], strides = [1, 1]} : vector<8x512xf32> to vector<8x128xf32>
    %cst_122 = arith.constant 5.000000e-01 : f32
    %298 = vector.broadcast %cst_122 : f32 to vector<8x128xf32>
    %299 = arith.mulf %298, %297 : vector<8x128xf32>
    %300 = math.tanh %299 : vector<8x128xf32>
    %cst_123 = arith.constant 5.000000e-01 : f32
    %301 = vector.broadcast %cst_123 : f32 to vector<8x128xf32>
    %302 = arith.mulf %301, %300 : vector<8x128xf32>
    %cst_124 = arith.constant 5.000000e-01 : f32
    %303 = vector.broadcast %cst_124 : f32 to vector<8x128xf32>
    %304 = arith.addf %302, %303 : vector<8x128xf32>
    %305 = arith.mulf %294, %264 : vector<8x128xf32>
    %306 = arith.mulf %286, %296 : vector<8x128xf32>
    %307 = arith.addf %305, %306 : vector<8x128xf32>
    %308 = math.tanh %307 : vector<8x128xf32>
    %309 = arith.mulf %304, %308 : vector<8x128xf32>
    %310 = arith.truncf %309 : vector<8x128xf32> to vector<8x128xbf16>
    %311 = arith.index_cast %c6_i32 : i32 to index
    %c0_125 = arith.constant 0 : index
    %c0_126 = arith.constant 0 : index
    %312 = vector.load %arg8[%311, %c0_125, %c0_126] : memref<8x8x128xbf16, #tpu.memory_space<vmem>>, vector<1x8x128xbf16>
    %313 = vector.shape_cast %312 : vector<1x8x128xbf16> to vector<8x128xbf16>
    %314 = vector.shape_cast %310 : vector<8x128xbf16> to vector<1x8x128xbf16>
    tpu.vector_store %arg8[%311, %c0_125, %c0_126], %314 {strides = array<i32>} : memref<8x8x128xbf16, #tpu.memory_space<vmem>>, vector<1x8x128xbf16>,
    %c7_i32 = arith.constant 7 : i32
    %315 = arith.index_cast %c7_i32 : i32 to index
    %c0_127 = arith.constant 0 : index
    %c0_128 = arith.constant 0 : index
    %316 = vector.load %arg11[%315, %c0_127, %c0_128] : memref<8x8x512xf32, #tpu.memory_space<vmem>>, vector<1x8x512xf32>
    %317 = vector.shape_cast %316 : vector<1x8x512xf32> to vector<8x512xf32>
    %318 = arith.truncf %309 : vector<8x128xf32> to vector<8x128xbf16>
    %c0_129 = arith.constant 0 : index
    %c0_130 = arith.constant 0 : index
    %319 = vector.load %arg4[%c0_129, %c0_130] : memref<128x512xbf16, #tpu.memory_space<vmem>>, vector<128x512xbf16>
    %cst_131 = arith.constant dense<0.000000e+00> : vector<8x512xf32>
    %320 = tpu.matmul %318, %319, %cst_131 {dimension_numbers = #tpu.dot_dimension_numbers<[1], [0], [0], [1], [0, 0, 1, 1], [], []>} : vector<8x128xbf16>, vector<128x512xbf16>, vector<8x512xf32> -> vector<8x512xf32>
    %321 = arith.addf %317, %320 : vector<8x512xf32>
    %322 = vector.extract_strided_slice %321 {offsets = [0, 0], sizes = [8, 128], strides = [1, 1]} : vector<8x512xf32> to vector<8x128xf32>
    %cst_132 = arith.constant 5.000000e-01 : f32
    %323 = vector.broadcast %cst_132 : f32 to vector<8x128xf32>
    %324 = arith.mulf %323, %322 : vector<8x128xf32>
    %325 = math.tanh %324 : vector<8x128xf32>
    %cst_133 = arith.constant 5.000000e-01 : f32
    %326 = vector.broadcast %cst_133 : f32 to vector<8x128xf32>
    %327 = arith.mulf %326, %325 : vector<8x128xf32>
    %cst_134 = arith.constant 5.000000e-01 : f32
    %328 = vector.broadcast %cst_134 : f32 to vector<8x128xf32>
    %329 = arith.addf %327, %328 : vector<8x128xf32>
    %330 = vector.extract_strided_slice %321 {offsets = [0, 128], sizes = [8, 128], strides = [1, 1]} : vector<8x512xf32> to vector<8x128xf32>
    %cst_135 = arith.constant 5.000000e-01 : f32
    %331 = vector.broadcast %cst_135 : f32 to vector<8x128xf32>
    %332 = arith.mulf %331, %330 : vector<8x128xf32>
    %333 = math.tanh %332 : vector<8x128xf32>
    %cst_136 = arith.constant 5.000000e-01 : f32
    %334 = vector.broadcast %cst_136 : f32 to vector<8x128xf32>
    %335 = arith.mulf %334, %333 : vector<8x128xf32>
    %cst_137 = arith.constant 5.000000e-01 : f32
    %336 = vector.broadcast %cst_137 : f32 to vector<8x128xf32>
    %337 = arith.addf %335, %336 : vector<8x128xf32>
    %338 = vector.extract_strided_slice %321 {offsets = [0, 256], sizes = [8, 128], strides = [1, 1]} : vector<8x512xf32> to vector<8x128xf32>
    %339 = math.tanh %338 : vector<8x128xf32>
    %340 = vector.extract_strided_slice %321 {offsets = [0, 384], sizes = [8, 128], strides = [1, 1]} : vector<8x512xf32> to vector<8x128xf32>
    %cst_138 = arith.constant 5.000000e-01 : f32
    %341 = vector.broadcast %cst_138 : f32 to vector<8x128xf32>
    %342 = arith.mulf %341, %340 : vector<8x128xf32>
    %343 = math.tanh %342 : vector<8x128xf32>
    %cst_139 = arith.constant 5.000000e-01 : f32
    %344 = vector.broadcast %cst_139 : f32 to vector<8x128xf32>
    %345 = arith.mulf %344, %343 : vector<8x128xf32>
    %cst_140 = arith.constant 5.000000e-01 : f32
    %346 = vector.broadcast %cst_140 : f32 to vector<8x128xf32>
    %347 = arith.addf %345, %346 : vector<8x128xf32>
    %348 = arith.mulf %337, %307 : vector<8x128xf32>
    %349 = arith.mulf %329, %339 : vector<8x128xf32>
    %350 = arith.addf %348, %349 : vector<8x128xf32>
    %351 = math.tanh %350 : vector<8x128xf32>
    %352 = arith.mulf %347, %351 : vector<8x128xf32>
    %353 = arith.truncf %352 : vector<8x128xf32> to vector<8x128xbf16>
    %354 = arith.index_cast %c7_i32 : i32 to index
    %c0_141 = arith.constant 0 : index
    %c0_142 = arith.constant 0 : index
    %355 = vector.load %arg8[%354, %c0_141, %c0_142] : memref<8x8x128xbf16, #tpu.memory_space<vmem>>, vector<1x8x128xbf16>
    %356 = vector.shape_cast %355 : vector<1x8x128xbf16> to vector<8x128xbf16>
    %357 = vector.shape_cast %353 : vector<8x128xbf16> to vector<1x8x128xbf16>
    tpu.vector_store %arg8[%354, %c0_141, %c0_142], %357 {strides = array<i32>} : memref<8x8x128xbf16, #tpu.memory_space<vmem>>, vector<1x8x128xbf16>,
    %c8_i32 = arith.constant 8 : i32
    %c0_143 = arith.constant 0 : index
    %c0_144 = arith.constant 0 : index
    %358 = vector.load %arg12[%c0_143, %c0_144] : memref<8x128xf32, #tpu.memory_space<vmem>>, vector<8x128xf32>
    tpu.vector_store %arg12[%c0_143, %c0_144], %352 {strides = array<i32>} : memref<8x128xf32, #tpu.memory_space<vmem>>, vector<8x128xf32>,
    %c0_145 = arith.constant 0 : index
    %c0_146 = arith.constant 0 : index
    %359 = vector.load %arg13[%c0_145, %c0_146] : memref<8x128xf32, #tpu.memory_space<vmem>>, vector<8x128xf32>
    tpu.vector_store %arg13[%c0_145, %c0_146], %350 {strides = array<i32>} : memref<8x128xf32, #tpu.memory_space<vmem>>, vector<8x128xf32>,
    %c0_i32_147 = arith.constant 0 : i32
    %360 = arith.cmpi eq, %arg1, %c0_i32_147 : i32
    %361 = arith.extui %360 : i1 to i32
    %c0_i32_148 = arith.constant 0 : i32
    %362 = arith.cmpi ne, %361, %c0_i32_148 : i32
    scf.if %362 {
      %c0_149 = arith.constant 0 : index
      %c0_150 = arith.constant 0 : index
      %363 = vector.load %arg12[%c0_149, %c0_150] : memref<8x128xf32, #tpu.memory_space<vmem>>, vector<8x128xf32>
      %c0_151 = arith.constant 0 : index
      %c0_152 = arith.constant 0 : index
      %364 = vector.load %arg9[%c0_151, %c0_152] : memref<8x128xf32, #tpu.memory_space<vmem>>, vector<8x128xf32>
      tpu.vector_store %arg9[%c0_151, %c0_152], %363 {strides = array<i32>} : memref<8x128xf32, #tpu.memory_space<vmem>>, vector<8x128xf32>,
      %c0_153 = arith.constant 0 : index
      %c0_154 = arith.constant 0 : index
      %365 = vector.load %arg13[%c0_153, %c0_154] : memref<8x128xf32, #tpu.memory_space<vmem>>, vector<8x128xf32>
      %c0_155 = arith.constant 0 : index
      %c0_156 = arith.constant 0 : index
      %366 = vector.load %arg10[%c0_155, %c0_156] : memref<8x128xf32, #tpu.memory_space<vmem>>, vector<8x128xf32>
      tpu.vector_store %arg10[%c0_155, %c0_156], %365 {strides = array<i32>} : memref<8x128xf32, #tpu.memory_space<vmem>>, vector<8x128xf32>,
    } else {
    }
    return
  }
  func.func @transform_0(%arg0: i32, %arg1: i32) -> (i32, i32, i32) {
    %c0_i32 = arith.constant 0 : i32
    %c0_i32_0 = arith.constant 0 : i32
    return %arg1, %arg0, %c0_i32 : i32, i32, i32
  }
  func.func @transform_1(%arg0: i32, %arg1: i32) -> (i32, i32) {
    %c0_i32 = arith.constant 0 : i32
    %c0_i32_0 = arith.constant 0 : i32
    %c0_i32_1 = arith.constant 0 : i32
    return %c0_i32, %c0_i32_0 : i32, i32
  }
  func.func @transform_2(%arg0: i32, %arg1: i32) -> (i32, i32) {
    %c0_i32 = arith.constant 0 : i32
    %c0_i32_0 = arith.constant 0 : i32
    %c0_i32_1 = arith.constant 0 : i32
    return %c0_i32, %c0_i32_0 : i32, i32
  }
  func.func @transform_3(%arg0: i32, %arg1: i32) -> (i32, i32) {
    %c0_i32 = arith.constant 0 : i32
    %c0_i32_0 = arith.constant 0 : i32
    %c0_i32_1 = arith.constant 0 : i32
    return %c0_i32, %c0_i32_0 : i32, i32
  }
  func.func @transform_4(%arg0: i32, %arg1: i32) -> (i32, i32) {
    %c0_i32 = arith.constant 0 : i32
    %c0_i32_0 = arith.constant 0 : i32
    return %arg0, %c0_i32 : i32, i32
  }
  func.func @transform_5(%arg0: i32, %arg1: i32) -> (i32, i32) {
    %c0_i32 = arith.constant 0 : i32
    %c0_i32_0 = arith.constant 0 : i32
    return %arg0, %c0_i32 : i32, i32
  }
  func.func @transform_6(%arg0: i32, %arg1: i32) -> (i32, i32, i32) {
    %c0_i32 = arith.constant 0 : i32
    %c0_i32_0 = arith.constant 0 : i32
    return %arg1, %arg0, %c0_i32 : i32, i32, i32
  }
  func.func @transform_7(%arg0: i32, %arg1: i32) -> (i32, i32) {
    %c0_i32 = arith.constant 0 : i32
    %c0_i32_0 = arith.constant 0 : i32
    return %arg0, %c0_i32 : i32, i32
  }
  func.func @transform_8(%arg0: i32, %arg1: i32) -> (i32, i32) {
    %c0_i32 = arith.constant 0 : i32
    %c0_i32_0 = arith.constant 0 : i32
    return %arg0, %c0_i32 : i32, i32
  }
}

</mosaic_0001>

<bundles_post_ra>
// kernel: rnnlm_forward.5
= control target key start
LH: loop header
LB: loop body
LE: loop exit
PB: predicated region body
PF: predicated region fallthrough
CT: control target
= control target key end

     0   :  { %v623_v2 = vmov 0   ;;  %s1114_s0 = inlined_call_operand.vmem [shape: bf16[8,8,128], index: 0, kind: input, shape index: {}]   ;;  %s1115_s1 = inlined_call_operand.vmem [shape: bf16[128,256], index: 1, kind: input, shape index: {}]   ;;  %s1116_s2 = inlined_call_operand.vmem [shape: f32[1,256], index: 2, kind: input, shape index: {}]   ;;  %s1117_s3 = inlined_call_operand.hbm [shape: f32[8,8,256], index: 3, kind: output, shape index: {}]  }
   0x1   :  { %v571_v0 = vld [vmem:[%s1115_s1 + $0x4] ss:$8 sps:$4 sm:$0xff]   ;;  %v573_v1 = vld [vmem:[%s1115_s1] ss:$8 sps:$4 sm:$0xff]   ;;  %188 = vmatprep.mubr.bf16.mxu0 %v623_v2  ;;  %208 = vmatprep.mubr.bf16.mxu1 %v623_v2  ;;  %v574_v3 = vld [vmem:[%s1115_s1 + $0x14] ss:$8 sps:$4 sm:$0xff]  }
   0x2   :  { %156 = vmatprep.subr.bf16.mxu0 %v571_v0  ;;  %551 = vmatprep.subr.bf16.mxu1 %v571_v0  ;;  %v576_v4 = vld [vmem:[%s1115_s1 + $0x10] ss:$8 sps:$4 sm:$0xff]   ;;  %v577_v5 = vld [vmem:[%s1115_s1 + $0x24] ss:$8 sps:$4 sm:$0xff]   ;;  %v579_v6 = vld [vmem:[%s1115_s1 + $0x20] ss:$8 sps:$4 sm:$0xff]  }
   0x3   :  { %157 = vmatpush1.bf16.msra.mxu0 %v573_v1  ;;  %559 = vmatpush1.bf16.msra.mxu1 %v573_v1  ;;  %v580_v7 = vld [vmem:[%s1115_s1 + $0x34] ss:$8 sps:$4 sm:$0xff]   ;;  %v582_v8 = vld [vmem:[%s1115_s1 + $0x30] ss:$8 sps:$4 sm:$0xff]   ;;  %v583_v9 = vld [vmem:[%s1115_s1 + $0x44] ss:$8 sps:$4 sm:$0xff]  }
   0x4   :  { %158 = vmatprep.subr.bf16.mxu0 %v574_v3  ;;  %552 = vmatprep.subr.bf16.mxu1 %v574_v3  ;;  %v585_v10 = vld [vmem:[%s1115_s1 + $0x40] ss:$8 sps:$4 sm:$0xff]  }
   0x7   :  { %159 = vmatpush1.bf16.msra.mxu0 %v576_v4  ;;  %560 = vmatpush1.bf16.msra.mxu1 %v576_v4 }
   0x8   :  { %160 = vmatprep.subr.bf16.mxu0 %v577_v5  ;;  %553 = vmatprep.subr.bf16.mxu1 %v577_v5 }
   0xb   :  { %161 = vmatpush1.bf16.msra.mxu0 %v579_v6  ;;  %561 = vmatpush1.bf16.msra.mxu1 %v579_v6 }
   0xc   :  { %162 = vmatprep.subr.bf16.mxu0 %v580_v7  ;;  %554 = vmatprep.subr.bf16.mxu1 %v580_v7 }
   0xf   :  { %163 = vmatpush1.bf16.msra.mxu0 %v582_v8  ;;  %562 = vmatpush1.bf16.msra.mxu1 %v582_v8 }
  0x10   :  { %8 = vsyncpa [#allocation3], 0  ;;  %164 = vmatprep.subr.bf16.mxu0 %v583_v9  ;;  %555 = vmatprep.subr.bf16.mxu1 %v583_v9  ;;  %v586_v11 = vld [vmem:[%s1115_s1 + $0x54] ss:$8 sps:$4 sm:$0xff]   ;;  %v588_v12 = vld [vmem:[%s1115_s1 + $0x50] ss:$8 sps:$4 sm:$0xff]   ;;  %v42_v21 = vlaneseq }
  0x11   :  { %v589_v13 = vld [vmem:[%s1115_s1 + $0x64] ss:$8 sps:$4 sm:$0xff]   ;;  %v591_v14 = vld [vmem:[%s1115_s1 + $0x60] ss:$8 sps:$4 sm:$0xff]   ;;  %v592_v15 = vld [vmem:[%s1115_s1 + $0x74] ss:$8 sps:$4 sm:$0xff]  }
  0x12   :  { %v594_v16 = vld [vmem:[%s1115_s1 + $0x70] ss:$8 sps:$4 sm:$0xff]   ;;  %v595_v17 = vld [vmem:[%s1114_s0] sm:$0xff]   ;;  %v597_v19 = vld [vmem:[%s1114_s0 + $0x8] sm:$0xff]   ;;  %v43_v22 = vshrl.u32 %v42_v21, 7  ;;  %vm246_vm0 = vcmask 1041409  }
  0x13   :  { %165 = vmatpush1.bf16.msra.mxu0 %v585_v10  ;;  %563 = vmatpush1.bf16.msra.mxu1 %v585_v10  ;;  %v596_v18 = vld [vmem:[%s1114_s0 + $0x10] sm:$0xff]   ;;  %v598_v20 = vld [vmem:[%s1114_s0 + $0x18] sm:$0xff]   ;;  %v40_v24 = vld [vmem:[%s1116_s2] sm:$0x3]  ;;  %vm249_vm1 = vcmask 1042434   ;;  %vm252_vm2 = vcmask 1043459  }
  0x14   :  { %166 = vmatprep.subr.bf16.mxu0 %v586_v11  ;;  %556 = vmatprep.subr.bf16.mxu1 %v586_v11  ;;  %v44_v23 = vsub.s32 0, %v43_v22  ;;  %v48_v25 = vsub.s32 1, %v43_v22  ;;  %vm255_vm3 = vcmask 1044484   ;;  %vm258_vm4 = vcmask 1045509   ;;  %s624_s0 = smov [#allocation2]  }
  0x15   :  { %vm261_vm5 = vcmask 1046534   ;;  %vm264_vm6 = vcmask 1047559   ;;  %s520_s2 = sshll.u32 %s624_s0, 4  ;;  %s521_s2 = int_to_ptr.vmem [resolvable:$true] %s520_s2 }
  0x16   :  { %v710_v26 = vrot.slane %v40_v24, %v44_v23  ;;  %v712_v27 = vrot.slane %v40_v24, %v48_v25  ;;  %s599_s26 = scalar_lea.vmem %s521_s2, 2048  ;;  %p604_p1 = scmp.lt.s32.totalorder %s521_s2, %s521_s2 }
  0x17   :  { %167 = vmatpush1.bf16.msra.mxu0 %v588_v12  ;;  %564 = vmatpush1.bf16.msra.mxu1 %v588_v12  ;;  %p600_p0 = scmp.ne.s32.totalorder %s521_s2, %s599_s26  ;;  %p605_p2 = scmp.lt.s32.totalorder %s599_s26, %s599_s26 }
  0x18   :  { %168 = vmatprep.subr.bf16.mxu0 %v589_v13  ;;  %557 = vmatprep.subr.bf16.mxu1 %v589_v13 }
  0x19   :  { %p606_p3 = por %p605_p2, %p604_p1 }
  0x1b   :  { %169 = vmatpush1.bf16.msra.mxu0 %v591_v14  ;;  %565 = vmatpush1.bf16.msra.mxu1 %v591_v14  ;;  %p607_p4 = pnand %p606_p3, %p600_p0 }
  0x1c   :  { %170 = vmatprep.subr.bf16.mxu0 %v592_v15  ;;  %558 = vmatprep.subr.bf16.mxu1 %v592_v15 }
  0x1f   :  { %171 = vmatpush1.bf16.msra.mxu0 %v594_v16  ;;  %566 = vmatpush1.bf16.msra.mxu1 %v594_v16 }
  0x22   :  { %189 = vmatmul.mubr.bf16.vlgmr.msra.gmra.mrb[0].mxu0 %v595_v17  ;;  %209 = vmatmul.mubr.bf16.vlgmr.msra.gmra.mrb[0].mxu1 %v596_v18 }
  0x23   :  { %198 = vmatprep.mubr.bf16.mxu0 %v623_v2  ;;  %218 = vmatprep.mubr.bf16.mxu1 %v623_v2 }
  0x2a   :  { %199 = vmatmul.mubr.bf16.gmra.mrb[4].mxu0 %v597_v19  ;;  %219 = vmatmul.mubr.bf16.gmra.mrb[4].mxu1 %v598_v20 }
  0xf5   :  { %v190_v28 = vpop.f32.mrb[0].mxu0  ;;  %v210_v29 = vpop.f32.mrb[0].mxu1 }
  0xf6   :  { %v715_v30 = vadd.f32 %v190_v28, %v710_v26  ;;  %v192_v31 = vpop.f32.mrb[1].mxu0  ;;  %v212_v32 = vpop.f32.mrb[1].mxu1  ;;  %v721_v34 = vadd.f32 %v210_v29, %v710_v26 }
  0xf7   :  { %v718_v33 = vadd.f32 %v192_v31, %v712_v27  ;;  %v194_v35 = vpop.f32.mrb[2].mxu0  ;;  %v214_v36 = vpop.f32.mrb[2].mxu1  ;;  %v727_v40 = vadd.f32 %v212_v32, %v712_v27 }
  0xf8   :  { %v284_v37 = vrot.slane %v715_v30, 1  ;;  %v317_v38 = vrot.slane %v715_v30, 2  ;;  %v350_v39 = vrot.slane %v715_v30, 3  ;;  %v196_v41 = vpop.f32.mrb[3].mxu0  ;;  %v729_v42 = vpop.f32.mrb[3].mxu1  ;;  %v383_v43 = vrot.slane %v715_v30, 4 }
  0xf9   :  { %v416_v44 = vrot.slane %v715_v30, 5  ;;  %v449_v45 = vrot.slane %v715_v30, 6  ;;  %v482_v46 = vrot.slane %v715_v30, 7  ;;  %v298_v47 = vrot.slane %v718_v33, 1 }
  0xfa   :  { %v331_v48 = vrot.slane %v718_v33, 2  ;;  %v364_v49 = vrot.slane %v718_v33, 3  ;;  %v397_v50 = vrot.slane %v718_v33, 4  ;;  %v430_v51 = vrot.slane %v718_v33, 5 }
  0xfb   :  { %v463_v52 = vrot.slane %v718_v33, 6  ;;  %v496_v53 = vrot.slane %v718_v33, 7  ;;  %v254_v54 = vrot.slane %v721_v34, 4  ;;  %v290_v55 = vrot.slane %v721_v34, 5 }
  0xfc   :  { %v323_v56 = vrot.slane %v721_v34, 6  ;;  %v356_v57 = vrot.slane %v721_v34, 7  ;;  %v423_v58 = vrot.slane %v721_v34, 1  ;;  %v456_v59 = vrot.slane %v721_v34, 2 }
  0xfd   :  { %v195_v61 = vadd.f32 %v194_v35, %v710_v26  ;;  %v272_v62 = vrot.slane %v727_v40, 4  ;;  %v200_v63 = vpop.f32.mrb[4].mxu0  ;;  %v220_v0 = vpop.f32.mrb[4].mxu1  ;;  %v304_v1 = vrot.slane %v727_v40, 5  ;;  %v337_v2 = vrot.slane %v727_v40, 6 }
  0xfe   :  { %v370_v3 = vrot.slane %v727_v40, 7  ;;  %v437_v4 = vrot.slane %v727_v40, 1  ;;  %v202_v5 = vpop.f32.mrb[5].mxu0  ;;  %v755_v6 = vpop.f32.mrb[5].mxu1  ;;  %v470_v10 = vrot.slane %v727_v40, 2  ;;  %v770_v21 = vadd.f32 %v196_v41, %v712_v27 }
  0xff   :  { %v245_v7 = vrot.slane %v195_v61, 7  ;;  %v758_v8 = vsel %vm246_vm0, %v195_v61, %v284_v37  ;;  %v318_v9 = vrot.slane %v195_v61, 1  ;;  %v204_v11 = vpop.f32.mrb[6].mxu0  ;;  %v761_v12 = vpop.f32.mrb[6].mxu1  ;;  %v384_v13 = vrot.slane %v195_v61, 3 }
 0x100   :  { %v417_v14 = vrot.slane %v195_v61, 4  ;;  %v450_v15 = vrot.slane %v195_v61, 5  ;;  %v483_v16 = vrot.slane %v195_v61, 6  ;;  %v763_v17 = vpop.f32.mrb[7].mxu0  ;;  %v765_v18 = vpop.f32.mrb[7].mxu1  ;;  %v351_v20 = vrot.slane %v195_v61, 2 }
 0x101   :  { %v247_v19 = vsel %vm246_vm0, %v245_v7, %v715_v30  ;;  %v773_v22 = vadd.f32 %v214_v36, %v710_v26  ;;  %v385_v23 = vsel %vm246_vm0, %v384_v13, %v383_v43  ;;  %v266_v31 = vrot.slane %v770_v21, 7 }
 0x102   :  { %v418_v24 = vsel %vm246_vm0, %v417_v14, %v416_v44  ;;  %v451_v25 = vsel %vm246_vm0, %v450_v15, %v449_v45  ;;  %v484_v28 = vsel %vm246_vm0, %v483_v16, %v482_v46  ;;  %v299_v32 = vsel %vm246_vm0, %v770_v21, %v298_v47 }
 0x103   :  { %v332_v35 = vrot.slane %v770_v21, 1  ;;  %v398_v36 = vrot.slane %v770_v21, 3  ;;  %v431_v37 = vrot.slane %v770_v21, 4  ;;  %v464_v41 = vrot.slane %v770_v21, 5 }
 0x104   :  { %v497_v43 = vrot.slane %v770_v21, 6  ;;  %v267_v44 = vsel %vm246_vm0, %v266_v31, %v718_v33  ;;  %v365_v45 = vrot.slane %v770_v21, 2  ;;  %v257_v46 = vrot.slane %v773_v22, 3 }
 0x105   :  { %v399_v47 = vsel %vm246_vm0, %v398_v36, %v397_v50  ;;  %v432_v7 = vsel %vm246_vm0, %v431_v37, %v430_v51  ;;  %v465_v13 = vsel %vm246_vm0, %v464_v41, %v463_v52  ;;  %v325_v15 = vrot.slane %v773_v22, 5 }
 0x106   :  { %v498_v14 = vsel %vm246_vm0, %v497_v43, %v496_v53  ;;  %v358_v16 = vrot.slane %v773_v22, 6  ;;  %v804_v61 = vadd.f32 %v729_v42, %v712_v27  ;;  %v201_v50 = vadd.f32 %v200_v63, %v710_v26 }
 0x107   :  { %v319_v51 = vsel %vm246_vm0, %v318_v9, %v317_v38  ;;  %v811_v52 = vadd.f32 %v202_v5, %v712_v27  ;;  %v333_v53 = vsel %vm246_vm0, %v332_v35, %v331_v48  ;;  %v817_v36 = vadd.f32 %v220_v0, %v710_v26 }
 0x108   :  { %v352_v42 = vsel %vm246_vm0, %v351_v20, %v350_v39  ;;  %v826_v5 = vadd.f32 %v204_v11, %v710_v26  ;;  %v372_v9 = vrot.slane %v804_v61, 6  ;;  %v248_v35 = vrot.slane %v201_v50, 6 }
 0x109   :  { %v286_v39 = vrot.slane %v201_v50, 7  ;;  %v320_v20 = vsel %vm249_vm1, %v201_v50, %v319_v51  ;;  %v386_v41 = vrot.slane %v201_v50, 2  ;;  %v419_v38 = vrot.slane %v201_v50, 3 }
 0x10a   :  { %v250_v43 = vsel %vm249_vm1, %v248_v35, %v247_v19  ;;  %v452_v11 = vrot.slane %v201_v50, 4  ;;  %v485_v37 = vrot.slane %v201_v50, 5  ;;  %v268_v63 = vrot.slane %v811_v52, 6 }
 0x10b   :  { %v287_v48 = vsel %vm249_vm1, %v286_v39, %v758_v8  ;;  %v387_v0 = vsel %vm249_vm1, %v386_v41, %v385_v23  ;;  %v300_v30 = vrot.slane %v811_v52, 7  ;;  %v420_v60 = vsel %vm249_vm1, %v419_v38, %v418_v24 }
 0x10c   :  { %v453_v51 = vsel %vm249_vm1, %v452_v11, %v451_v25  ;;  %v486_v29 = vsel %vm249_vm1, %v485_v37, %v484_v28  ;;  %v844_v19 = vsel %vm249_vm1, %v811_v52, %v333_v53  ;;  %v353_v35 = vrot.slane %v201_v50, 1 }
 0x10d   :  { %v269_v31 = vsel %vm249_vm1, %v268_v63, %v267_v44  ;;  %v848_v8 = vsel %vm249_vm1, %v300_v30, %v299_v32  ;;  %v400_v23 = vrot.slane %v811_v52, 2  ;;  %v367_v39 = vrot.slane %v811_v52, 1 }
 0x10e   :  { %v433_v24 = vrot.slane %v811_v52, 3  ;;  %v466_v25 = vrot.slane %v811_v52, 4  ;;  %v499_v28 = vrot.slane %v811_v52, 5  ;;  %v260_v50 = vrot.slane %v817_v36, 2 }
 0x10f   :  { %v856_v37 = vsel %vm249_vm1, %v400_v23, %v399_v47  ;;  %v294_v44 = vrot.slane %v817_v36, 3  ;;  %v327_v32 = vrot.slane %v817_v36, 4  ;;  %v360_v30 = vrot.slane %v817_v36, 5 }
 0x110   :  { %v434_v53 = vsel %vm249_vm1, %v433_v24, %v432_v7  ;;  %v863_v63 = vsel %vm249_vm1, %v466_v25, %v465_v13  ;;  %v866_v38 = vsel %vm249_vm1, %v499_v28, %v498_v14  ;;  %v251_v41 = vrot.slane %v826_v5, 5 }
 0x111   :  { %v288_v11 = vrot.slane %v826_v5, 6  ;;  %v321_v23 = vrot.slane %v826_v5, 7  ;;  %v354_v7 = vsel %vm249_vm1, %v353_v35, %v352_v42  ;;  %v388_v13 = vrot.slane %v826_v5, 1 }
 0x112   :  { %v421_v24 = vrot.slane %v826_v5, 2  ;;  %v253_v14 = vsel %vm252_vm2, %v251_v41, %v250_v43  ;;  %v355_v28 = vsel %vm252_vm2, %v826_v5, %v354_v7  ;;  %v454_v47 = vrot.slane %v826_v5, 3 }
 0x113   :  { %v289_v25 = vsel %vm252_vm2, %v288_v11, %v287_v48  ;;  %v256_v52 = vsel %vm255_vm3, %v254_v54, %v253_v14  ;;  %v322_v35 = vsel %vm252_vm2, %v321_v23, %v320_v20  ;;  %v357_v43 = vsel %vm255_vm3, %v356_v57, %v355_v28 }
 0x114   :  { %v291_v42 = vsel %vm255_vm3, %v290_v55, %v289_v25  ;;  %v324_v48 = vsel %vm255_vm3, %v323_v56, %v322_v35  ;;  %v359_v41 = vsel %vm258_vm4, %v358_v16, %v357_v43  ;;  %v389_v54 = vsel %vm252_vm2, %v388_v13, %v387_v0 }
 0x115   :  { %v422_v11 = vsel %vm252_vm2, %v421_v24, %v420_v60  ;;  %v390_v55 = vsel %vm255_vm3, %v721_v34, %v389_v54  ;;  %v455_v20 = vsel %vm252_vm2, %v454_v47, %v453_v51  ;;  %v487_v56 = vrot.slane %v826_v5, 4 }
 0x116   :  { %v424_v57 = vsel %vm255_vm3, %v423_v58, %v422_v11  ;;  %v910_v16 = vsel %vm255_vm3, %v456_v59, %v455_v20  ;;  %v914_v60 = vadd.f32 %v755_v6, %v712_v27  ;;  %v207_v0 = vadd.f32 %v763_v17, %v712_v27 }
 0x117   :  { %v366_v58 = vsel %vm246_vm0, %v365_v45, %v364_v49  ;;  %v493_v5 = vrot.slane %v817_v36, 1  ;;  %v925_v51 = vsel %vm252_vm2, %v487_v56, %v486_v29  ;;  %v259_v6 = vsel %vm258_vm4, %v257_v46, %v256_v52 }
 0x118   :  { %v368_v59 = vsel %vm249_vm1, %v367_v39, %v366_v58  ;;  %v276_v17 = vrot.slane %v914_v60, 2  ;;  %v308_v33 = vrot.slane %v914_v60, 3  ;;  %v341_v21 = vrot.slane %v914_v60, 4 }
 0x119   :  { %v936_v49 = vadd.f32 %v761_v12, %v710_v26  ;;  %v374_v45 = vrot.slane %v914_v60, 5  ;;  %v407_v29 = vrot.slane %v914_v60, 6  ;;  %v440_v39 = vrot.slane %v914_v60, 7 }
 0x11a   :  { %v270_v47 = vrot.slane %v207_v0, 5  ;;  %v302_v23 = vrot.slane %v207_v0, 6  ;;  %v335_v7 = vrot.slane %v207_v0, 7  ;;  %v369_v46 = vsel %vm252_vm2, %v207_v0, %v368_v59 }
 0x11b   :  { %v402_v52 = vrot.slane %v207_v0, 1  ;;  %v371_v24 = vsel %vm255_vm3, %v370_v3, %v369_v46  ;;  %v435_v26 = vrot.slane %v207_v0, 2  ;;  %v468_v12 = vrot.slane %v207_v0, 3 }
 0x11c   :  { %v271_v13 = vsel %vm252_vm2, %v270_v47, %v269_v31  ;;  %v303_v25 = vsel %vm252_vm2, %v302_v23, %v848_v8  ;;  %v336_v28 = vsel %vm252_vm2, %v335_v7, %v844_v19  ;;  %v373_v31 = vsel %vm258_vm4, %v372_v9, %v371_v24 }
 0x11d   :  { %v273_v14 = vsel %vm255_vm3, %v272_v62, %v271_v13  ;;  %v305_v3 = vsel %vm255_vm3, %v304_v1, %v303_v25  ;;  %v338_v35 = vsel %vm255_vm3, %v337_v2, %v336_v28  ;;  %v403_v62 = vsel %vm252_vm2, %v402_v52, %v856_v37 }
 0x11e   :  { %v436_v8 = vsel %vm252_vm2, %v435_v26, %v434_v53  ;;  %v404_v19 = vsel %vm255_vm3, %v727_v40, %v403_v62  ;;  %v469_v1 = vsel %vm252_vm2, %v468_v12, %v863_v63  ;;  %v501_v43 = vrot.slane %v207_v0, 4 }
 0x11f   :  { %v970_v9 = vsel %vm255_vm3, %v437_v4, %v436_v8  ;;  %v977_v2 = vsel %vm255_vm3, %v470_v10, %v469_v1  ;;  %v262_v37 = vsel %vm261_vm5, %v260_v50, %v259_v6  ;;  %v263_v53 = vrot.slane %v936_v49, 1 }
 0x120   :  { %v1118_v54 = vrot.slane %v773_v22, 4  ;;  %v988_v11 = vsel %vm252_vm2, %v501_v43, %v866_v38  ;;  %v296_v10 = vrot.slane %v936_v49, 2  ;;  %v326_v50 = vsel %vm258_vm4, %v325_v15, %v324_v48 }
 0x121   :  { %v265_v20 = vsel %vm264_vm6, %v263_v53, %v262_v37  ;;  %v329_v56 = vrot.slane %v936_v49, 3  ;;  %v361_v38 = vsel %vm261_vm5, %v360_v30, %v359_v41  ;;  %v362_v0 = vrot.slane %v936_v49, 4 }
 0x122   :  { %v293_v4 = vsel %vm258_vm4, %v1118_v54, %v291_v42  ;;  %v328_v42 = vsel %vm261_vm5, %v327_v32, %v326_v50  ;;  %282 = vst [vmem:[#allocation2] sm:$0xff] %v265_v20  ;;  %v1119_v58 = vrot.slane %v773_v22, 7  ;;  %v395_v48 = vrot.slane %v936_v49, 5 }
 0x123   :  { %v295_v63 = vsel %vm261_vm5, %v294_v44, %v293_v4  ;;  %v330_v32 = vsel %vm264_vm6, %v329_v56, %v328_v42  ;;  %v1120_v59 = vrot.slane %v817_v36, 6  ;;  %v425_v30 = vsel %vm258_vm4, %v773_v22, %v424_v57 }
 0x124   :  { %v297_v44 = vsel %vm264_vm6, %v296_v10, %v295_v63  ;;  %v392_v15 = vsel %vm258_vm4, %v1119_v58, %v390_v55  ;;  %v428_v41 = vrot.slane %v936_v49, 6  ;;  %348 = vst [vmem:[#allocation2 + $0x20] sm:$0xff] %v330_v32  ;;  %v363_v47 = vsel %vm264_vm6, %v362_v0, %v361_v38 }
 0x125   :  { %315 = vst [vmem:[#allocation2 + $0x10] sm:$0xff] %v297_v44  ;;  %v394_v6 = vsel %vm261_vm5, %v1120_v59, %v392_v15  ;;  %v1121_v55 = vrot.slane %v817_v36, 7  ;;  %v1122_v46 = vrot.slane %v773_v22, 1  ;;  %381 = vst [vmem:[#allocation2 + $0x30] sm:$0xff] %v363_v47  ;;  %v461_v24 = vrot.slane %v936_v49, 7 }
 0x126   :  { %v396_v23 = vsel %vm264_vm6, %v395_v48, %v394_v6  ;;  %v1123_v26 = vrot.slane %v721_v34, 3  ;;  %v1124_v25 = vrot.slane %v773_v22, 2  ;;  %v1125_v62 = vrot.slane %v804_v61, 3 }
 0x127   :  { %v427_v7 = vsel %vm261_vm5, %v1121_v55, %v425_v30  ;;  %v459_v52 = vsel %vm258_vm4, %v1122_v46, %v910_v16  ;;  %414 = vst [vmem:[#allocation2 + $0x40] sm:$0xff] %v396_v23  ;;  %v227_v16 = vadd.f32 %v765_v18, %v712_v27  ;;  %v1126_v1 = vrot.slane %v804_v61, 4 }
 0x128   :  { %v429_v57 = vsel %vm264_vm6, %v428_v41, %v427_v7  ;;  %v460_v13 = vsel %vm261_vm5, %v817_v36, %v459_v52  ;;  %v490_v12 = vsel %vm255_vm3, %v1123_v26, %v925_v51  ;;  %v275_v8 = vsel %vm258_vm4, %v1125_v62, %v273_v14 }
 0x129   :  { %447 = vst [vmem:[#allocation2 + $0x50] sm:$0xff] %v429_v57  ;;  %v492_v28 = vsel %vm258_vm4, %v1124_v25, %v490_v12  ;;  %v307_v43 = vsel %vm258_vm4, %v1126_v1, %v305_v3  ;;  %v462_v34 = vsel %vm264_vm6, %v461_v24, %v460_v13  ;;  %v277_v22 = vsel %vm261_vm5, %v276_v17, %v275_v8 }
 0x12a   :  { %v494_v51 = vsel %vm261_vm5, %v493_v5, %v492_v28  ;;  %v309_v27 = vsel %vm261_vm5, %v308_v33, %v307_v43  ;;  %480 = vst [vmem:[#allocation2 + $0x60] sm:$0xff] %v462_v34  ;;  %v278_v14 = vrot.slane %v227_v16, 1  ;;  %v310_v3 = vrot.slane %v227_v16, 2 }
 0x12b   :  { %v495_v18 = vsel %vm264_vm6, %v936_v49, %v494_v51  ;;  %v1127_v37 = vrot.slane %v804_v61, 5  ;;  %v343_v17 = vrot.slane %v227_v16, 3  ;;  %v375_v33 = vsel %vm261_vm5, %v374_v45, %v373_v31 }
 0x12c   :  { %513 = vst [vmem:[#allocation2 + $0x70] sm:$0xff] %v495_v18  ;;  %v376_v53 = vrot.slane %v227_v16, 4  ;;  %v279_v54 = vsel %vm264_vm6, %v278_v14, %v277_v22  ;;  %v311_v49 = vsel %vm264_vm6, %v310_v3, %v309_v27  ;;  %v1128_v4 = vrot.slane %v804_v61, 7 }
 0x12d   :  { %v340_v36 = vsel %vm258_vm4, %v1127_v37, %v338_v35  ;;  %v409_v35 = vrot.slane %v227_v16, 5  ;;  %283 = vst [vmem:[#allocation2 + $0x8] sm:$0xff] %v279_v54  ;;  %316 = vst [vmem:[#allocation2 + $0x18] sm:$0xff] %v311_v49  ;;  %v439_v31 = vsel %vm258_vm4, %v804_v61, %v970_v9  ;;  %v442_v20 = vrot.slane %v227_v16, 6 }
 0x12e   :  { %v342_v5 = vsel %vm261_vm5, %v341_v21, %v340_v36  ;;  %v406_v63 = vsel %vm258_vm4, %v1128_v4, %v404_v19  ;;  %v377_v21 = vsel %vm264_vm6, %v376_v53, %v375_v33  ;;  %v441_v19 = vsel %vm261_vm5, %v440_v39, %v439_v31 }
 0x12f   :  { %v344_v10 = vsel %vm264_vm6, %v343_v17, %v342_v5  ;;  %v408_v45 = vsel %vm261_vm5, %v407_v29, %v406_v63  ;;  %382 = vst [vmem:[#allocation2 + $0x38] sm:$0xff] %v377_v21  ;;  %v1129_v42 = vrot.slane %v804_v61, 1  ;;  %v507_v29 = vrot.slane %v914_v60, 1 }
 0x130   :  { %349 = vst [vmem:[#allocation2 + $0x28] sm:$0xff] %v344_v10  ;;  %v410_v50 = vsel %vm264_vm6, %v409_v35, %v408_v45  ;;  %v475_v38 = vrot.slane %v227_v16, 7  ;;  %v1130_v44 = vrot.slane %v727_v40, 3  ;;  %v443_v0 = vsel %vm264_vm6, %v442_v20, %v441_v19 }
 0x131   :  { %v473_v56 = vsel %vm258_vm4, %v1129_v42, %v977_v2  ;;  %415 = vst [vmem:[#allocation2 + $0x48] sm:$0xff] %v410_v50  ;;  %v1131_v58 = vrot.slane %v804_v61, 2  ;;  %448 = vst [vmem:[#allocation2 + $0x58] sm:$0xff] %v443_v0 }
 0x132   :  { %v474_v9 = vsel %vm261_vm5, %v914_v60, %v473_v56  ;;  %v504_v39 = vsel %vm255_vm3, %v1130_v44, %v988_v11 }
 0x133   :  { %v506_v2 = vsel %vm258_vm4, %v1131_v58, %v504_v39  ;;  %v476_v15 = vsel %vm264_vm6, %v475_v38, %v474_v9 }
 0x134   :  { %v508_v48 = vsel %vm261_vm5, %v507_v29, %v506_v2  ;;  %481 = vst [vmem:[#allocation2 + $0x68] sm:$0xff] %v476_v15 }
 0x135   :  { %v509_v60 = vsel %vm264_vm6, %v227_v16, %v508_v48 }
 0x136   :  { %514 = vst [vmem:[#allocation2 + $0x78] sm:$0xff] %v509_v60 }
 0x137   :  { %610 = shalt.err (!%p607_p4)
}
 0x138   :  { %s611_s29 = scalar_lea.hbm %s1117_s3, 2048 }
 0x139   :  { %p612_p5 = scmp.ne.s32.totalorder %s1117_s3, %s611_s29  ;;  %p615_p6 = scmp.lt.u32.totalorder %s611_s29, %s1117_s3 }
 0x13b   :  { %p617_p7 = pnand %p615_p6, %p612_p5 }
 0x13d   :  { %620 = shalt.err (!%p617_p7)
}
 0x13e   :  { %s625_s7 = smov 256   ;;  %s626_s8 = smov 16  }
 0x13f   :  { %526 = dma.vmem_to_hbm [thread:$0]  %s521_s2, 2048, %s1117_s3, [#allocation3], %s625_s7, %s625_s7, %s626_s8  }
 0x140   :  { %621 = dma.done.wait [#allocation3], 2048  }
 0x141   :  { %622 = vsyncadd [#allocation3], 4294965248 }
 0x142   :  { %530 = vsyncpa [#allocation3], 1 }

// kernel: rnnlm_forward.4
= control target key start
LH: loop header
LB: loop body
LE: loop exit
PB: predicated region body
PF: predicated region fallthrough
CT: control target
= control target key end

     0   :  { %v4377_v1 = vmov 0   ;;  %s4368_s1 = inlined_call_operand.vmem [shape: bf16[128,512], index: 1, kind: input, shape index: {}]   ;;  %s4369_s0 = inlined_call_operand.vmem [shape: bf16[8,8,128], index: 0, kind: input, shape index: {}]   ;;  %s4370_s2 = inlined_call_operand.vmem [shape: bf16[128,512], index: 2, kind: input, shape index: {}]   ;;  %s4371_s4 = inlined_call_operand.vmem [shape: f32[8,128], index: 4, kind: input, shape index: {}]   ;;  %s4372_s3 = inlined_call_operand.vmem [shape: f32[1,512], index: 3, kind: input, shape index: {}]   ;;  %s4373_s5 = inlined_call_operand.vmem [shape: f32[8,128], index: 5, kind: input, shape index: {}]   ;;  %s4374_s6 = inlined_call_operand.vmem [shape: bf16[8,8,128], index: 6, kind: output, shape index: {0}]   ;;  %s4375_s8 = inlined_call_operand.vmem [shape: f32[8,128], index: 8, kind: output, shape index: {2}]   ;;  %s4376_s7 = inlined_call_operand.vmem [shape: f32[8,128], index: 7, kind: output, shape index: {1}]  }
   0x1   :  { %v3213_v0 = vld [vmem:[%s4368_s1 + $0x4] ss:$16 sps:$4 sm:$0xff]   ;;  %313 = vmatprep.mubr.bf16.mxu0 %v4377_v1  ;;  %386 = vmatprep.mubr.bf16.mxu1 %v4377_v1  ;;  %v3215_v2 = vld [vmem:[%s4368_s1 + $0xc] ss:$16 sps:$4 sm:$0xff]   ;;  %v3217_v3 = vld [vmem:[%s4368_s1] ss:$16 sps:$4 sm:$0xff]  }
   0x2   :  { %281 = vmatprep.subr.bf16.mxu0 %v3213_v0  ;;  %v3218_v4 = vld [vmem:[%s4368_s1 + $0x8] ss:$16 sps:$4 sm:$0xff]   ;;  %354 = vmatprep.subr.bf16.mxu1 %v3215_v2  ;;  %v3219_v5 = vld [vmem:[%s4368_s1 + $0x24] ss:$16 sps:$4 sm:$0xff]   ;;  %v3221_v6 = vld [vmem:[%s4368_s1 + $0x2c] ss:$16 sps:$4 sm:$0xff]  }
   0x3   :  { %282 = vmatpush1.bf16.msra.mxu0 %v3217_v3  ;;  %355 = vmatpush1.bf16.msra.mxu1 %v3218_v4  ;;  %v3223_v7 = vld [vmem:[%s4368_s1 + $0x20] ss:$16 sps:$4 sm:$0xff]   ;;  %v3224_v8 = vld [vmem:[%s4368_s1 + $0x28] ss:$16 sps:$4 sm:$0xff]   ;;  %v3225_v9 = vld [vmem:[%s4368_s1 + $0x44] ss:$16 sps:$4 sm:$0xff]  }
   0x4   :  { %283 = vmatprep.subr.bf16.mxu0 %v3219_v5  ;;  %356 = vmatprep.subr.bf16.mxu1 %v3221_v6  ;;  %v3227_v10 = vld [vmem:[%s4368_s1 + $0x4c] ss:$16 sps:$4 sm:$0xff]   ;;  %v3229_v11 = vld [vmem:[%s4368_s1 + $0x40] ss:$16 sps:$4 sm:$0xff]   ;;  %v3230_v12 = vld [vmem:[%s4368_s1 + $0x48] ss:$16 sps:$4 sm:$0xff]  }
   0x5   :  { %v3231_v13 = vld [vmem:[%s4368_s1 + $0x64] ss:$16 sps:$4 sm:$0xff]   ;;  %v3233_v14 = vld [vmem:[%s4368_s1 + $0x6c] ss:$16 sps:$4 sm:$0xff]   ;;  %v3235_v15 = vld [vmem:[%s4368_s1 + $0x60] ss:$16 sps:$4 sm:$0xff]  }
   0x6   :  { %v3236_v16 = vld [vmem:[%s4368_s1 + $0x68] ss:$16 sps:$4 sm:$0xff]   ;;  %v3237_v17 = vld [vmem:[%s4368_s1 + $0x84] ss:$16 sps:$4 sm:$0xff]   ;;  %v3239_v18 = vld [vmem:[%s4368_s1 + $0x8c] ss:$16 sps:$4 sm:$0xff]  }
   0x7   :  { %284 = vmatpush1.bf16.msra.mxu0 %v3223_v7  ;;  %357 = vmatpush1.bf16.msra.mxu1 %v3224_v8  ;;  %v3241_v19 = vld [vmem:[%s4368_s1 + $0x80] ss:$16 sps:$4 sm:$0xff]   ;;  %v3242_v20 = vld [vmem:[%s4368_s1 + $0x88] ss:$16 sps:$4 sm:$0xff]   ;;  %v3243_v21 = vld [vmem:[%s4368_s1 + $0xa4] ss:$16 sps:$4 sm:$0xff]   ;;  %v77_v8 = vlaneseq }
   0x8   :  { %285 = vmatprep.subr.bf16.mxu0 %v3225_v9  ;;  %358 = vmatprep.subr.bf16.mxu1 %v3227_v10  ;;  %v3245_v22 = vld [vmem:[%s4368_s1 + $0xac] ss:$16 sps:$4 sm:$0xff]   ;;  %v3247_v23 = vld [vmem:[%s4368_s1 + $0xa0] ss:$16 sps:$4 sm:$0xff]   ;;  %v3248_v24 = vld [vmem:[%s4368_s1 + $0xa8] ss:$16 sps:$4 sm:$0xff]  }
   0x9   :  { %v3249_v25 = vld [vmem:[%s4368_s1 + $0xc4] ss:$16 sps:$4 sm:$0xff]   ;;  %v3251_v26 = vld [vmem:[%s4368_s1 + $0xcc] ss:$16 sps:$4 sm:$0xff]   ;;  %v3253_v27 = vld [vmem:[%s4368_s1 + $0xc0] ss:$16 sps:$4 sm:$0xff]  }
   0xa   :  { %v3254_v28 = vld [vmem:[%s4368_s1 + $0xc8] ss:$16 sps:$4 sm:$0xff]   ;;  %v3255_v29 = vld [vmem:[%s4368_s1 + $0xe4] ss:$16 sps:$4 sm:$0xff]   ;;  %v3257_v30 = vld [vmem:[%s4368_s1 + $0xec] ss:$16 sps:$4 sm:$0xff]  }
   0xb   :  { %286 = vmatpush1.bf16.msra.mxu0 %v3229_v11  ;;  %359 = vmatpush1.bf16.msra.mxu1 %v3230_v12  ;;  %v3259_v31 = vld [vmem:[%s4368_s1 + $0xe0] ss:$16 sps:$4 sm:$0xff]   ;;  %v3260_v32 = vld [vmem:[%s4368_s1 + $0xe8] ss:$16 sps:$4 sm:$0xff]   ;;  %v3588_v33 = vld [vmem:[%s4370_s2 + $0x4] ss:$16 sps:$4 sm:$0xff]  }
   0xc   :  { %287 = vmatprep.subr.bf16.mxu0 %v3231_v13  ;;  %360 = vmatprep.subr.bf16.mxu1 %v3233_v14  ;;  %v3593_v34 = vld [vmem:[%s4370_s2 + $0xc] ss:$16 sps:$4 sm:$0xff]   ;;  %v3261_v35 = vld [vmem:[%s4369_s0] sm:$0xff]   ;;  %v3606_v37 = vld [vmem:[%s4370_s2 + $0x8] ss:$16 sps:$4 sm:$0xff]   ;;  %v78_v9 = vshrl.u32 %v77_v8, 7 }
   0xd   :  { %v3601_v36 = vld [vmem:[%s4370_s2] ss:$16 sps:$4 sm:$0xff]   ;;  %v3613_v38 = vld [vmem:[%s4370_s2 + $0x24] ss:$16 sps:$4 sm:$0xff]   ;;  %v3618_v39 = vld [vmem:[%s4370_s2 + $0x2c] ss:$16 sps:$4 sm:$0xff]  }
   0xe   :  { %v3623_v40 = vld [vmem:[%s4370_s2 + $0x20] ss:$16 sps:$4 sm:$0xff]   ;;  %v3630_v41 = vld [vmem:[%s4370_s2 + $0x28] ss:$16 sps:$4 sm:$0xff]   ;;  %v3637_v42 = vld [vmem:[%s4370_s2 + $0x44] ss:$16 sps:$4 sm:$0xff]  }
   0xf   :  { %288 = vmatpush1.bf16.msra.mxu0 %v3235_v15  ;;  %361 = vmatpush1.bf16.msra.mxu1 %v3236_v16  ;;  %v3642_v43 = vld [vmem:[%s4370_s2 + $0x4c] ss:$16 sps:$4 sm:$0xff]   ;;  %v3652_v45 = vld [vmem:[%s4370_s2 + $0x40] ss:$16 sps:$4 sm:$0xff]   ;;  %v3657_v46 = vld [vmem:[%s4370_s2 + $0x48] ss:$16 sps:$4 sm:$0xff]  }
  0x10   :  { %289 = vmatprep.subr.bf16.mxu0 %v3237_v17  ;;  %362 = vmatprep.subr.bf16.mxu1 %v3239_v18  ;;  %v3274_v44 = vld [vmem:[%s4369_s0 + $0x8] sm:$0xff]   ;;  %v3664_v47 = vld [vmem:[%s4370_s2 + $0x64] ss:$16 sps:$4 sm:$0xff]   ;;  %v3676_v49 = vld [vmem:[%s4370_s2 + $0x60] ss:$16 sps:$4 sm:$0xff]   ;;  %v87_v10 = vsub.s32 2, %v78_v9 }
  0x11   :  { %v3671_v48 = vld [vmem:[%s4370_s2 + $0x6c] ss:$16 sps:$4 sm:$0xff]   ;;  %v3681_v50 = vld [vmem:[%s4370_s2 + $0x68] ss:$16 sps:$4 sm:$0xff]   ;;  %v3688_v51 = vld [vmem:[%s4370_s2 + $0x84] ss:$16 sps:$4 sm:$0xff]  }
  0x12   :  { %v3695_v52 = vld [vmem:[%s4370_s2 + $0x8c] ss:$16 sps:$4 sm:$0xff]   ;;  %v3287_v53 = vld [vmem:[%s4369_s0 + $0x10] sm:$0xff]   ;;  %v3710_v55 = vld [vmem:[%s4370_s2 + $0x88] ss:$16 sps:$4 sm:$0xff]   ;;  %v91_v11 = vsub.s32 3, %v78_v9 }
  0x13   :  { %290 = vmatpush1.bf16.msra.mxu0 %v3241_v19  ;;  %363 = vmatpush1.bf16.msra.mxu1 %v3242_v20  ;;  %v3705_v54 = vld [vmem:[%s4370_s2 + $0x80] ss:$16 sps:$4 sm:$0xff]   ;;  %v3715_v56 = vld [vmem:[%s4370_s2 + $0xa4] ss:$16 sps:$4 sm:$0xff]   ;;  %v3720_v57 = vld [vmem:[%s4370_s2 + $0xac] ss:$16 sps:$4 sm:$0xff]  }
  0x14   :  { %291 = vmatprep.subr.bf16.mxu0 %v3243_v21  ;;  %364 = vmatprep.subr.bf16.mxu1 %v3245_v22  ;;  %v3729_v58 = vld [vmem:[%s4370_s2 + $0xa0] ss:$16 sps:$4 sm:$0xff]   ;;  %v3734_v59 = vld [vmem:[%s4370_s2 + $0xa8] ss:$16 sps:$4 sm:$0xff]   ;;  %v3739_v60 = vld [vmem:[%s4370_s2 + $0xc4] ss:$16 sps:$4 sm:$0xff]  }
  0x15   :  { %v3744_v61 = vld [vmem:[%s4370_s2 + $0xcc] ss:$16 sps:$4 sm:$0xff]   ;;  %v3758_v63 = vld [vmem:[%s4370_s2 + $0xc0] ss:$16 sps:$4 sm:$0xff]   ;;  %v3763_v0 = vld [vmem:[%s4370_s2 + $0xc8] ss:$16 sps:$4 sm:$0xff]  }
  0x16   :  { %v3300_v62 = vld [vmem:[%s4369_s0 + $0x18] sm:$0xff]   ;;  %v3768_v2 = vld [vmem:[%s4370_s2 + $0xe4] ss:$16 sps:$4 sm:$0xff]   ;;  %v3784_v4 = vld [vmem:[%s4370_s2 + $0xe0] ss:$16 sps:$4 sm:$0xff]   ;;  %v79_v12 = vsub.s32 0, %v78_v9 }
  0x17   :  { %292 = vmatpush1.bf16.msra.mxu0 %v3247_v23  ;;  %365 = vmatpush1.bf16.msra.mxu1 %v3248_v24  ;;  %v3773_v3 = vld [vmem:[%s4370_s2 + $0xec] ss:$16 sps:$4 sm:$0xff]   ;;  %v3789_v5 = vld [vmem:[%s4370_s2 + $0xe8] ss:$16 sps:$4 sm:$0xff]   ;;  %v31_v6 = vld [vmem:[%s4371_s4] sm:$0xff]  ;;  %v83_v14 = vsub.s32 1, %v78_v9 }
  0x18   :  { %293 = vmatprep.subr.bf16.mxu0 %v3249_v25  ;;  %366 = vmatprep.subr.bf16.mxu1 %v3251_v26  ;;  %v465_v7 = vpack.c.bf16 %v31_v6, %v31_v6  ;;  %v75_v13 = vld [vmem:[%s4372_s3] sm:$0xf] }
  0x19   :  { %v3839_v15 = vrot.slane %v75_v13, %v87_v10  ;;  %v3845_v18 = vrot.slane %v75_v13, %v91_v11  ;;  %v80_v19 = vrot.slane %v75_v13, %v79_v12  ;;  %v84_v22 = vrot.slane %v75_v13, %v83_v14 }
  0x1b   :  { %294 = vmatpush1.bf16.msra.mxu0 %v3253_v27  ;;  %367 = vmatpush1.bf16.msra.mxu1 %v3254_v28 }
  0x1c   :  { %295 = vmatprep.subr.bf16.mxu0 %v3255_v29  ;;  %368 = vmatprep.subr.bf16.mxu1 %v3257_v30 }
  0x1f   :  { %296 = vmatpush1.bf16.msra.mxu0 %v3259_v31  ;;  %369 = vmatpush1.bf16.msra.mxu1 %v3260_v32 }
  0x20   :  { %658 = vmatprep.subr.bf16.mxu0 %v3588_v33  ;;  %699 = vmatprep.subr.bf16.mxu1 %v3593_v34 }
  0x22   :  { %314 = vmatmul.mubr.bf16.vlgmr.msra.gmra.mrb[0].mxu0 %v3261_v35  ;;  %387 = vmatmul.mubr.bf16.vlgmr.msra.gmra.mrb[0].mxu1 %v3261_v35 }
  0x23   :  { %659 = vmatpush1.bf16.msra.mxu0 %v3601_v36  ;;  %700 = vmatpush1.bf16.msra.mxu1 %v3606_v37 }
  0x24   :  { %660 = vmatprep.subr.bf16.mxu0 %v3613_v38  ;;  %701 = vmatprep.subr.bf16.mxu1 %v3618_v39 }
  0x25   :  { %323 = vmatprep.mubr.bf16.mxu0 %v4377_v1  ;;  %396 = vmatprep.mubr.bf16.mxu1 %v4377_v1 }
  0x27   :  { %661 = vmatpush1.bf16.msra.mxu0 %v3623_v40  ;;  %702 = vmatpush1.bf16.msra.mxu1 %v3630_v41 }
  0x28   :  { %662 = vmatprep.subr.bf16.mxu0 %v3637_v42  ;;  %703 = vmatprep.subr.bf16.mxu1 %v3642_v43 }
  0x2a   :  { %324 = vmatmul.mubr.bf16.gmra.mrb[4].mxu0 %v3274_v44  ;;  %397 = vmatmul.mubr.bf16.gmra.mrb[4].mxu1 %v3274_v44 }
  0x2b   :  { %663 = vmatpush1.bf16.msra.mxu0 %v3652_v45  ;;  %704 = vmatpush1.bf16.msra.mxu1 %v3657_v46 }
  0x2c   :  { %664 = vmatprep.subr.bf16.mxu0 %v3664_v47  ;;  %705 = vmatprep.subr.bf16.mxu1 %v3671_v48 }
  0x2d   :  { %333 = vmatprep.mubr.bf16.mxu0 %v4377_v1  ;;  %406 = vmatprep.mubr.bf16.mxu1 %v4377_v1 }
  0x2f   :  { %665 = vmatpush1.bf16.msra.mxu0 %v3676_v49  ;;  %706 = vmatpush1.bf16.msra.mxu1 %v3681_v50 }
  0x30   :  { %666 = vmatprep.subr.bf16.mxu0 %v3688_v51  ;;  %707 = vmatprep.subr.bf16.mxu1 %v3695_v52 }
  0x32   :  { %334 = vmatmul.mubr.bf16.gmra.mrb[8].mxu0 %v3287_v53  ;;  %407 = vmatmul.mubr.bf16.gmra.mrb[8].mxu1 %v3287_v53 }
  0x33   :  { %667 = vmatpush1.bf16.msra.mxu0 %v3705_v54  ;;  %708 = vmatpush1.bf16.msra.mxu1 %v3710_v55 }
  0x34   :  { %668 = vmatprep.subr.bf16.mxu0 %v3715_v56  ;;  %709 = vmatprep.subr.bf16.mxu1 %v3720_v57 }
  0x35   :  { %343 = vmatprep.mubr.bf16.mxu0 %v4377_v1  ;;  %416 = vmatprep.mubr.bf16.mxu1 %v4377_v1 }
  0x37   :  { %669 = vmatpush1.bf16.msra.mxu0 %v3729_v58  ;;  %710 = vmatpush1.bf16.msra.mxu1 %v3734_v59 }
  0x38   :  { %670 = vmatprep.subr.bf16.mxu0 %v3739_v60  ;;  %711 = vmatprep.subr.bf16.mxu1 %v3744_v61 }
  0x3a   :  { %344 = vmatmul.mubr.bf16.gmra.mrb[12].mxu0 %v3300_v62  ;;  %417 = vmatmul.mubr.bf16.gmra.mrb[12].mxu1 %v3300_v62 }
  0x3b   :  { %671 = vmatpush1.bf16.msra.mxu0 %v3758_v63  ;;  %712 = vmatpush1.bf16.msra.mxu1 %v3763_v0 }
  0x3c   :  { %672 = vmatprep.subr.bf16.mxu0 %v3768_v2  ;;  %713 = vmatprep.subr.bf16.mxu1 %v3773_v3 }
  0x3d   :  { %690 = vmatprep.mubr.bf16.mxu0 %v4377_v1  ;;  %731 = vmatprep.mubr.bf16.mxu1 %v4377_v1 }
  0x3f   :  { %673 = vmatpush1.bf16.msra.mxu0 %v3784_v4  ;;  %714 = vmatpush1.bf16.msra.mxu1 %v3789_v5 }
  0x40   :  { %961 = vmatprep.subr.bf16.mxu0 %v3588_v33  ;;  %1002 = vmatprep.subr.bf16.mxu1 %v3593_v34 }
  0x42   :  { %691 = vmatmul.mubr.bf16.vlgmr.msra.gmra.mrb[16].mxu0 %v465_v7  ;;  %732 = vmatmul.mubr.bf16.vlgmr.msra.gmra.mrb[16].mxu1 %v465_v7 }
  0x43   :  { %962 = vmatpush1.bf16.msra.mxu0 %v3601_v36  ;;  %1003 = vmatpush1.bf16.msra.mxu1 %v3606_v37 }
  0x44   :  { %963 = vmatprep.subr.bf16.mxu0 %v3613_v38  ;;  %1004 = vmatprep.subr.bf16.mxu1 %v3618_v39 }
  0x45   :  { %993 = vmatprep.mubr.bf16.mxu0 %v4377_v1  ;;  %1034 = vmatprep.mubr.bf16.mxu1 %v4377_v1 }
  0x47   :  { %964 = vmatpush1.bf16.msra.mxu0 %v3623_v40  ;;  %1005 = vmatpush1.bf16.msra.mxu1 %v3630_v41 }
  0x48   :  { %965 = vmatprep.subr.bf16.mxu0 %v3637_v42  ;;  %1006 = vmatprep.subr.bf16.mxu1 %v3642_v43 }
  0x4b   :  { %966 = vmatpush1.bf16.msra.mxu0 %v3652_v45  ;;  %1007 = vmatpush1.bf16.msra.mxu1 %v3657_v46 }
  0x4c   :  { %967 = vmatprep.subr.bf16.mxu0 %v3664_v47  ;;  %1008 = vmatprep.subr.bf16.mxu1 %v3671_v48 }
  0x4f   :  { %968 = vmatpush1.bf16.msra.mxu0 %v3676_v49  ;;  %1009 = vmatpush1.bf16.msra.mxu1 %v3681_v50 }
  0x50   :  { %969 = vmatprep.subr.bf16.mxu0 %v3688_v51  ;;  %1010 = vmatprep.subr.bf16.mxu1 %v3695_v52 }
  0x53   :  { %970 = vmatpush1.bf16.msra.mxu0 %v3705_v54  ;;  %1011 = vmatpush1.bf16.msra.mxu1 %v3710_v55 }
  0x54   :  { %971 = vmatprep.subr.bf16.mxu0 %v3715_v56  ;;  %1012 = vmatprep.subr.bf16.mxu1 %v3720_v57 }
  0x57   :  { %972 = vmatpush1.bf16.msra.mxu0 %v3729_v58  ;;  %1013 = vmatpush1.bf16.msra.mxu1 %v3734_v59 }
  0x58   :  { %973 = vmatprep.subr.bf16.mxu0 %v3739_v60  ;;  %1014 = vmatprep.subr.bf16.mxu1 %v3744_v61 }
  0x5b   :  { %974 = vmatpush1.bf16.msra.mxu0 %v3758_v63  ;;  %1015 = vmatpush1.bf16.msra.mxu1 %v3763_v0 }
  0x5c   :  { %975 = vmatprep.subr.bf16.mxu0 %v3768_v2  ;;  %1016 = vmatprep.subr.bf16.mxu1 %v3773_v3 }
  0x5f   :  { %976 = vmatpush1.bf16.msra.mxu0 %v3784_v4  ;;  %1017 = vmatpush1.bf16.msra.mxu1 %v3789_v5 }
  0x60   :  { %1265 = vmatprep.subr.bf16.mxu0 %v3588_v33  ;;  %1306 = vmatprep.subr.bf16.mxu1 %v3593_v34 }
  0xf5   :  { %v3841_v16 = vpop.f32.mrb[0].mxu0  ;;  %v3843_v17 = vpop.f32.mrb[0].mxu1 }
  0xf6   :  { %v317_v20 = vpop.f32.mrb[1].mxu0  ;;  %v390_v21 = vpop.f32.mrb[1].mxu1 }
  0xf7   :  { %v319_v23 = vpop.f32.mrb[2].mxu0  ;;  %v392_v24 = vpop.f32.mrb[2].mxu1 }
  0xf8   :  { %v3847_v25 = vadd.f32 %v319_v23, %v80_v19  ;;  %v321_v26 = vpop.f32.mrb[3].mxu0  ;;  %v3850_v27 = vadd.f32 %v392_v24, %v3839_v15  ;;  %v394_v28 = vpop.f32.mrb[3].mxu1 }
  0xf9   :  { %v3852_v29 = vadd.f32 %v321_v26, %v84_v22  ;;  %v3855_v30 = vadd.f32 %v394_v28, %v3845_v18 }
  0xfd   :  { %v325_v31 = vpop.f32.mrb[4].mxu0  ;;  %v398_v32 = vpop.f32.mrb[4].mxu1 }
  0xfe   :  { %v3857_v35 = vadd.f32 %v325_v31, %v80_v19  ;;  %v327_v44 = vpop.f32.mrb[5].mxu0  ;;  %v3860_v53 = vadd.f32 %v398_v32, %v3839_v15  ;;  %v400_v62 = vpop.f32.mrb[5].mxu1 }
  0xff   :  { %v3862_v6 = vadd.f32 %v327_v44, %v84_v22  ;;  %v329_v7 = vpop.f32.mrb[6].mxu0  ;;  %v3865_v8 = vadd.f32 %v400_v62, %v3845_v18  ;;  %v402_v9 = vpop.f32.mrb[6].mxu1 }
 0x100   :  { %v3867_v10 = vadd.f32 %v329_v7, %v80_v19  ;;  %v331_v11 = vpop.f32.mrb[7].mxu0  ;;  %v3870_v12 = vadd.f32 %v402_v9, %v3839_v15  ;;  %v404_v13 = vpop.f32.mrb[7].mxu1 }
 0x101   :  { %4379 = vst [vmem:[#allocation5_spill] sm:$0xff] %v3865_v8  ;;  %v3872_v14 = vadd.f32 %v331_v11, %v84_v22  ;;  %v3875_v23 = vadd.f32 %v404_v13, %v3845_v18 }
 0x102   :  { %4380 = vst [vmem:[#allocation6_spill] sm:$0xff] %v3867_v10  ;;  %4381 = vst [vmem:[#allocation7_spill] sm:$0xff] %v3870_v12 }
 0x103   :  { %4382 = vst [vmem:[#allocation8_spill] sm:$0xff] %v3872_v14  ;;  %4383 = vst [vmem:[#allocation9_spill] sm:$0xff] %v3875_v23 }
 0x105   :  { %v335_v24 = vpop.f32.mrb[8].mxu0  ;;  %v408_v26 = vpop.f32.mrb[8].mxu1 }
 0x106   :  { %v3877_v28 = vadd.f32 %v335_v24, %v80_v19  ;;  %v337_v31 = vpop.f32.mrb[9].mxu0  ;;  %v3880_v32 = vadd.f32 %v408_v26, %v3839_v15  ;;  %v410_v44 = vpop.f32.mrb[9].mxu1 }
 0x107   :  { %v3882_v62 = vadd.f32 %v337_v31, %v84_v22  ;;  %v339_v7 = vpop.f32.mrb[10].mxu0  ;;  %v3885_v9 = vadd.f32 %v410_v44, %v3845_v18  ;;  %v412_v11 = vpop.f32.mrb[10].mxu1 }
 0x108   :  { %4384 = vst [vmem:[#allocation10_spill] sm:$0xff] %v3877_v28  ;;  %4385 = vst [vmem:[#allocation11_spill] sm:$0xff] %v3880_v32  ;;  %v3887_v1 = vadd.f32 %v339_v7, %v80_v19  ;;  %v341_v13 = vpop.f32.mrb[11].mxu0  ;;  %v3890_v23 = vadd.f32 %v412_v11, %v3839_v15  ;;  %v414_v24 = vpop.f32.mrb[11].mxu1 }
 0x109   :  { %4386 = vst [vmem:[#allocation12_spill] sm:$0xff] %v3882_v62  ;;  %4387 = vst [vmem:[#allocation13_spill] sm:$0xff] %v3885_v9  ;;  %v3892_v28 = vadd.f32 %v341_v13, %v84_v22  ;;  %v3895_v26 = vadd.f32 %v414_v24, %v3845_v18 }
 0x10a   :  { %4388 = vst [vmem:[#allocation14_spill] sm:$0xff] %v3887_v1  ;;  %4389 = vst [vmem:[#allocation15_spill] sm:$0xff] %v3890_v23 }
 0x10b   :  { %4390 = vst [vmem:[#allocation16_spill] sm:$0xff] %v3892_v28  ;;  %4391 = vst [vmem:[#allocation17_spill] sm:$0xff] %v3895_v26 }
 0x10d   :  { %v345_v32 = vpop.f32.mrb[12].mxu0  ;;  %v418_v31 = vpop.f32.mrb[12].mxu1 }
 0x10e   :  { %v3897_v62 = vadd.f32 %v345_v32, %v80_v19  ;;  %v347_v14 = vpop.f32.mrb[13].mxu0  ;;  %v3900_v44 = vadd.f32 %v418_v31, %v3839_v15  ;;  %v420_v7 = vpop.f32.mrb[13].mxu1 }
 0x10f   :  { %v3902_v1 = vadd.f32 %v347_v14, %v84_v22  ;;  %v349_v9 = vpop.f32.mrb[14].mxu0  ;;  %v3905_v11 = vadd.f32 %v420_v7, %v3845_v18  ;;  %v422_v13 = vpop.f32.mrb[14].mxu1  ;;  %v316_v14 = vadd.f32 %v3841_v16, %v80_v19  ;;  %v318_v7 = vadd.f32 %v317_v20, %v84_v22 }
 0x110   :  { %4392 = vst [vmem:[#allocation18_spill] sm:$0xff] %v3897_v62  ;;  %4393 = vst [vmem:[#allocation19_spill] sm:$0xff] %v3900_v44  ;;  %v3907_v28 = vadd.f32 %v349_v9, %v80_v19  ;;  %v351_v24 = vpop.f32.mrb[15].mxu0  ;;  %v3910_v26 = vadd.f32 %v422_v13, %v3839_v15  ;;  %v424_v32 = vpop.f32.mrb[15].mxu1 }
 0x111   :  { %4394 = vst [vmem:[#allocation20_spill] sm:$0xff] %v3902_v1  ;;  %4395 = vst [vmem:[#allocation21_spill] sm:$0xff] %v3905_v11  ;;  %v3912_v62 = vadd.f32 %v351_v24, %v84_v22  ;;  %v3915_v31 = vadd.f32 %v424_v32, %v3845_v18  ;;  %v389_v1 = vadd.f32 %v3843_v17, %v3839_v15 }
 0x112   :  { %4396 = vst [vmem:[#allocation22_spill] sm:$0xff] %v3907_v28  ;;  %4397 = vst [vmem:[#allocation23_spill] sm:$0xff] %v3910_v26  ;;  %v391_v11 = vadd.f32 %v390_v21, %v3845_v18  ;;  %v33_v21 = vld [vmem:[%s4373_s5] sm:$0xff] }
 0x113   :  { %4398 = vst [vmem:[#allocation24_spill] sm:$0xff] %v3912_v62  ;;  %4399 = vst [vmem:[#allocation25_spill] sm:$0xff] %v3915_v31 }
 0x115   :  { %v692_v9 = vpop.f32.mrb[16].mxu0  ;;  %v733_v28 = vpop.f32.mrb[16].mxu1 }
 0x116   :  { %v740_v44 = vadd.f32 %v692_v9, %v316_v14  ;;  %v742_v23 = vadd.f32 %v733_v28, %v389_v1  ;;  %v694_v13 = vpop.f32.mrb[17].mxu0  ;;  %v735_v26 = vpop.f32.mrb[17].mxu1  ;;  %v4400_v14 = vmov 0  }
 0x117   :  { %v741_v12 = vadd.f32 %v694_v13, %v318_v7  ;;  %v743_v24 = vadd.f32 %v735_v26, %v391_v11  ;;  %v696_v62 = vpop.f32.mrb[18].mxu0  ;;  %v737_v10 = vpop.f32.mrb[18].mxu1 }
 0x118   :  { %v744_v32 = vmul.f32 0.5, %v740_v44  ;;  %v697_v31 = vpop.f32.mrb[19].mxu0  ;;  %v738_v8 = vpop.f32.mrb[19].mxu1 }
 0x119   :  { %v748_v16 = vmul.f32 0.5, %v741_v12  ;;  %v753_v15 = vmul.f32 0.5, %v743_v24 }
 0x11a   :  { %3361 = vtanh.f32 %v744_v32 }
 0x11b   :  { %3363 = vtanh.f32 %v748_v16 }
 0x11c   :  { %3365 = vtanh.f32 %v742_v23 }
 0x11d   :  { %3367 = vtanh.f32 %v753_v15 }
 0x124   :  { %v3362_v17 = vpop.eup %3361 }
 0x125   :  { %v3364_v18 = vpop.eup %3363  ;;  %v746_v19 = vmul.f32 0.5, %v3362_v17 }
 0x126   :  { %v750_v20 = vmul.f32 0.5, %v3364_v18  ;;  %v3366_v22 = vpop.eup %3365 }
 0x127   :  { %v747_v1 = vadd.f32 0.5, %v746_v19  ;;  %v3368_v12 = vpop.eup %3367 }
 0x128   :  { %v751_v10 = vadd.f32 0.5, %v750_v20  ;;  %v755_v23 = vmul.f32 0.5, %v3368_v12 }
 0x129   :  { %v758_v28 = vmul.f32 %v3366_v22, %v747_v1 }
 0x12a   :  { %v757_v62 = vmul.f32 %v751_v10, %v33_v21  ;;  %v756_v26 = vadd.f32 0.5, %v755_v23 }
 0x12c   :  { %v3924_v8 = vadd.f32 %v758_v28, %v757_v62 }
 0x12e   :  { %3369 = vtanh.f32 %v3924_v8 }
 0x138   :  { %v3370_v44 = vpop.eup %3369 }
 0x139   :  { %v761_v11 = vmul.f32 %v3370_v44, %v756_v26 }
 0x13b   :  { %v762_v31 = vpack.c.bf16 %v761_v11, %v761_v11 }
 0x13d   :  { %763 = vst [vmem:[%s4374_s6] sm:$0xf] %v762_v31  ;;  %994 = vmatmul.mubr.bf16.vlgmr.msra.gmra.mrb[20].mxu0 %v762_v31  ;;  %1035 = vmatmul.mubr.bf16.vlgmr.msra.gmra.mrb[20].mxu1 %v762_v31 }
 0x13e   :  { %1266 = vmatpush1.bf16.msra.mxu0 %v3601_v36  ;;  %1307 = vmatpush1.bf16.msra.mxu1 %v3606_v37 }
 0x13f   :  { %1267 = vmatprep.subr.bf16.mxu0 %v3613_v38  ;;  %1308 = vmatprep.subr.bf16.mxu1 %v3618_v39 }
 0x140   :  { %1297 = vmatprep.mubr.bf16.mxu0 %v4400_v14  ;;  %1338 = vmatprep.mubr.bf16.mxu1 %v4400_v14 }
 0x142   :  { %1268 = vmatpush1.bf16.msra.mxu0 %v3623_v40  ;;  %1309 = vmatpush1.bf16.msra.mxu1 %v3630_v41 }
 0x143   :  { %1269 = vmatprep.subr.bf16.mxu0 %v3637_v42  ;;  %1310 = vmatprep.subr.bf16.mxu1 %v3642_v43 }
 0x146   :  { %1270 = vmatpush1.bf16.msra.mxu0 %v3652_v45  ;;  %1311 = vmatpush1.bf16.msra.mxu1 %v3657_v46 }
 0x147   :  { %1271 = vmatprep.subr.bf16.mxu0 %v3664_v47  ;;  %1312 = vmatprep.subr.bf16.mxu1 %v3671_v48 }
 0x14a   :  { %1272 = vmatpush1.bf16.msra.mxu0 %v3676_v49  ;;  %1313 = vmatpush1.bf16.msra.mxu1 %v3681_v50 }
 0x14b   :  { %1273 = vmatprep.subr.bf16.mxu0 %v3688_v51  ;;  %1314 = vmatprep.subr.bf16.mxu1 %v3695_v52 }
 0x14e   :  { %1274 = vmatpush1.bf16.msra.mxu0 %v3705_v54  ;;  %1315 = vmatpush1.bf16.msra.mxu1 %v3710_v55 }
 0x14f   :  { %1275 = vmatprep.subr.bf16.mxu0 %v3715_v56  ;;  %1316 = vmatprep.subr.bf16.mxu1 %v3720_v57 }
 0x152   :  { %1276 = vmatpush1.bf16.msra.mxu0 %v3729_v58  ;;  %1317 = vmatpush1.bf16.msra.mxu1 %v3734_v59 }
 0x153   :  { %1277 = vmatprep.subr.bf16.mxu0 %v3739_v60  ;;  %1318 = vmatprep.subr.bf16.mxu1 %v3744_v61 }
 0x156   :  { %1278 = vmatpush1.bf16.msra.mxu0 %v3758_v63  ;;  %1319 = vmatpush1.bf16.msra.mxu1 %v3763_v0 }
 0x157   :  { %1279 = vmatprep.subr.bf16.mxu0 %v3768_v2  ;;  %1320 = vmatprep.subr.bf16.mxu1 %v3773_v3 }
 0x15a   :  { %1280 = vmatpush1.bf16.msra.mxu0 %v3784_v4  ;;  %1321 = vmatpush1.bf16.msra.mxu1 %v3789_v5 }
 0x15b   :  { %1569 = vmatprep.subr.bf16.mxu0 %v3588_v33  ;;  %1610 = vmatprep.subr.bf16.mxu1 %v3593_v34 }
 0x210   :  { %v995_v7 = vpop.f32.mrb[20].mxu0  ;;  %v1036_v9 = vpop.f32.mrb[20].mxu1 }
 0x211   :  { %v1043_v13 = vadd.f32 %v995_v7, %v3847_v25  ;;  %v1045_v24 = vadd.f32 %v1036_v9, %v3850_v27  ;;  %v997_v32 = vpop.f32.mrb[21].mxu0  ;;  %v1038_v16 = vpop.f32.mrb[21].mxu1 }
 0x212   :  { %v1044_v15 = vadd.f32 %v997_v32, %v3852_v29  ;;  %v1046_v17 = vadd.f32 %v1038_v16, %v3855_v30  ;;  %v999_v18 = vpop.f32.mrb[22].mxu0  ;;  %v1040_v19 = vpop.f32.mrb[22].mxu1  ;;  %v4047_v32 = vld [vmem:[%s4370_s2 + $0x24] ss:$16 sps:$4 sm:$0xff]   ;;  %v4052_v16 = vld [vmem:[%s4370_s2 + $0x2c] ss:$16 sps:$4 sm:$0xff]  }
 0x213   :  { %v1047_v20 = vmul.f32 0.5, %v1043_v13  ;;  %v1000_v1 = vpop.f32.mrb[23].mxu0  ;;  %v1041_v21 = vpop.f32.mrb[23].mxu1  ;;  %v4033_v13 = vld [vmem:[%s4370_s2] ss:$16 sps:$4 sm:$0xff]  }
 0x214   :  { %v1051_v33 = vmul.f32 0.5, %v1044_v15  ;;  %v1056_v34 = vmul.f32 0.5, %v1046_v17  ;;  %v4057_v15 = vld [vmem:[%s4370_s2 + $0x20] ss:$16 sps:$4 sm:$0xff]   ;;  %v4062_v17 = vld [vmem:[%s4370_s2 + $0x28] ss:$16 sps:$4 sm:$0xff]  }
 0x215   :  { %3371 = vtanh.f32 %v1047_v20  ;;  %v4071_v18 = vld [vmem:[%s4370_s2 + $0x44] ss:$16 sps:$4 sm:$0xff]   ;;  %v4076_v19 = vld [vmem:[%s4370_s2 + $0x4c] ss:$16 sps:$4 sm:$0xff]   ;;  %v4081_v20 = vld [vmem:[%s4370_s2 + $0x40] ss:$16 sps:$4 sm:$0xff]  }
 0x216   :  { %3373 = vtanh.f32 %v1051_v33  ;;  %v4086_v1 = vld [vmem:[%s4370_s2 + $0x48] ss:$16 sps:$4 sm:$0xff]   ;;  %v4095_v21 = vld [vmem:[%s4370_s2 + $0x64] ss:$16 sps:$4 sm:$0xff]   ;;  %v4100_v33 = vld [vmem:[%s4370_s2 + $0x6c] ss:$16 sps:$4 sm:$0xff]  }
 0x217   :  { %3375 = vtanh.f32 %v1045_v24  ;;  %v4038_v24 = vld [vmem:[%s4370_s2 + $0x8] ss:$16 sps:$4 sm:$0xff]  }
 0x218   :  { %3377 = vtanh.f32 %v1056_v34  ;;  %v4105_v34 = vld [vmem:[%s4370_s2 + $0x60] ss:$16 sps:$4 sm:$0xff]  }
 0x21f   :  { %v3372_v22 = vpop.eup %3371 }
 0x220   :  { %v3374_v25 = vpop.eup %3373  ;;  %v1049_v10 = vmul.f32 0.5, %v3372_v22  ;;  %v4110_v22 = vld [vmem:[%s4370_s2 + $0x68] ss:$16 sps:$4 sm:$0xff]  }
 0x221   :  { %v1053_v27 = vmul.f32 0.5, %v3374_v25  ;;  %v3376_v62 = vpop.eup %3375  ;;  %v4119_v25 = vld [vmem:[%s4370_s2 + $0x84] ss:$16 sps:$4 sm:$0xff]  }
 0x222   :  { %v1050_v28 = vadd.f32 0.5, %v1049_v10  ;;  %v3378_v26 = vpop.eup %3377  ;;  %v4124_v10 = vld [vmem:[%s4370_s2 + $0x8c] ss:$16 sps:$4 sm:$0xff]  }
 0x223   :  { %v1054_v29 = vadd.f32 0.5, %v1053_v27  ;;  %v1058_v44 = vmul.f32 0.5, %v3378_v26  ;;  %v4129_v27 = vld [vmem:[%s4370_s2 + $0x80] ss:$16 sps:$4 sm:$0xff]   ;;  %v4172_v26 = vld [vmem:[%s4370_s2 + $0xcc] ss:$16 sps:$4 sm:$0xff]  }
 0x224   :  { %v1061_v12 = vmul.f32 %v3376_v62, %v1050_v28  ;;  %v4134_v28 = vld [vmem:[%s4370_s2 + $0x88] ss:$16 sps:$4 sm:$0xff]   ;;  %v4143_v62 = vld [vmem:[%s4370_s2 + $0xa4] ss:$16 sps:$4 sm:$0xff]  }
 0x225   :  { %v1060_v30 = vmul.f32 %v1054_v29, %v3924_v8  ;;  %v1059_v11 = vadd.f32 0.5, %v1058_v44  ;;  %v4028_v8 = vld [vmem:[%s4370_s2 + $0xc] ss:$16 sps:$4 sm:$0xff]   ;;  %v4177_v44 = vld [vmem:[%s4370_s2 + $0xc0] ss:$16 sps:$4 sm:$0xff]  }
 0x226   :  { %v4148_v29 = vld [vmem:[%s4370_s2 + $0xac] ss:$16 sps:$4 sm:$0xff]  }
 0x227   :  { %v3969_v23 = vadd.f32 %v1061_v12, %v1060_v30  ;;  %v4153_v12 = vld [vmem:[%s4370_s2 + $0xa0] ss:$16 sps:$4 sm:$0xff]   ;;  %v4158_v30 = vld [vmem:[%s4370_s2 + $0xa8] ss:$16 sps:$4 sm:$0xff]  }
 0x229   :  { %3379 = vtanh.f32 %v3969_v23 }
 0x233   :  { %v3380_v31 = vpop.eup %3379 }
 0x234   :  { %v1064_v7 = vmul.f32 %v3380_v31, %v1059_v11  ;;  %v4182_v11 = vld [vmem:[%s4370_s2 + $0xc8] ss:$16 sps:$4 sm:$0xff]   ;;  %v4191_v31 = vld [vmem:[%s4370_s2 + $0xe4] ss:$16 sps:$4 sm:$0xff]  }
 0x236   :  { %v1065_v9 = vpack.c.bf16 %v1064_v7, %v1064_v7  ;;  %v4196_v7 = vld [vmem:[%s4370_s2 + $0xec] ss:$16 sps:$4 sm:$0xff]  }
 0x238   :  { %3013 = vst [vmem:[%s4374_s6 + $0x4] sm:$0xf] %v1065_v9  ;;  %1298 = vmatmul.mubr.bf16.vlgmr.msra.gmra.mrb[24].mxu0 %v1065_v9  ;;  %1339 = vmatmul.mubr.bf16.vlgmr.msra.gmra.mrb[24].mxu1 %v1065_v9  ;;  %v4201_v9 = vld [vmem:[%s4370_s2 + $0xe0] ss:$16 sps:$4 sm:$0xff]  }
 0x239   :  { %1570 = vmatpush1.bf16.msra.mxu0 %v3601_v36  ;;  %1611 = vmatpush1.bf16.msra.mxu1 %v3606_v37 }
 0x23a   :  { %1571 = vmatprep.subr.bf16.mxu0 %v3613_v38  ;;  %1612 = vmatprep.subr.bf16.mxu1 %v3618_v39 }
 0x23b   :  { %1601 = vmatprep.mubr.bf16.mxu0 %v4400_v14  ;;  %1642 = vmatprep.mubr.bf16.mxu1 %v4400_v14 }
 0x23d   :  { %1572 = vmatpush1.bf16.msra.mxu0 %v3623_v40  ;;  %1613 = vmatpush1.bf16.msra.mxu1 %v3630_v41 }
 0x23e   :  { %1573 = vmatprep.subr.bf16.mxu0 %v3637_v42  ;;  %1614 = vmatprep.subr.bf16.mxu1 %v3642_v43  ;;  %v4401_v43 = vld [vmem:[#allocation5_spill] sm:$0xff] }
 0x241   :  { %1574 = vmatpush1.bf16.msra.mxu0 %v3652_v45  ;;  %1615 = vmatpush1.bf16.msra.mxu1 %v3657_v46 }
 0x242   :  { %1575 = vmatprep.subr.bf16.mxu0 %v3664_v47  ;;  %1616 = vmatprep.subr.bf16.mxu1 %v3671_v48 }
 0x245   :  { %1576 = vmatpush1.bf16.msra.mxu0 %v3676_v49  ;;  %1617 = vmatpush1.bf16.msra.mxu1 %v3681_v50 }
 0x246   :  { %1577 = vmatprep.subr.bf16.mxu0 %v3688_v51  ;;  %1618 = vmatprep.subr.bf16.mxu1 %v3695_v52 }
 0x249   :  { %1578 = vmatpush1.bf16.msra.mxu0 %v3705_v54  ;;  %1619 = vmatpush1.bf16.msra.mxu1 %v3710_v55 }
 0x24a   :  { %1579 = vmatprep.subr.bf16.mxu0 %v3715_v56  ;;  %1620 = vmatprep.subr.bf16.mxu1 %v3720_v57 }
 0x24d   :  { %1580 = vmatpush1.bf16.msra.mxu0 %v3729_v58  ;;  %1621 = vmatpush1.bf16.msra.mxu1 %v3734_v59 }
 0x24e   :  { %1581 = vmatprep.subr.bf16.mxu0 %v3739_v60  ;;  %1622 = vmatprep.subr.bf16.mxu1 %v3744_v61 }
 0x251   :  { %1582 = vmatpush1.bf16.msra.mxu0 %v3758_v63  ;;  %1623 = vmatpush1.bf16.msra.mxu1 %v3763_v0 }
 0x252   :  { %1583 = vmatprep.subr.bf16.mxu0 %v3768_v2  ;;  %1624 = vmatprep.subr.bf16.mxu1 %v3773_v3 }
 0x255   :  { %1584 = vmatpush1.bf16.msra.mxu0 %v3784_v4  ;;  %1625 = vmatpush1.bf16.msra.mxu1 %v3789_v5 }
 0x256   :  { %1914 = vmatprep.subr.bf16.mxu1 %v4028_v8 }
 0x30b   :  { %v1299_v36 = vpop.f32.mrb[24].mxu0  ;;  %v1340_v37 = vpop.f32.mrb[24].mxu1 }
 0x30c   :  { %v1347_v38 = vadd.f32 %v1299_v36, %v3857_v35  ;;  %v1349_v39 = vadd.f32 %v1340_v37, %v3860_v53  ;;  %v1301_v40 = vpop.f32.mrb[25].mxu0  ;;  %v1342_v41 = vpop.f32.mrb[25].mxu1  ;;  %v4206_v36 = vld [vmem:[%s4370_s2 + $0xe8] ss:$16 sps:$4 sm:$0xff]  }
 0x30d   :  { %v1348_v42 = vadd.f32 %v1301_v40, %v3862_v6  ;;  %v1350_v45 = vadd.f32 %v1342_v41, %v4401_v43  ;;  %v1303_v46 = vpop.f32.mrb[26].mxu0  ;;  %v1344_v47 = vpop.f32.mrb[26].mxu1  ;;  %v4023_v6 = vld [vmem:[%s4370_s2 + $0x4] ss:$16 sps:$4 sm:$0xff]  }
 0x30e   :  { %v1351_v48 = vmul.f32 0.5, %v1347_v38  ;;  %v1304_v49 = vpop.f32.mrb[27].mxu0  ;;  %v1345_v50 = vpop.f32.mrb[27].mxu1  ;;  %1873 = vmatprep.subr.bf16.mxu0 %v4023_v6  ;;  %v4403_v41 = vld [vmem:[#allocation7_spill] sm:$0xff]  ;;  %v4404_v46 = vld [vmem:[#allocation8_spill] sm:$0xff] }
 0x30f   :  { %v1355_v51 = vmul.f32 0.5, %v1348_v42  ;;  %v1360_v52 = vmul.f32 0.5, %v1350_v45 }
 0x310   :  { %3381 = vtanh.f32 %v1351_v48  ;;  %v4405_v48 = vld [vmem:[#allocation9_spill] sm:$0xff] }
 0x311   :  { %3383 = vtanh.f32 %v1355_v51 }
 0x312   :  { %3385 = vtanh.f32 %v1349_v39  ;;  %v4402_v39 = vld [vmem:[#allocation6_spill] sm:$0xff] }
 0x313   :  { %3387 = vtanh.f32 %v1360_v52 }
 0x31a   :  { %v3382_v54 = vpop.eup %3381 }
 0x31b   :  { %v3384_v55 = vpop.eup %3383  ;;  %v1353_v56 = vmul.f32 0.5, %v3382_v54 }
 0x31c   :  { %v1357_v57 = vmul.f32 0.5, %v3384_v55  ;;  %v3386_v59 = vpop.eup %3385 }
 0x31d   :  { %v1354_v58 = vadd.f32 0.5, %v1353_v56  ;;  %v3388_v2 = vpop.eup %3387 }
 0x31e   :  { %v1358_v60 = vadd.f32 0.5, %v1357_v57  ;;  %v1362_v3 = vmul.f32 0.5, %v3388_v2 }
 0x31f   :  { %v1365_v61 = vmul.f32 %v3386_v59, %v1354_v58 }
 0x320   :  { %v1364_v63 = vmul.f32 %v1358_v60, %v3969_v23  ;;  %v1363_v4 = vadd.f32 0.5, %v1362_v3  ;;  %v4167_v23 = vld [vmem:[%s4370_s2 + $0xc4] ss:$16 sps:$4 sm:$0xff]  }
 0x322   :  { %v4012_v0 = vadd.f32 %v1365_v61, %v1364_v63 }
 0x324   :  { %3389 = vtanh.f32 %v4012_v0 }
 0x32e   :  { %v3390_v5 = vpop.eup %3389 }
 0x32f   :  { %v1368_v35 = vmul.f32 %v3390_v5, %v1363_v4 }
 0x331   :  { %v1369_v53 = vpack.c.bf16 %v1368_v35, %v1368_v35 }
 0x333   :  { %3046 = vst [vmem:[%s4374_s6 + $0x8] sm:$0xf] %v1369_v53  ;;  %1602 = vmatmul.mubr.bf16.vlgmr.msra.gmra.mrb[28].mxu0 %v1369_v53  ;;  %1643 = vmatmul.mubr.bf16.vlgmr.msra.gmra.mrb[28].mxu1 %v1369_v53 }
 0x334   :  { %1905 = vmatprep.mubr.bf16.mxu0 %v4400_v14  ;;  %1946 = vmatprep.mubr.bf16.mxu1 %v4400_v14 }
 0x335   :  { %1874 = vmatpush1.bf16.msra.mxu0 %v4033_v13  ;;  %1915 = vmatpush1.bf16.msra.mxu1 %v4038_v24 }
 0x336   :  { %1875 = vmatprep.subr.bf16.mxu0 %v4047_v32  ;;  %1916 = vmatprep.subr.bf16.mxu1 %v4052_v16 }
 0x339   :  { %1876 = vmatpush1.bf16.msra.mxu0 %v4057_v15  ;;  %1917 = vmatpush1.bf16.msra.mxu1 %v4062_v17 }
 0x33a   :  { %1877 = vmatprep.subr.bf16.mxu0 %v4071_v18  ;;  %1918 = vmatprep.subr.bf16.mxu1 %v4076_v19 }
 0x33d   :  { %1878 = vmatpush1.bf16.msra.mxu0 %v4081_v20  ;;  %1919 = vmatpush1.bf16.msra.mxu1 %v4086_v1 }
 0x33e   :  { %1879 = vmatprep.subr.bf16.mxu0 %v4095_v21  ;;  %1920 = vmatprep.subr.bf16.mxu1 %v4100_v33 }
 0x341   :  { %1880 = vmatpush1.bf16.msra.mxu0 %v4105_v34  ;;  %1921 = vmatpush1.bf16.msra.mxu1 %v4110_v22 }
 0x342   :  { %1881 = vmatprep.subr.bf16.mxu0 %v4119_v25  ;;  %1922 = vmatprep.subr.bf16.mxu1 %v4124_v10 }
 0x345   :  { %1882 = vmatpush1.bf16.msra.mxu0 %v4129_v27  ;;  %1923 = vmatpush1.bf16.msra.mxu1 %v4134_v28 }
 0x346   :  { %1883 = vmatprep.subr.bf16.mxu0 %v4143_v62  ;;  %1924 = vmatprep.subr.bf16.mxu1 %v4148_v29 }
 0x349   :  { %1884 = vmatpush1.bf16.msra.mxu0 %v4153_v12  ;;  %1925 = vmatpush1.bf16.msra.mxu1 %v4158_v30 }
 0x34a   :  { %1885 = vmatprep.subr.bf16.mxu0 %v4167_v23  ;;  %1926 = vmatprep.subr.bf16.mxu1 %v4172_v26 }
 0x34d   :  { %1886 = vmatpush1.bf16.msra.mxu0 %v4177_v44  ;;  %1927 = vmatpush1.bf16.msra.mxu1 %v4182_v11 }
 0x34e   :  { %1887 = vmatprep.subr.bf16.mxu0 %v4191_v31  ;;  %1928 = vmatprep.subr.bf16.mxu1 %v4196_v7 }
 0x351   :  { %1888 = vmatpush1.bf16.msra.mxu0 %v4201_v9  ;;  %1929 = vmatpush1.bf16.msra.mxu1 %v4206_v36 }
 0x352   :  { %2177 = vmatprep.subr.bf16.mxu0 %v4023_v6  ;;  %2218 = vmatprep.subr.bf16.mxu1 %v4028_v8 }
 0x406   :  { %v1603_v37 = vpop.f32.mrb[28].mxu0  ;;  %v1644_v38 = vpop.f32.mrb[28].mxu1 }
 0x407   :  { %v1651_v40 = vadd.f32 %v1603_v37, %v4402_v39  ;;  %v1653_v42 = vadd.f32 %v1644_v38, %v4403_v41  ;;  %v1605_v43 = vpop.f32.mrb[29].mxu0  ;;  %v1646_v45 = vpop.f32.mrb[29].mxu1 }
 0x408   :  { %v1652_v47 = vadd.f32 %v1605_v43, %v4404_v46  ;;  %v1654_v49 = vadd.f32 %v1646_v45, %v4405_v48  ;;  %v1607_v50 = vpop.f32.mrb[30].mxu0  ;;  %v1648_v51 = vpop.f32.mrb[30].mxu1  ;;  %v4406_v43 = vld [vmem:[#allocation10_spill] sm:$0xff]  ;;  %v4407_v46 = vld [vmem:[#allocation11_spill] sm:$0xff] }
 0x409   :  { %v1655_v52 = vmul.f32 0.5, %v1651_v40  ;;  %v1608_v54 = vpop.f32.mrb[31].mxu0  ;;  %v1649_v55 = vpop.f32.mrb[31].mxu1  ;;  %v4408_v50 = vld [vmem:[#allocation12_spill] sm:$0xff] }
 0x40a   :  { %v1659_v56 = vmul.f32 0.5, %v1652_v47  ;;  %v1664_v57 = vmul.f32 0.5, %v1654_v49 }
 0x40b   :  { %3391 = vtanh.f32 %v1655_v52  ;;  %v4409_v52 = vld [vmem:[#allocation13_spill] sm:$0xff] }
 0x40c   :  { %3393 = vtanh.f32 %v1659_v56 }
 0x40d   :  { %3395 = vtanh.f32 %v1653_v42 }
 0x40e   :  { %3397 = vtanh.f32 %v1664_v57 }
 0x415   :  { %v3392_v58 = vpop.eup %3391 }
 0x416   :  { %v3394_v59 = vpop.eup %3393  ;;  %v1657_v60 = vmul.f32 0.5, %v3392_v58 }
 0x417   :  { %v1661_v61 = vmul.f32 0.5, %v3394_v59  ;;  %v3396_v2 = vpop.eup %3395 }
 0x418   :  { %v1658_v63 = vadd.f32 0.5, %v1657_v60  ;;  %v3398_v53 = vpop.eup %3397 }
 0x419   :  { %v1662_v3 = vadd.f32 0.5, %v1661_v61  ;;  %v1666_v37 = vmul.f32 0.5, %v3398_v53 }
 0x41a   :  { %v1669_v4 = vmul.f32 %v3396_v2, %v1658_v63 }
 0x41b   :  { %v1668_v5 = vmul.f32 %v1662_v3, %v4012_v0  ;;  %v1667_v38 = vadd.f32 0.5, %v1666_v37 }
 0x41d   :  { %v4219_v35 = vadd.f32 %v1669_v4, %v1668_v5 }
 0x41f   :  { %3399 = vtanh.f32 %v4219_v35 }
 0x429   :  { %v3400_v39 = vpop.eup %3399 }
 0x42a   :  { %v1672_v40 = vmul.f32 %v3400_v39, %v1667_v38 }
 0x42c   :  { %v1673_v41 = vpack.c.bf16 %v1672_v40, %v1672_v40 }
 0x42e   :  { %3079 = vst [vmem:[%s4374_s6 + $0xc] sm:$0xf] %v1673_v41  ;;  %1906 = vmatmul.mubr.bf16.vlgmr.msra.gmra.mrb[32].mxu0 %v1673_v41  ;;  %1947 = vmatmul.mubr.bf16.vlgmr.msra.gmra.mrb[32].mxu1 %v1673_v41 }
 0x42f   :  { %2178 = vmatpush1.bf16.msra.mxu0 %v4033_v13  ;;  %2219 = vmatpush1.bf16.msra.mxu1 %v4038_v24 }
 0x430   :  { %2179 = vmatprep.subr.bf16.mxu0 %v4047_v32  ;;  %2220 = vmatprep.subr.bf16.mxu1 %v4052_v16 }
 0x431   :  { %2209 = vmatprep.mubr.bf16.mxu0 %v4400_v14  ;;  %2250 = vmatprep.mubr.bf16.mxu1 %v4400_v14 }
 0x433   :  { %2180 = vmatpush1.bf16.msra.mxu0 %v4057_v15  ;;  %2221 = vmatpush1.bf16.msra.mxu1 %v4062_v17 }
 0x434   :  { %2181 = vmatprep.subr.bf16.mxu0 %v4071_v18  ;;  %2222 = vmatprep.subr.bf16.mxu1 %v4076_v19 }
 0x437   :  { %2182 = vmatpush1.bf16.msra.mxu0 %v4081_v20  ;;  %2223 = vmatpush1.bf16.msra.mxu1 %v4086_v1 }
 0x438   :  { %2183 = vmatprep.subr.bf16.mxu0 %v4095_v21  ;;  %2224 = vmatprep.subr.bf16.mxu1 %v4100_v33 }
 0x43b   :  { %2184 = vmatpush1.bf16.msra.mxu0 %v4105_v34  ;;  %2225 = vmatpush1.bf16.msra.mxu1 %v4110_v22 }
 0x43c   :  { %2185 = vmatprep.subr.bf16.mxu0 %v4119_v25  ;;  %2226 = vmatprep.subr.bf16.mxu1 %v4124_v10 }
 0x43f   :  { %2186 = vmatpush1.bf16.msra.mxu0 %v4129_v27  ;;  %2227 = vmatpush1.bf16.msra.mxu1 %v4134_v28 }
 0x440   :  { %2187 = vmatprep.subr.bf16.mxu0 %v4143_v62  ;;  %2228 = vmatprep.subr.bf16.mxu1 %v4148_v29 }
 0x443   :  { %2188 = vmatpush1.bf16.msra.mxu0 %v4153_v12  ;;  %2229 = vmatpush1.bf16.msra.mxu1 %v4158_v30 }
 0x444   :  { %2189 = vmatprep.subr.bf16.mxu0 %v4167_v23  ;;  %2230 = vmatprep.subr.bf16.mxu1 %v4172_v26 }
 0x447   :  { %2190 = vmatpush1.bf16.msra.mxu0 %v4177_v44  ;;  %2231 = vmatpush1.bf16.msra.mxu1 %v4182_v11 }
 0x448   :  { %2191 = vmatprep.subr.bf16.mxu0 %v4191_v31  ;;  %2232 = vmatprep.subr.bf16.mxu1 %v4196_v7 }
 0x44b   :  { %2192 = vmatpush1.bf16.msra.mxu0 %v4201_v9  ;;  %2233 = vmatpush1.bf16.msra.mxu1 %v4206_v36 }
 0x44c   :  { %2481 = vmatprep.subr.bf16.mxu0 %v4023_v6  ;;  %2522 = vmatprep.subr.bf16.mxu1 %v4028_v8 }
 0x501   :  { %v1907_v0 = vpop.f32.mrb[32].mxu0  ;;  %v1948_v42 = vpop.f32.mrb[32].mxu1 }
 0x502   :  { %v1955_v45 = vadd.f32 %v1907_v0, %v4406_v43  ;;  %v1957_v47 = vadd.f32 %v1948_v42, %v4407_v46  ;;  %v1909_v48 = vpop.f32.mrb[33].mxu0  ;;  %v1950_v49 = vpop.f32.mrb[33].mxu1 }
 0x503   :  { %v1956_v51 = vadd.f32 %v1909_v48, %v4408_v50  ;;  %v1958_v54 = vadd.f32 %v1950_v49, %v4409_v52  ;;  %v1911_v55 = vpop.f32.mrb[34].mxu0  ;;  %v1952_v56 = vpop.f32.mrb[34].mxu1  ;;  %v4410_v48 = vld [vmem:[#allocation14_spill] sm:$0xff]  ;;  %v4411_v50 = vld [vmem:[#allocation15_spill] sm:$0xff] }
 0x504   :  { %v1959_v57 = vmul.f32 0.5, %v1955_v45  ;;  %v1912_v58 = vpop.f32.mrb[35].mxu0  ;;  %v1953_v59 = vpop.f32.mrb[35].mxu1  ;;  %v4412_v55 = vld [vmem:[#allocation16_spill] sm:$0xff] }
 0x505   :  { %v1963_v60 = vmul.f32 0.5, %v1956_v51  ;;  %v1968_v61 = vmul.f32 0.5, %v1958_v54 }
 0x506   :  { %3401 = vtanh.f32 %v1959_v57  ;;  %v4413_v57 = vld [vmem:[#allocation17_spill] sm:$0xff] }
 0x507   :  { %3403 = vtanh.f32 %v1963_v60 }
 0x508   :  { %3405 = vtanh.f32 %v1957_v47 }
 0x509   :  { %3407 = vtanh.f32 %v1968_v61 }
 0x510   :  { %v3402_v63 = vpop.eup %3401 }
 0x511   :  { %v3404_v2 = vpop.eup %3403  ;;  %v1961_v3 = vmul.f32 0.5, %v3402_v63 }
 0x512   :  { %v1965_v4 = vmul.f32 0.5, %v3404_v2  ;;  %v3406_v53 = vpop.eup %3405 }
 0x513   :  { %v1962_v5 = vadd.f32 0.5, %v1961_v3  ;;  %v3408_v41 = vpop.eup %3407 }
 0x514   :  { %v1966_v37 = vadd.f32 0.5, %v1965_v4  ;;  %v1970_v0 = vmul.f32 0.5, %v3408_v41 }
 0x515   :  { %v1973_v38 = vmul.f32 %v3406_v53, %v1962_v5 }
 0x516   :  { %v1972_v39 = vmul.f32 %v1966_v37, %v4219_v35  ;;  %v1971_v42 = vadd.f32 0.5, %v1970_v0 }
 0x518   :  { %v4264_v40 = vadd.f32 %v1973_v38, %v1972_v39 }
 0x51a   :  { %3409 = vtanh.f32 %v4264_v40 }
 0x524   :  { %v3410_v43 = vpop.eup %3409 }
 0x525   :  { %v1976_v45 = vmul.f32 %v3410_v43, %v1971_v42 }
 0x527   :  { %v1977_v46 = vpack.c.bf16 %v1976_v45, %v1976_v45 }
 0x529   :  { %3112 = vst [vmem:[%s4374_s6 + $0x10] sm:$0xf] %v1977_v46  ;;  %2210 = vmatmul.mubr.bf16.vlgmr.msra.gmra.mrb[36].mxu0 %v1977_v46  ;;  %2251 = vmatmul.mubr.bf16.vlgmr.msra.gmra.mrb[36].mxu1 %v1977_v46 }
 0x52a   :  { %2482 = vmatpush1.bf16.msra.mxu0 %v4033_v13  ;;  %2523 = vmatpush1.bf16.msra.mxu1 %v4038_v24 }
 0x52b   :  { %2483 = vmatprep.subr.bf16.mxu0 %v4047_v32  ;;  %2524 = vmatprep.subr.bf16.mxu1 %v4052_v16 }
 0x52c   :  { %2513 = vmatprep.mubr.bf16.mxu0 %v4400_v14  ;;  %2554 = vmatprep.mubr.bf16.mxu1 %v4400_v14 }
 0x52e   :  { %2484 = vmatpush1.bf16.msra.mxu0 %v4057_v15  ;;  %2525 = vmatpush1.bf16.msra.mxu1 %v4062_v17 }
 0x52f   :  { %2485 = vmatprep.subr.bf16.mxu0 %v4071_v18  ;;  %2526 = vmatprep.subr.bf16.mxu1 %v4076_v19 }
 0x532   :  { %2486 = vmatpush1.bf16.msra.mxu0 %v4081_v20  ;;  %2527 = vmatpush1.bf16.msra.mxu1 %v4086_v1 }
 0x533   :  { %2487 = vmatprep.subr.bf16.mxu0 %v4095_v21  ;;  %2528 = vmatprep.subr.bf16.mxu1 %v4100_v33 }
 0x536   :  { %2488 = vmatpush1.bf16.msra.mxu0 %v4105_v34  ;;  %2529 = vmatpush1.bf16.msra.mxu1 %v4110_v22 }
 0x537   :  { %2489 = vmatprep.subr.bf16.mxu0 %v4119_v25  ;;  %2530 = vmatprep.subr.bf16.mxu1 %v4124_v10 }
 0x53a   :  { %2490 = vmatpush1.bf16.msra.mxu0 %v4129_v27  ;;  %2531 = vmatpush1.bf16.msra.mxu1 %v4134_v28 }
 0x53b   :  { %2491 = vmatprep.subr.bf16.mxu0 %v4143_v62  ;;  %2532 = vmatprep.subr.bf16.mxu1 %v4148_v29 }
 0x53e   :  { %2492 = vmatpush1.bf16.msra.mxu0 %v4153_v12  ;;  %2533 = vmatpush1.bf16.msra.mxu1 %v4158_v30 }
 0x53f   :  { %2493 = vmatprep.subr.bf16.mxu0 %v4167_v23  ;;  %2534 = vmatprep.subr.bf16.mxu1 %v4172_v26 }
 0x542   :  { %2494 = vmatpush1.bf16.msra.mxu0 %v4177_v44  ;;  %2535 = vmatpush1.bf16.msra.mxu1 %v4182_v11 }
 0x543   :  { %2495 = vmatprep.subr.bf16.mxu0 %v4191_v31  ;;  %2536 = vmatprep.subr.bf16.mxu1 %v4196_v7 }
 0x546   :  { %2496 = vmatpush1.bf16.msra.mxu0 %v4201_v9  ;;  %2537 = vmatpush1.bf16.msra.mxu1 %v4206_v36 }
 0x547   :  { %2785 = vmatprep.subr.bf16.mxu0 %v4023_v6  ;;  %2826 = vmatprep.subr.bf16.mxu1 %v4028_v8 }
 0x5fc   :  { %v2211_v35 = vpop.f32.mrb[36].mxu0  ;;  %v2252_v47 = vpop.f32.mrb[36].mxu1 }
 0x5fd   :  { %v2259_v49 = vadd.f32 %v2211_v35, %v4410_v48  ;;  %v2261_v51 = vadd.f32 %v2252_v47, %v4411_v50  ;;  %v2213_v52 = vpop.f32.mrb[37].mxu0  ;;  %v2254_v54 = vpop.f32.mrb[37].mxu1 }
 0x5fe   :  { %v2260_v56 = vadd.f32 %v2213_v52, %v4412_v55  ;;  %v2262_v58 = vadd.f32 %v2254_v54, %v4413_v57  ;;  %v2215_v59 = vpop.f32.mrb[38].mxu0  ;;  %v2256_v60 = vpop.f32.mrb[38].mxu1  ;;  %v4418_v55 = vld [vmem:[#allocation22_spill] sm:$0xff]  ;;  %v4419_v57 = vld [vmem:[#allocation23_spill] sm:$0xff] }
 0x5ff   :  { %v2263_v61 = vmul.f32 0.5, %v2259_v49  ;;  %v2216_v63 = vpop.f32.mrb[39].mxu0  ;;  %v2257_v2 = vpop.f32.mrb[39].mxu1 }
 0x600   :  { %v2267_v6 = vmul.f32 0.5, %v2260_v56  ;;  %v2272_v8 = vmul.f32 0.5, %v2262_v58  ;;  %v4421_v2 = vld [vmem:[#allocation25_spill] sm:$0xff] }
 0x601   :  { %3411 = vtanh.f32 %v2263_v61  ;;  %v4420_v61 = vld [vmem:[#allocation24_spill] sm:$0xff] }
 0x602   :  { %3413 = vtanh.f32 %v2267_v6 }
 0x603   :  { %3415 = vtanh.f32 %v2261_v51 }
 0x604   :  { %3417 = vtanh.f32 %v2272_v8 }
 0x60b   :  { %v3412_v3 = vpop.eup %3411 }
 0x60c   :  { %v3414_v4 = vpop.eup %3413  ;;  %v2265_v5 = vmul.f32 0.5, %v3412_v3 }
 0x60d   :  { %v2269_v53 = vmul.f32 0.5, %v3414_v4  ;;  %v3416_v38 = vpop.eup %3415 }
 0x60e   :  { %v2266_v37 = vadd.f32 0.5, %v2265_v5  ;;  %v3418_v43 = vpop.eup %3417 }
 0x60f   :  { %v2270_v39 = vadd.f32 0.5, %v2269_v53  ;;  %v2274_v45 = vmul.f32 0.5, %v3418_v43 }
 0x610   :  { %v2277_v41 = vmul.f32 %v3416_v38, %v2266_v37 }
 0x611   :  { %v2276_v0 = vmul.f32 %v2270_v39, %v4264_v40  ;;  %v2275_v46 = vadd.f32 0.5, %v2274_v45 }
 0x613   :  { %v4309_v42 = vadd.f32 %v2277_v41, %v2276_v0 }
 0x615   :  { %3419 = vtanh.f32 %v4309_v42 }
 0x61f   :  { %v3420_v35 = vpop.eup %3419 }
 0x620   :  { %v2280_v47 = vmul.f32 %v3420_v35, %v2275_v46 }
 0x622   :  { %v2281_v48 = vpack.c.bf16 %v2280_v47, %v2280_v47 }
 0x624   :  { %3145 = vst [vmem:[%s4374_s6 + $0x14] sm:$0xf] %v2281_v48  ;;  %2514 = vmatmul.mubr.bf16.vlgmr.msra.gmra.mrb[40].mxu0 %v2281_v48  ;;  %2555 = vmatmul.mubr.bf16.vlgmr.msra.gmra.mrb[40].mxu1 %v2281_v48 }
 0x625   :  { %2786 = vmatpush1.bf16.msra.mxu0 %v4033_v13  ;;  %2827 = vmatpush1.bf16.msra.mxu1 %v4038_v24  ;;  %v4414_v24 = vld [vmem:[#allocation18_spill] sm:$0xff] }
 0x626   :  { %2787 = vmatprep.subr.bf16.mxu0 %v4047_v32  ;;  %2828 = vmatprep.subr.bf16.mxu1 %v4052_v16  ;;  %v4415_v16 = vld [vmem:[#allocation19_spill] sm:$0xff] }
 0x627   :  { %2817 = vmatprep.mubr.bf16.mxu0 %v4400_v14  ;;  %2858 = vmatprep.mubr.bf16.mxu1 %v4400_v14 }
 0x629   :  { %2788 = vmatpush1.bf16.msra.mxu0 %v4057_v15  ;;  %2829 = vmatpush1.bf16.msra.mxu1 %v4062_v17 }
 0x62a   :  { %2789 = vmatprep.subr.bf16.mxu0 %v4071_v18  ;;  %2830 = vmatprep.subr.bf16.mxu1 %v4076_v19  ;;  %v4416_v19 = vld [vmem:[#allocation20_spill] sm:$0xff] }
 0x62d   :  { %2790 = vmatpush1.bf16.msra.mxu0 %v4081_v20  ;;  %2831 = vmatpush1.bf16.msra.mxu1 %v4086_v1  ;;  %v4417_v1 = vld [vmem:[#allocation21_spill] sm:$0xff] }
 0x62e   :  { %2791 = vmatprep.subr.bf16.mxu0 %v4095_v21  ;;  %2832 = vmatprep.subr.bf16.mxu1 %v4100_v33 }
 0x631   :  { %2792 = vmatpush1.bf16.msra.mxu0 %v4105_v34  ;;  %2833 = vmatpush1.bf16.msra.mxu1 %v4110_v22 }
 0x632   :  { %2793 = vmatprep.subr.bf16.mxu0 %v4119_v25  ;;  %2834 = vmatprep.subr.bf16.mxu1 %v4124_v10 }
 0x635   :  { %2794 = vmatpush1.bf16.msra.mxu0 %v4129_v27  ;;  %2835 = vmatpush1.bf16.msra.mxu1 %v4134_v28 }
 0x636   :  { %2795 = vmatprep.subr.bf16.mxu0 %v4143_v62  ;;  %2836 = vmatprep.subr.bf16.mxu1 %v4148_v29 }
 0x639   :  { %2796 = vmatpush1.bf16.msra.mxu0 %v4153_v12  ;;  %2837 = vmatpush1.bf16.msra.mxu1 %v4158_v30 }
 0x63a   :  { %2797 = vmatprep.subr.bf16.mxu0 %v4167_v23  ;;  %2838 = vmatprep.subr.bf16.mxu1 %v4172_v26 }
 0x63d   :  { %2798 = vmatpush1.bf16.msra.mxu0 %v4177_v44  ;;  %2839 = vmatpush1.bf16.msra.mxu1 %v4182_v11 }
 0x63e   :  { %2799 = vmatprep.subr.bf16.mxu0 %v4191_v31  ;;  %2840 = vmatprep.subr.bf16.mxu1 %v4196_v7 }
 0x641   :  { %2800 = vmatpush1.bf16.msra.mxu0 %v4201_v9  ;;  %2841 = vmatpush1.bf16.msra.mxu1 %v4206_v36 }
 0x6f7   :  { %v2515_v14 = vpop.f32.mrb[40].mxu0  ;;  %v2556_v13 = vpop.f32.mrb[40].mxu1 }
 0x6f8   :  { %v2563_v32 = vadd.f32 %v2515_v14, %v4414_v24  ;;  %v2565_v15 = vadd.f32 %v2556_v13, %v4415_v16  ;;  %v2517_v17 = vpop.f32.mrb[41].mxu0  ;;  %v2558_v18 = vpop.f32.mrb[41].mxu1 }
 0x6f9   :  { %v2564_v20 = vadd.f32 %v2517_v17, %v4416_v19  ;;  %v2566_v21 = vadd.f32 %v2558_v18, %v4417_v1  ;;  %v2519_v33 = vpop.f32.mrb[42].mxu0  ;;  %v2560_v34 = vpop.f32.mrb[42].mxu1 }
 0x6fa   :  { %v2567_v22 = vmul.f32 0.5, %v2563_v32  ;;  %v2520_v25 = vpop.f32.mrb[43].mxu0  ;;  %v2561_v10 = vpop.f32.mrb[43].mxu1 }
 0x6fb   :  { %v2571_v27 = vmul.f32 0.5, %v2564_v20  ;;  %v2576_v28 = vmul.f32 0.5, %v2566_v21 }
 0x6fc   :  { %3421 = vtanh.f32 %v2567_v22 }
 0x6fd   :  { %3423 = vtanh.f32 %v2571_v27 }
 0x6fe   :  { %3425 = vtanh.f32 %v2565_v15 }
 0x6ff   :  { %3427 = vtanh.f32 %v2576_v28 }
 0x706   :  { %v3422_v62 = vpop.eup %3421 }
 0x707   :  { %v3424_v29 = vpop.eup %3423  ;;  %v2569_v12 = vmul.f32 0.5, %v3422_v62 }
 0x708   :  { %v2573_v30 = vmul.f32 0.5, %v3424_v29  ;;  %v3426_v26 = vpop.eup %3425 }
 0x709   :  { %v2570_v23 = vadd.f32 0.5, %v2569_v12  ;;  %v3428_v9 = vpop.eup %3427 }
 0x70a   :  { %v2574_v44 = vadd.f32 0.5, %v2573_v30  ;;  %v2578_v36 = vmul.f32 0.5, %v3428_v9 }
 0x70b   :  { %v2581_v11 = vmul.f32 %v3426_v26, %v2570_v23 }
 0x70c   :  { %v2580_v31 = vmul.f32 %v2574_v44, %v4309_v42  ;;  %v2579_v40 = vadd.f32 0.5, %v2578_v36 }
 0x70e   :  { %v2582_v7 = vadd.f32 %v2581_v11, %v2580_v31 }
 0x710   :  { %3429 = vtanh.f32 %v2582_v7 }
 0x71a   :  { %v3430_v49 = vpop.eup %3429 }
 0x71b   :  { %v2584_v50 = vmul.f32 %v3430_v49, %v2579_v40 }
 0x71d   :  { %v2585_v51 = vpack.c.bf16 %v2584_v50, %v2584_v50 }
 0x71f   :  { %3178 = vst [vmem:[%s4374_s6 + $0x18] sm:$0xf] %v2585_v51  ;;  %2818 = vmatmul.mubr.bf16.vlgmr.msra.gmra.mrb[44].mxu0 %v2585_v51  ;;  %2859 = vmatmul.mubr.bf16.vlgmr.msra.gmra.mrb[44].mxu1 %v2585_v51 }
 0x7f2   :  { %v2819_v52 = vpop.f32.mrb[44].mxu0  ;;  %v2860_v54 = vpop.f32.mrb[44].mxu1 }
 0x7f3   :  { %v2867_v56 = vadd.f32 %v2819_v52, %v4418_v55  ;;  %v2869_v58 = vadd.f32 %v2860_v54, %v4419_v57  ;;  %v2821_v59 = vpop.f32.mrb[45].mxu0  ;;  %v2862_v60 = vpop.f32.mrb[45].mxu1 }
 0x7f4   :  { %v2868_v63 = vadd.f32 %v2821_v59, %v4420_v61  ;;  %v2870_v6 = vadd.f32 %v2862_v60, %v4421_v2  ;;  %v2823_v8 = vpop.f32.mrb[46].mxu0  ;;  %v2864_v3 = vpop.f32.mrb[46].mxu1 }
 0x7f5   :  { %v2871_v4 = vmul.f32 0.5, %v2867_v56  ;;  %v2824_v5 = vpop.f32.mrb[47].mxu0  ;;  %v2865_v53 = vpop.f32.mrb[47].mxu1 }
 0x7f6   :  { %v2875_v37 = vmul.f32 0.5, %v2868_v63  ;;  %v2880_v38 = vmul.f32 0.5, %v2870_v6 }
 0x7f7   :  { %3431 = vtanh.f32 %v2871_v4 }
 0x7f8   :  { %3433 = vtanh.f32 %v2875_v37 }
 0x7f9   :  { %3435 = vtanh.f32 %v2869_v58 }
 0x7fa   :  { %3437 = vtanh.f32 %v2880_v38 }
 0x801   :  { %v3432_v39 = vpop.eup %3431 }
 0x802   :  { %v3434_v41 = vpop.eup %3433  ;;  %v2873_v0 = vmul.f32 0.5, %v3432_v39 }
 0x803   :  { %v2877_v42 = vmul.f32 0.5, %v3434_v41  ;;  %v3436_v45 = vpop.eup %3435 }
 0x804   :  { %v2874_v43 = vadd.f32 0.5, %v2873_v0  ;;  %v3438_v14 = vpop.eup %3437 }
 0x805   :  { %v2878_v46 = vadd.f32 0.5, %v2877_v42  ;;  %v2882_v13 = vmul.f32 0.5, %v3438_v14 }
 0x806   :  { %v2885_v35 = vmul.f32 %v3436_v45, %v2874_v43 }
 0x807   :  { %v2884_v47 = vmul.f32 %v2878_v46, %v2582_v7  ;;  %v2883_v24 = vadd.f32 0.5, %v2882_v13 }
 0x809   :  { %v2886_v48 = vadd.f32 %v2885_v35, %v2884_v47 }
 0x80b   :  { %3439 = vtanh.f32 %v2886_v48  ;;  %2900 = vst [vmem:[%s4375_s8] sm:$0xff] %v2886_v48 }
 0x815   :  { %v3440_v32 = vpop.eup %3439 }
 0x816   :  { %v2888_v16 = vmul.f32 %v3440_v32, %v2883_v24 }
 0x818   :  { %v2889_v15 = vpack.c.bf16 %v2888_v16, %v2888_v16  ;;  %2898 = vst [vmem:[%s4376_s7] sm:$0xff] %v2888_v16 }
 0x81a   :  { %3211 = vst [vmem:[%s4374_s6 + $0x1c] sm:$0xf] %v2889_v15 }

// kernel: rnnlm_forward.3
= control target key start
LH: loop header
LB: loop body
LE: loop exit
PB: predicated region body
PF: predicated region fallthrough
CT: control target
= control target key end

     0   :  { %14 = vsyncpa [#allocation6], 0  ;;  %s3479_s27 = smov [#allocation5]   ;;  %s4416_s0 = inlined_call_operand.vmem [shape: bf16[8,8,128], index: 0, kind: input, shape index: {}]   ;;  %s4417_s1 = inlined_call_operand.vmem [shape: bf16[128,512], index: 1, kind: input, shape index: {}]   ;;  %s4418_s2 = inlined_call_operand.vmem [shape: bf16[128,512], index: 2, kind: input, shape index: {}]   ;;  %s4419_s3 = inlined_call_operand.hbm [shape: f32[1,512], index: 3, kind: input, shape index: {}]   ;;  %s4420_s4 = inlined_call_operand.vmem [shape: f32[8,128], index: 4, kind: input, shape index: {}]   ;;  %s4421_s5 = inlined_call_operand.vmem [shape: f32[8,128], index: 5, kind: input, shape index: {}]   ;;  %s4422_s6 = inlined_call_operand.vmem [shape: bf16[8,8,128], index: 6, kind: output, shape index: {0}]   ;;  %s4423_s7 = inlined_call_operand.vmem [shape: f32[8,128], index: 7, kind: output, shape index: {1}]   ;;  %s4424_s8 = inlined_call_operand.vmem [shape: f32[8,128], index: 8, kind: output, shape index: {2}]  }
   0x1   :  { %s27_s28 = sshll.u32 %s3479_s27, 4  ;;  %s3455_s9 = scalar_lea.hbm %s4419_s3, 64  ;;  %s28_s28 = int_to_ptr.vmem [resolvable:$true] %s27_s28 }
   0x2   :  { %p3456_p0 = scmp.ne.s32.totalorder %s4419_s3, %s3455_s9  ;;  %p3459_p1 = scmp.lt.u32.totalorder %s3455_s9, %s4419_s3 }
   0x4   :  { %p3461_p2 = pnand %p3459_p1, %p3456_p0 }
   0x6   :  { %3464 = shalt.err (!%p3461_p2)
}
   0x7   :  { %s3465_s14 = scalar_lea.vmem %s28_s28, 64  ;;  %p3470_p4 = scmp.lt.s32.totalorder %s28_s28, %s28_s28 }
   0x8   :  { %p3466_p3 = scmp.ne.s32.totalorder %s28_s28, %s3465_s14  ;;  %p3471_p5 = scmp.lt.s32.totalorder %s3465_s14, %s3465_s14 }
   0xa   :  { %p3472_p6 = por %p3471_p5, %p3470_p4 }
   0xc   :  { %p3473_p7 = pnand %p3472_p6, %p3466_p3 }
   0xe   :  { %3476 = shalt.err (!%p3473_p7)
}
   0xf   :  { %30 = dma.hbm_to_vmem [thread:$0]  %s4419_s3, 64, %s28_s28, [#allocation6]  }
  0x10   :  { %3477 = dma.done.wait [#allocation6], 64  }
  0x11   :  { %3478 = vsyncadd [#allocation6], 4294967232  ;;  %v4425_v0 = vmov 0   ;;  %v3227_v1 = vld [vmem:[%s4417_s1 + $0x4] ss:$16 sps:$4 sm:$0xff]   ;;  %v3288_v44 = vld [vmem:[%s4416_s0 + $0x8] sm:$0xff]  }
  0x12   :  { %325 = vmatprep.mubr.bf16.mxu0 %v4425_v0  ;;  %398 = vmatprep.mubr.bf16.mxu1 %v4425_v0  ;;  %v3229_v2 = vld [vmem:[%s4417_s1 + $0xc] ss:$16 sps:$4 sm:$0xff]   ;;  %v3231_v3 = vld [vmem:[%s4417_s1] ss:$16 sps:$4 sm:$0xff]   ;;  %v3232_v4 = vld [vmem:[%s4417_s1 + $0x8] ss:$16 sps:$4 sm:$0xff]  }
  0x13   :  { %293 = vmatprep.subr.bf16.mxu0 %v3227_v1  ;;  %366 = vmatprep.subr.bf16.mxu1 %v3229_v2  ;;  %v3233_v5 = vld [vmem:[%s4417_s1 + $0x24] ss:$16 sps:$4 sm:$0xff]   ;;  %v3235_v6 = vld [vmem:[%s4417_s1 + $0x2c] ss:$16 sps:$4 sm:$0xff]   ;;  %v3237_v7 = vld [vmem:[%s4417_s1 + $0x20] ss:$16 sps:$4 sm:$0xff]  }
  0x14   :  { %294 = vmatpush1.bf16.msra.mxu0 %v3231_v3  ;;  %367 = vmatpush1.bf16.msra.mxu1 %v3232_v4  ;;  %v3238_v8 = vld [vmem:[%s4417_s1 + $0x28] ss:$16 sps:$4 sm:$0xff]   ;;  %v3239_v9 = vld [vmem:[%s4417_s1 + $0x44] ss:$16 sps:$4 sm:$0xff]   ;;  %v3241_v10 = vld [vmem:[%s4417_s1 + $0x4c] ss:$16 sps:$4 sm:$0xff]  }
  0x15   :  { %295 = vmatprep.subr.bf16.mxu0 %v3233_v5  ;;  %368 = vmatprep.subr.bf16.mxu1 %v3235_v6  ;;  %v3243_v11 = vld [vmem:[%s4417_s1 + $0x40] ss:$16 sps:$4 sm:$0xff]   ;;  %v3244_v12 = vld [vmem:[%s4417_s1 + $0x48] ss:$16 sps:$4 sm:$0xff]   ;;  %v3245_v13 = vld [vmem:[%s4417_s1 + $0x64] ss:$16 sps:$4 sm:$0xff]  }
  0x16   :  { %v3247_v14 = vld [vmem:[%s4417_s1 + $0x6c] ss:$16 sps:$4 sm:$0xff]   ;;  %v3249_v15 = vld [vmem:[%s4417_s1 + $0x60] ss:$16 sps:$4 sm:$0xff]   ;;  %v3250_v16 = vld [vmem:[%s4417_s1 + $0x68] ss:$16 sps:$4 sm:$0xff]  }
  0x17   :  { %v3251_v17 = vld [vmem:[%s4417_s1 + $0x84] ss:$16 sps:$4 sm:$0xff]   ;;  %v3253_v18 = vld [vmem:[%s4417_s1 + $0x8c] ss:$16 sps:$4 sm:$0xff]   ;;  %v3255_v19 = vld [vmem:[%s4417_s1 + $0x80] ss:$16 sps:$4 sm:$0xff]  }
  0x18   :  { %296 = vmatpush1.bf16.msra.mxu0 %v3237_v7  ;;  %369 = vmatpush1.bf16.msra.mxu1 %v3238_v8  ;;  %v3256_v20 = vld [vmem:[%s4417_s1 + $0x88] ss:$16 sps:$4 sm:$0xff]   ;;  %v3257_v21 = vld [vmem:[%s4417_s1 + $0xa4] ss:$16 sps:$4 sm:$0xff]   ;;  %v3259_v22 = vld [vmem:[%s4417_s1 + $0xac] ss:$16 sps:$4 sm:$0xff]   ;;  %v89_v8 = vlaneseq }
  0x19   :  { %297 = vmatprep.subr.bf16.mxu0 %v3239_v9  ;;  %370 = vmatprep.subr.bf16.mxu1 %v3241_v10  ;;  %v3261_v23 = vld [vmem:[%s4417_s1 + $0xa0] ss:$16 sps:$4 sm:$0xff]   ;;  %v3262_v24 = vld [vmem:[%s4417_s1 + $0xa8] ss:$16 sps:$4 sm:$0xff]   ;;  %v3263_v25 = vld [vmem:[%s4417_s1 + $0xc4] ss:$16 sps:$4 sm:$0xff]  }
  0x1a   :  { %v3265_v26 = vld [vmem:[%s4417_s1 + $0xcc] ss:$16 sps:$4 sm:$0xff]   ;;  %v3267_v27 = vld [vmem:[%s4417_s1 + $0xc0] ss:$16 sps:$4 sm:$0xff]   ;;  %v3268_v28 = vld [vmem:[%s4417_s1 + $0xc8] ss:$16 sps:$4 sm:$0xff]  }
  0x1b   :  { %v3269_v29 = vld [vmem:[%s4417_s1 + $0xe4] ss:$16 sps:$4 sm:$0xff]   ;;  %v3271_v30 = vld [vmem:[%s4417_s1 + $0xec] ss:$16 sps:$4 sm:$0xff]   ;;  %v3273_v31 = vld [vmem:[%s4417_s1 + $0xe0] ss:$16 sps:$4 sm:$0xff]  }
  0x1c   :  { %298 = vmatpush1.bf16.msra.mxu0 %v3243_v11  ;;  %371 = vmatpush1.bf16.msra.mxu1 %v3244_v12  ;;  %v3274_v32 = vld [vmem:[%s4417_s1 + $0xe8] ss:$16 sps:$4 sm:$0xff]   ;;  %v3639_v33 = vld [vmem:[%s4418_s2 + $0x4] ss:$16 sps:$4 sm:$0xff]   ;;  %v3644_v34 = vld [vmem:[%s4418_s2 + $0xc] ss:$16 sps:$4 sm:$0xff]  }
  0x1d   :  { %299 = vmatprep.subr.bf16.mxu0 %v3245_v13  ;;  %372 = vmatprep.subr.bf16.mxu1 %v3247_v14  ;;  %v3275_v35 = vld [vmem:[%s4416_s0] sm:$0xff]   ;;  %v3657_v37 = vld [vmem:[%s4418_s2 + $0x8] ss:$16 sps:$4 sm:$0xff]   ;;  %v3669_v39 = vld [vmem:[%s4418_s2 + $0x2c] ss:$16 sps:$4 sm:$0xff]   ;;  %v90_v9 = vshrl.u32 %v89_v8, 7 }
  0x1e   :  { %v3652_v36 = vld [vmem:[%s4418_s2] ss:$16 sps:$4 sm:$0xff]   ;;  %v3664_v38 = vld [vmem:[%s4418_s2 + $0x24] ss:$16 sps:$4 sm:$0xff]   ;;  %v3681_v41 = vld [vmem:[%s4418_s2 + $0x28] ss:$16 sps:$4 sm:$0xff]  }
  0x1f   :  { %v3674_v40 = vld [vmem:[%s4418_s2 + $0x20] ss:$16 sps:$4 sm:$0xff]   ;;  %v3688_v42 = vld [vmem:[%s4418_s2 + $0x44] ss:$16 sps:$4 sm:$0xff]   ;;  %v3693_v43 = vld [vmem:[%s4418_s2 + $0x4c] ss:$16 sps:$4 sm:$0xff]  }
  0x20   :  { %300 = vmatpush1.bf16.msra.mxu0 %v3249_v15  ;;  %373 = vmatpush1.bf16.msra.mxu1 %v3250_v16  ;;  %v3703_v45 = vld [vmem:[%s4418_s2 + $0x40] ss:$16 sps:$4 sm:$0xff]   ;;  %v3708_v46 = vld [vmem:[%s4418_s2 + $0x48] ss:$16 sps:$4 sm:$0xff]   ;;  %v3715_v47 = vld [vmem:[%s4418_s2 + $0x64] ss:$16 sps:$4 sm:$0xff]  }
  0x21   :  { %301 = vmatprep.subr.bf16.mxu0 %v3251_v17  ;;  %374 = vmatprep.subr.bf16.mxu1 %v3253_v18  ;;  %v3722_v48 = vld [vmem:[%s4418_s2 + $0x6c] ss:$16 sps:$4 sm:$0xff]   ;;  %v3727_v49 = vld [vmem:[%s4418_s2 + $0x60] ss:$16 sps:$4 sm:$0xff]   ;;  %v3732_v50 = vld [vmem:[%s4418_s2 + $0x68] ss:$16 sps:$4 sm:$0xff]  }
  0x22   :  { %v3739_v51 = vld [vmem:[%s4418_s2 + $0x84] ss:$16 sps:$4 sm:$0xff]   ;;  %v3746_v52 = vld [vmem:[%s4418_s2 + $0x8c] ss:$16 sps:$4 sm:$0xff]   ;;  %v3756_v54 = vld [vmem:[%s4418_s2 + $0x80] ss:$16 sps:$4 sm:$0xff]  }
  0x23   :  { %v3301_v53 = vld [vmem:[%s4416_s0 + $0x10] sm:$0xff]   ;;  %v3761_v55 = vld [vmem:[%s4418_s2 + $0x88] ss:$16 sps:$4 sm:$0xff]   ;;  %v3771_v57 = vld [vmem:[%s4418_s2 + $0xac] ss:$16 sps:$4 sm:$0xff]   ;;  %v99_v10 = vsub.s32 2, %v90_v9 }
  0x24   :  { %302 = vmatpush1.bf16.msra.mxu0 %v3255_v19  ;;  %375 = vmatpush1.bf16.msra.mxu1 %v3256_v20  ;;  %v3766_v56 = vld [vmem:[%s4418_s2 + $0xa4] ss:$16 sps:$4 sm:$0xff]   ;;  %v3780_v58 = vld [vmem:[%s4418_s2 + $0xa0] ss:$16 sps:$4 sm:$0xff]   ;;  %v3785_v59 = vld [vmem:[%s4418_s2 + $0xa8] ss:$16 sps:$4 sm:$0xff]  }
  0x25   :  { %303 = vmatprep.subr.bf16.mxu0 %v3257_v21  ;;  %376 = vmatprep.subr.bf16.mxu1 %v3259_v22  ;;  %v3790_v60 = vld [vmem:[%s4418_s2 + $0xc4] ss:$16 sps:$4 sm:$0xff]   ;;  %v3795_v61 = vld [vmem:[%s4418_s2 + $0xcc] ss:$16 sps:$4 sm:$0xff]   ;;  %v3809_v63 = vld [vmem:[%s4418_s2 + $0xc0] ss:$16 sps:$4 sm:$0xff]  }
  0x26   :  { %v3314_v62 = vld [vmem:[%s4416_s0 + $0x18] sm:$0xff]   ;;  %v3819_v2 = vld [vmem:[%s4418_s2 + $0xe4] ss:$16 sps:$4 sm:$0xff]   ;;  %v3835_v4 = vld [vmem:[%s4418_s2 + $0xe0] ss:$16 sps:$4 sm:$0xff]   ;;  %v103_v11 = vsub.s32 3, %v90_v9 }
  0x27   :  { %v3814_v1 = vld [vmem:[%s4418_s2 + $0xc8] ss:$16 sps:$4 sm:$0xff]   ;;  %v3824_v3 = vld [vmem:[%s4418_s2 + $0xec] ss:$16 sps:$4 sm:$0xff]   ;;  %v43_v6 = vld [vmem:[%s4420_s4] sm:$0xff]  ;;  %v91_v12 = vsub.s32 0, %v90_v9 }
  0x28   :  { %304 = vmatpush1.bf16.msra.mxu0 %v3261_v23  ;;  %377 = vmatpush1.bf16.msra.mxu1 %v3262_v24  ;;  %v3840_v5 = vld [vmem:[%s4418_s2 + $0xe8] ss:$16 sps:$4 sm:$0xff]   ;;  %v477_v7 = vpack.c.bf16 %v43_v6, %v43_v6  ;;  %v87_v13 = vld [vmem:[#allocation5] sm:$0xf]  ;;  %v95_v14 = vsub.s32 1, %v90_v9 }
  0x29   :  { %305 = vmatprep.subr.bf16.mxu0 %v3263_v25  ;;  %378 = vmatprep.subr.bf16.mxu1 %v3265_v26  ;;  %v3887_v15 = vrot.slane %v87_v13, %v99_v10  ;;  %v3893_v18 = vrot.slane %v87_v13, %v103_v11  ;;  %v92_v19 = vrot.slane %v87_v13, %v91_v12 }
  0x2a   :  { %v96_v22 = vrot.slane %v87_v13, %v95_v14 }
  0x2c   :  { %306 = vmatpush1.bf16.msra.mxu0 %v3267_v27  ;;  %379 = vmatpush1.bf16.msra.mxu1 %v3268_v28 }
  0x2d   :  { %307 = vmatprep.subr.bf16.mxu0 %v3269_v29  ;;  %380 = vmatprep.subr.bf16.mxu1 %v3271_v30 }
  0x30   :  { %308 = vmatpush1.bf16.msra.mxu0 %v3273_v31  ;;  %381 = vmatpush1.bf16.msra.mxu1 %v3274_v32 }
  0x31   :  { %670 = vmatprep.subr.bf16.mxu0 %v3639_v33  ;;  %711 = vmatprep.subr.bf16.mxu1 %v3644_v34 }
  0x33   :  { %326 = vmatmul.mubr.bf16.vlgmr.msra.gmra.mrb[0].mxu0 %v3275_v35  ;;  %399 = vmatmul.mubr.bf16.vlgmr.msra.gmra.mrb[0].mxu1 %v3275_v35 }
  0x34   :  { %671 = vmatpush1.bf16.msra.mxu0 %v3652_v36  ;;  %712 = vmatpush1.bf16.msra.mxu1 %v3657_v37 }
  0x35   :  { %672 = vmatprep.subr.bf16.mxu0 %v3664_v38  ;;  %713 = vmatprep.subr.bf16.mxu1 %v3669_v39 }
  0x36   :  { %335 = vmatprep.mubr.bf16.mxu0 %v4425_v0  ;;  %408 = vmatprep.mubr.bf16.mxu1 %v4425_v0 }
  0x38   :  { %673 = vmatpush1.bf16.msra.mxu0 %v3674_v40  ;;  %714 = vmatpush1.bf16.msra.mxu1 %v3681_v41 }
  0x39   :  { %674 = vmatprep.subr.bf16.mxu0 %v3688_v42  ;;  %715 = vmatprep.subr.bf16.mxu1 %v3693_v43 }
  0x3b   :  { %336 = vmatmul.mubr.bf16.gmra.mrb[4].mxu0 %v3288_v44  ;;  %409 = vmatmul.mubr.bf16.gmra.mrb[4].mxu1 %v3288_v44 }
  0x3c   :  { %675 = vmatpush1.bf16.msra.mxu0 %v3703_v45  ;;  %716 = vmatpush1.bf16.msra.mxu1 %v3708_v46 }
  0x3d   :  { %676 = vmatprep.subr.bf16.mxu0 %v3715_v47  ;;  %717 = vmatprep.subr.bf16.mxu1 %v3722_v48 }
  0x3e   :  { %345 = vmatprep.mubr.bf16.mxu0 %v4425_v0  ;;  %418 = vmatprep.mubr.bf16.mxu1 %v4425_v0 }
  0x40   :  { %677 = vmatpush1.bf16.msra.mxu0 %v3727_v49  ;;  %718 = vmatpush1.bf16.msra.mxu1 %v3732_v50 }
  0x41   :  { %678 = vmatprep.subr.bf16.mxu0 %v3739_v51  ;;  %719 = vmatprep.subr.bf16.mxu1 %v3746_v52 }
  0x43   :  { %346 = vmatmul.mubr.bf16.gmra.mrb[8].mxu0 %v3301_v53  ;;  %419 = vmatmul.mubr.bf16.gmra.mrb[8].mxu1 %v3301_v53 }
  0x44   :  { %679 = vmatpush1.bf16.msra.mxu0 %v3756_v54  ;;  %720 = vmatpush1.bf16.msra.mxu1 %v3761_v55 }
  0x45   :  { %680 = vmatprep.subr.bf16.mxu0 %v3766_v56  ;;  %721 = vmatprep.subr.bf16.mxu1 %v3771_v57 }
  0x46   :  { %355 = vmatprep.mubr.bf16.mxu0 %v4425_v0  ;;  %428 = vmatprep.mubr.bf16.mxu1 %v4425_v0 }
  0x48   :  { %681 = vmatpush1.bf16.msra.mxu0 %v3780_v58  ;;  %722 = vmatpush1.bf16.msra.mxu1 %v3785_v59 }
  0x49   :  { %682 = vmatprep.subr.bf16.mxu0 %v3790_v60  ;;  %723 = vmatprep.subr.bf16.mxu1 %v3795_v61 }
  0x4b   :  { %356 = vmatmul.mubr.bf16.gmra.mrb[12].mxu0 %v3314_v62  ;;  %429 = vmatmul.mubr.bf16.gmra.mrb[12].mxu1 %v3314_v62 }
  0x4c   :  { %683 = vmatpush1.bf16.msra.mxu0 %v3809_v63  ;;  %724 = vmatpush1.bf16.msra.mxu1 %v3814_v1 }
  0x4d   :  { %684 = vmatprep.subr.bf16.mxu0 %v3819_v2  ;;  %725 = vmatprep.subr.bf16.mxu1 %v3824_v3 }
  0x4e   :  { %702 = vmatprep.mubr.bf16.mxu0 %v4425_v0  ;;  %743 = vmatprep.mubr.bf16.mxu1 %v4425_v0 }
  0x50   :  { %685 = vmatpush1.bf16.msra.mxu0 %v3835_v4  ;;  %726 = vmatpush1.bf16.msra.mxu1 %v3840_v5 }
  0x51   :  { %973 = vmatprep.subr.bf16.mxu0 %v3639_v33  ;;  %1014 = vmatprep.subr.bf16.mxu1 %v3644_v34 }
  0x53   :  { %703 = vmatmul.mubr.bf16.vlgmr.msra.gmra.mrb[16].mxu0 %v477_v7  ;;  %744 = vmatmul.mubr.bf16.vlgmr.msra.gmra.mrb[16].mxu1 %v477_v7 }
  0x54   :  { %974 = vmatpush1.bf16.msra.mxu0 %v3652_v36  ;;  %1015 = vmatpush1.bf16.msra.mxu1 %v3657_v37 }
  0x55   :  { %975 = vmatprep.subr.bf16.mxu0 %v3664_v38  ;;  %1016 = vmatprep.subr.bf16.mxu1 %v3669_v39 }
  0x56   :  { %1005 = vmatprep.mubr.bf16.mxu0 %v4425_v0  ;;  %1046 = vmatprep.mubr.bf16.mxu1 %v4425_v0 }
  0x58   :  { %976 = vmatpush1.bf16.msra.mxu0 %v3674_v40  ;;  %1017 = vmatpush1.bf16.msra.mxu1 %v3681_v41 }
  0x59   :  { %977 = vmatprep.subr.bf16.mxu0 %v3688_v42  ;;  %1018 = vmatprep.subr.bf16.mxu1 %v3693_v43 }
  0x5c   :  { %978 = vmatpush1.bf16.msra.mxu0 %v3703_v45  ;;  %1019 = vmatpush1.bf16.msra.mxu1 %v3708_v46 }
  0x5d   :  { %979 = vmatprep.subr.bf16.mxu0 %v3715_v47  ;;  %1020 = vmatprep.subr.bf16.mxu1 %v3722_v48 }
  0x60   :  { %980 = vmatpush1.bf16.msra.mxu0 %v3727_v49  ;;  %1021 = vmatpush1.bf16.msra.mxu1 %v3732_v50 }
  0x61   :  { %981 = vmatprep.subr.bf16.mxu0 %v3739_v51  ;;  %1022 = vmatprep.subr.bf16.mxu1 %v3746_v52 }
  0x64   :  { %982 = vmatpush1.bf16.msra.mxu0 %v3756_v54  ;;  %1023 = vmatpush1.bf16.msra.mxu1 %v3761_v55 }
  0x65   :  { %983 = vmatprep.subr.bf16.mxu0 %v3766_v56  ;;  %1024 = vmatprep.subr.bf16.mxu1 %v3771_v57 }
  0x68   :  { %984 = vmatpush1.bf16.msra.mxu0 %v3780_v58  ;;  %1025 = vmatpush1.bf16.msra.mxu1 %v3785_v59 }
  0x69   :  { %985 = vmatprep.subr.bf16.mxu0 %v3790_v60  ;;  %1026 = vmatprep.subr.bf16.mxu1 %v3795_v61 }
  0x6c   :  { %986 = vmatpush1.bf16.msra.mxu0 %v3809_v63  ;;  %1027 = vmatpush1.bf16.msra.mxu1 %v3814_v1 }
  0x6d   :  { %987 = vmatprep.subr.bf16.mxu0 %v3819_v2  ;;  %1028 = vmatprep.subr.bf16.mxu1 %v3824_v3 }
  0x70   :  { %988 = vmatpush1.bf16.msra.mxu0 %v3835_v4  ;;  %1029 = vmatpush1.bf16.msra.mxu1 %v3840_v5 }
  0x71   :  { %1277 = vmatprep.subr.bf16.mxu0 %v3639_v33  ;;  %1318 = vmatprep.subr.bf16.mxu1 %v3644_v34 }
 0x106   :  { %v3889_v16 = vpop.f32.mrb[0].mxu0  ;;  %v3891_v17 = vpop.f32.mrb[0].mxu1 }
 0x107   :  { %v329_v20 = vpop.f32.mrb[1].mxu0  ;;  %v402_v21 = vpop.f32.mrb[1].mxu1 }
 0x108   :  { %v331_v23 = vpop.f32.mrb[2].mxu0  ;;  %v404_v24 = vpop.f32.mrb[2].mxu1 }
 0x109   :  { %v3895_v25 = vadd.f32 %v331_v23, %v92_v19  ;;  %v333_v26 = vpop.f32.mrb[3].mxu0  ;;  %v3898_v27 = vadd.f32 %v404_v24, %v3887_v15  ;;  %v406_v28 = vpop.f32.mrb[3].mxu1 }
 0x10a   :  { %v3900_v29 = vadd.f32 %v333_v26, %v96_v22  ;;  %v3903_v30 = vadd.f32 %v406_v28, %v3893_v18 }
 0x10e   :  { %v337_v31 = vpop.f32.mrb[4].mxu0  ;;  %v410_v32 = vpop.f32.mrb[4].mxu1 }
 0x10f   :  { %v3905_v35 = vadd.f32 %v337_v31, %v92_v19  ;;  %v339_v44 = vpop.f32.mrb[5].mxu0  ;;  %v3908_v53 = vadd.f32 %v410_v32, %v3887_v15  ;;  %v412_v62 = vpop.f32.mrb[5].mxu1 }
 0x110   :  { %v3910_v6 = vadd.f32 %v339_v44, %v96_v22  ;;  %v341_v7 = vpop.f32.mrb[6].mxu0  ;;  %v3913_v8 = vadd.f32 %v412_v62, %v3893_v18  ;;  %v414_v9 = vpop.f32.mrb[6].mxu1 }
 0x111   :  { %v3915_v10 = vadd.f32 %v341_v7, %v92_v19  ;;  %v343_v11 = vpop.f32.mrb[7].mxu0  ;;  %v3918_v12 = vadd.f32 %v414_v9, %v3887_v15  ;;  %v416_v13 = vpop.f32.mrb[7].mxu1 }
 0x112   :  { %4427 = vst [vmem:[#allocation8_spill] sm:$0xff] %v3913_v8  ;;  %v3920_v14 = vadd.f32 %v343_v11, %v96_v22  ;;  %v3923_v23 = vadd.f32 %v416_v13, %v3893_v18 }
 0x113   :  { %4428 = vst [vmem:[#allocation9_spill] sm:$0xff] %v3915_v10  ;;  %4429 = vst [vmem:[#allocation10_spill] sm:$0xff] %v3918_v12 }
 0x114   :  { %4430 = vst [vmem:[#allocation11_spill] sm:$0xff] %v3920_v14  ;;  %4431 = vst [vmem:[#allocation12_spill] sm:$0xff] %v3923_v23 }
 0x116   :  { %v347_v24 = vpop.f32.mrb[8].mxu0  ;;  %v420_v26 = vpop.f32.mrb[8].mxu1 }
 0x117   :  { %v3925_v28 = vadd.f32 %v347_v24, %v92_v19  ;;  %v349_v31 = vpop.f32.mrb[9].mxu0  ;;  %v3928_v32 = vadd.f32 %v420_v26, %v3887_v15  ;;  %v422_v44 = vpop.f32.mrb[9].mxu1 }
 0x118   :  { %v3930_v62 = vadd.f32 %v349_v31, %v96_v22  ;;  %v351_v7 = vpop.f32.mrb[10].mxu0  ;;  %v3933_v9 = vadd.f32 %v422_v44, %v3893_v18  ;;  %v424_v11 = vpop.f32.mrb[10].mxu1 }
 0x119   :  { %4432 = vst [vmem:[#allocation13_spill] sm:$0xff] %v3925_v28  ;;  %4433 = vst [vmem:[#allocation14_spill] sm:$0xff] %v3928_v32  ;;  %v3935_v0 = vadd.f32 %v351_v7, %v92_v19  ;;  %v353_v13 = vpop.f32.mrb[11].mxu0  ;;  %v3938_v23 = vadd.f32 %v424_v11, %v3887_v15  ;;  %v426_v24 = vpop.f32.mrb[11].mxu1 }
 0x11a   :  { %4434 = vst [vmem:[#allocation15_spill] sm:$0xff] %v3930_v62  ;;  %4435 = vst [vmem:[#allocation16_spill] sm:$0xff] %v3933_v9  ;;  %v3940_v28 = vadd.f32 %v353_v13, %v96_v22  ;;  %v3943_v26 = vadd.f32 %v426_v24, %v3893_v18 }
 0x11b   :  { %4436 = vst [vmem:[#allocation17_spill] sm:$0xff] %v3935_v0  ;;  %4437 = vst [vmem:[#allocation18_spill] sm:$0xff] %v3938_v23 }
 0x11c   :  { %4438 = vst [vmem:[#allocation19_spill] sm:$0xff] %v3940_v28  ;;  %4439 = vst [vmem:[#allocation20_spill] sm:$0xff] %v3943_v26 }
 0x11e   :  { %v357_v32 = vpop.f32.mrb[12].mxu0  ;;  %v430_v31 = vpop.f32.mrb[12].mxu1 }
 0x11f   :  { %v3945_v62 = vadd.f32 %v357_v32, %v92_v19  ;;  %v359_v14 = vpop.f32.mrb[13].mxu0  ;;  %v3948_v44 = vadd.f32 %v430_v31, %v3887_v15  ;;  %v432_v7 = vpop.f32.mrb[13].mxu1 }
 0x120   :  { %v3950_v0 = vadd.f32 %v359_v14, %v96_v22  ;;  %v361_v9 = vpop.f32.mrb[14].mxu0  ;;  %v3953_v11 = vadd.f32 %v432_v7, %v3893_v18  ;;  %v434_v13 = vpop.f32.mrb[14].mxu1  ;;  %v328_v14 = vadd.f32 %v3889_v16, %v92_v19  ;;  %v330_v7 = vadd.f32 %v329_v20, %v96_v22 }
 0x121   :  { %4440 = vst [vmem:[#allocation21_spill] sm:$0xff] %v3945_v62  ;;  %4441 = vst [vmem:[#allocation22_spill] sm:$0xff] %v3948_v44  ;;  %v3955_v28 = vadd.f32 %v361_v9, %v92_v19  ;;  %v363_v24 = vpop.f32.mrb[15].mxu0  ;;  %v3958_v26 = vadd.f32 %v434_v13, %v3887_v15  ;;  %v436_v32 = vpop.f32.mrb[15].mxu1 }
 0x122   :  { %4442 = vst [vmem:[#allocation23_spill] sm:$0xff] %v3950_v0  ;;  %4443 = vst [vmem:[#allocation24_spill] sm:$0xff] %v3953_v11  ;;  %v3960_v62 = vadd.f32 %v363_v24, %v96_v22  ;;  %v3963_v31 = vadd.f32 %v436_v32, %v3893_v18  ;;  %v401_v0 = vadd.f32 %v3891_v17, %v3887_v15 }
 0x123   :  { %4444 = vst [vmem:[#allocation25_spill] sm:$0xff] %v3955_v28  ;;  %4445 = vst [vmem:[#allocation26_spill] sm:$0xff] %v3958_v26  ;;  %v403_v11 = vadd.f32 %v402_v21, %v3893_v18  ;;  %v45_v21 = vld [vmem:[%s4421_s5] sm:$0xff] }
 0x124   :  { %4446 = vst [vmem:[#allocation27_spill] sm:$0xff] %v3960_v62  ;;  %4447 = vst [vmem:[#allocation28_spill] sm:$0xff] %v3963_v31 }
 0x126   :  { %v704_v9 = vpop.f32.mrb[16].mxu0  ;;  %v745_v28 = vpop.f32.mrb[16].mxu1 }
 0x127   :  { %v752_v44 = vadd.f32 %v704_v9, %v328_v14  ;;  %v754_v23 = vadd.f32 %v745_v28, %v401_v0  ;;  %v706_v13 = vpop.f32.mrb[17].mxu0  ;;  %v747_v26 = vpop.f32.mrb[17].mxu1  ;;  %v4448_v14 = vmov 0  }
 0x128   :  { %v753_v12 = vadd.f32 %v706_v13, %v330_v7  ;;  %v755_v24 = vadd.f32 %v747_v26, %v403_v11  ;;  %v708_v62 = vpop.f32.mrb[18].mxu0  ;;  %v749_v10 = vpop.f32.mrb[18].mxu1 }
 0x129   :  { %v756_v32 = vmul.f32 0.5, %v752_v44  ;;  %v709_v31 = vpop.f32.mrb[19].mxu0  ;;  %v750_v8 = vpop.f32.mrb[19].mxu1 }
 0x12a   :  { %v760_v16 = vmul.f32 0.5, %v753_v12  ;;  %v765_v15 = vmul.f32 0.5, %v755_v24 }
 0x12b   :  { %3375 = vtanh.f32 %v756_v32 }
 0x12c   :  { %3377 = vtanh.f32 %v760_v16 }
 0x12d   :  { %3379 = vtanh.f32 %v754_v23 }
 0x12e   :  { %3381 = vtanh.f32 %v765_v15 }
 0x135   :  { %v3376_v17 = vpop.eup %3375 }
 0x136   :  { %v3378_v18 = vpop.eup %3377  ;;  %v758_v19 = vmul.f32 0.5, %v3376_v17 }
 0x137   :  { %v762_v20 = vmul.f32 0.5, %v3378_v18  ;;  %v3380_v22 = vpop.eup %3379 }
 0x138   :  { %v759_v0 = vadd.f32 0.5, %v758_v19  ;;  %v3382_v12 = vpop.eup %3381 }
 0x139   :  { %v763_v10 = vadd.f32 0.5, %v762_v20  ;;  %v767_v23 = vmul.f32 0.5, %v3382_v12 }
 0x13a   :  { %v770_v28 = vmul.f32 %v3380_v22, %v759_v0 }
 0x13b   :  { %v769_v62 = vmul.f32 %v763_v10, %v45_v21  ;;  %v768_v26 = vadd.f32 0.5, %v767_v23 }
 0x13d   :  { %v3972_v8 = vadd.f32 %v770_v28, %v769_v62 }
 0x13f   :  { %3383 = vtanh.f32 %v3972_v8 }
 0x149   :  { %v3384_v44 = vpop.eup %3383 }
 0x14a   :  { %v773_v11 = vmul.f32 %v3384_v44, %v768_v26 }
 0x14c   :  { %v774_v31 = vpack.c.bf16 %v773_v11, %v773_v11 }
 0x14e   :  { %775 = vst [vmem:[%s4422_s6] sm:$0xf] %v774_v31  ;;  %1006 = vmatmul.mubr.bf16.vlgmr.msra.gmra.mrb[20].mxu0 %v774_v31  ;;  %1047 = vmatmul.mubr.bf16.vlgmr.msra.gmra.mrb[20].mxu1 %v774_v31 }
 0x14f   :  { %1278 = vmatpush1.bf16.msra.mxu0 %v3652_v36  ;;  %1319 = vmatpush1.bf16.msra.mxu1 %v3657_v37 }
 0x150   :  { %1279 = vmatprep.subr.bf16.mxu0 %v3664_v38  ;;  %1320 = vmatprep.subr.bf16.mxu1 %v3669_v39 }
 0x151   :  { %1309 = vmatprep.mubr.bf16.mxu0 %v4448_v14  ;;  %1350 = vmatprep.mubr.bf16.mxu1 %v4448_v14 }
 0x153   :  { %1280 = vmatpush1.bf16.msra.mxu0 %v3674_v40  ;;  %1321 = vmatpush1.bf16.msra.mxu1 %v3681_v41 }
 0x154   :  { %1281 = vmatprep.subr.bf16.mxu0 %v3688_v42  ;;  %1322 = vmatprep.subr.bf16.mxu1 %v3693_v43 }
 0x157   :  { %1282 = vmatpush1.bf16.msra.mxu0 %v3703_v45  ;;  %1323 = vmatpush1.bf16.msra.mxu1 %v3708_v46 }
 0x158   :  { %1283 = vmatprep.subr.bf16.mxu0 %v3715_v47  ;;  %1324 = vmatprep.subr.bf16.mxu1 %v3722_v48 }
 0x15b   :  { %1284 = vmatpush1.bf16.msra.mxu0 %v3727_v49  ;;  %1325 = vmatpush1.bf16.msra.mxu1 %v3732_v50 }
 0x15c   :  { %1285 = vmatprep.subr.bf16.mxu0 %v3739_v51  ;;  %1326 = vmatprep.subr.bf16.mxu1 %v3746_v52 }
 0x15f   :  { %1286 = vmatpush1.bf16.msra.mxu0 %v3756_v54  ;;  %1327 = vmatpush1.bf16.msra.mxu1 %v3761_v55 }
 0x160   :  { %1287 = vmatprep.subr.bf16.mxu0 %v3766_v56  ;;  %1328 = vmatprep.subr.bf16.mxu1 %v3771_v57 }
 0x163   :  { %1288 = vmatpush1.bf16.msra.mxu0 %v3780_v58  ;;  %1329 = vmatpush1.bf16.msra.mxu1 %v3785_v59 }
 0x164   :  { %1289 = vmatprep.subr.bf16.mxu0 %v3790_v60  ;;  %1330 = vmatprep.subr.bf16.mxu1 %v3795_v61 }
 0x167   :  { %1290 = vmatpush1.bf16.msra.mxu0 %v3809_v63  ;;  %1331 = vmatpush1.bf16.msra.mxu1 %v3814_v1 }
 0x168   :  { %1291 = vmatprep.subr.bf16.mxu0 %v3819_v2  ;;  %1332 = vmatprep.subr.bf16.mxu1 %v3824_v3 }
 0x16b   :  { %1292 = vmatpush1.bf16.msra.mxu0 %v3835_v4  ;;  %1333 = vmatpush1.bf16.msra.mxu1 %v3840_v5 }
 0x16c   :  { %1581 = vmatprep.subr.bf16.mxu0 %v3639_v33  ;;  %1622 = vmatprep.subr.bf16.mxu1 %v3644_v34 }
 0x221   :  { %v1007_v7 = vpop.f32.mrb[20].mxu0  ;;  %v1048_v9 = vpop.f32.mrb[20].mxu1 }
 0x222   :  { %v1055_v13 = vadd.f32 %v1007_v7, %v3895_v25  ;;  %v1057_v24 = vadd.f32 %v1048_v9, %v3898_v27  ;;  %v1009_v32 = vpop.f32.mrb[21].mxu0  ;;  %v1050_v16 = vpop.f32.mrb[21].mxu1 }
 0x223   :  { %v1056_v15 = vadd.f32 %v1009_v32, %v3900_v29  ;;  %v1058_v17 = vadd.f32 %v1050_v16, %v3903_v30  ;;  %v1011_v18 = vpop.f32.mrb[22].mxu0  ;;  %v1052_v19 = vpop.f32.mrb[22].mxu1  ;;  %v4095_v32 = vld [vmem:[%s4418_s2 + $0x24] ss:$16 sps:$4 sm:$0xff]   ;;  %v4100_v16 = vld [vmem:[%s4418_s2 + $0x2c] ss:$16 sps:$4 sm:$0xff]  }
 0x224   :  { %v1059_v20 = vmul.f32 0.5, %v1055_v13  ;;  %v1012_v0 = vpop.f32.mrb[23].mxu0  ;;  %v1053_v21 = vpop.f32.mrb[23].mxu1  ;;  %v4081_v13 = vld [vmem:[%s4418_s2] ss:$16 sps:$4 sm:$0xff]  }
 0x225   :  { %v1063_v33 = vmul.f32 0.5, %v1056_v15  ;;  %v1068_v34 = vmul.f32 0.5, %v1058_v17  ;;  %v4105_v15 = vld [vmem:[%s4418_s2 + $0x20] ss:$16 sps:$4 sm:$0xff]   ;;  %v4110_v17 = vld [vmem:[%s4418_s2 + $0x28] ss:$16 sps:$4 sm:$0xff]  }
 0x226   :  { %3385 = vtanh.f32 %v1059_v20  ;;  %v4119_v18 = vld [vmem:[%s4418_s2 + $0x44] ss:$16 sps:$4 sm:$0xff]   ;;  %v4124_v19 = vld [vmem:[%s4418_s2 + $0x4c] ss:$16 sps:$4 sm:$0xff]   ;;  %v4129_v20 = vld [vmem:[%s4418_s2 + $0x40] ss:$16 sps:$4 sm:$0xff]  }
 0x227   :  { %3387 = vtanh.f32 %v1063_v33  ;;  %v4134_v0 = vld [vmem:[%s4418_s2 + $0x48] ss:$16 sps:$4 sm:$0xff]   ;;  %v4143_v21 = vld [vmem:[%s4418_s2 + $0x64] ss:$16 sps:$4 sm:$0xff]   ;;  %v4148_v33 = vld [vmem:[%s4418_s2 + $0x6c] ss:$16 sps:$4 sm:$0xff]  }
 0x228   :  { %3389 = vtanh.f32 %v1057_v24  ;;  %v4086_v24 = vld [vmem:[%s4418_s2 + $0x8] ss:$16 sps:$4 sm:$0xff]  }
 0x229   :  { %3391 = vtanh.f32 %v1068_v34  ;;  %v4153_v34 = vld [vmem:[%s4418_s2 + $0x60] ss:$16 sps:$4 sm:$0xff]  }
 0x230   :  { %v3386_v22 = vpop.eup %3385 }
 0x231   :  { %v3388_v25 = vpop.eup %3387  ;;  %v1061_v10 = vmul.f32 0.5, %v3386_v22  ;;  %v4158_v22 = vld [vmem:[%s4418_s2 + $0x68] ss:$16 sps:$4 sm:$0xff]  }
 0x232   :  { %v1065_v27 = vmul.f32 0.5, %v3388_v25  ;;  %v3390_v62 = vpop.eup %3389  ;;  %v4167_v25 = vld [vmem:[%s4418_s2 + $0x84] ss:$16 sps:$4 sm:$0xff]  }
 0x233   :  { %v1062_v28 = vadd.f32 0.5, %v1061_v10  ;;  %v3392_v26 = vpop.eup %3391  ;;  %v4172_v10 = vld [vmem:[%s4418_s2 + $0x8c] ss:$16 sps:$4 sm:$0xff]  }
 0x234   :  { %v1066_v29 = vadd.f32 0.5, %v1065_v27  ;;  %v1070_v44 = vmul.f32 0.5, %v3392_v26  ;;  %v4177_v27 = vld [vmem:[%s4418_s2 + $0x80] ss:$16 sps:$4 sm:$0xff]   ;;  %v4220_v26 = vld [vmem:[%s4418_s2 + $0xcc] ss:$16 sps:$4 sm:$0xff]  }
 0x235   :  { %v1073_v12 = vmul.f32 %v3390_v62, %v1062_v28  ;;  %v4182_v28 = vld [vmem:[%s4418_s2 + $0x88] ss:$16 sps:$4 sm:$0xff]   ;;  %v4191_v62 = vld [vmem:[%s4418_s2 + $0xa4] ss:$16 sps:$4 sm:$0xff]  }
 0x236   :  { %v1072_v30 = vmul.f32 %v1066_v29, %v3972_v8  ;;  %v1071_v11 = vadd.f32 0.5, %v1070_v44  ;;  %v4076_v8 = vld [vmem:[%s4418_s2 + $0xc] ss:$16 sps:$4 sm:$0xff]   ;;  %v4225_v44 = vld [vmem:[%s4418_s2 + $0xc0] ss:$16 sps:$4 sm:$0xff]  }
 0x237   :  { %v4196_v29 = vld [vmem:[%s4418_s2 + $0xac] ss:$16 sps:$4 sm:$0xff]  }
 0x238   :  { %v4017_v23 = vadd.f32 %v1073_v12, %v1072_v30  ;;  %v4201_v12 = vld [vmem:[%s4418_s2 + $0xa0] ss:$16 sps:$4 sm:$0xff]   ;;  %v4206_v30 = vld [vmem:[%s4418_s2 + $0xa8] ss:$16 sps:$4 sm:$0xff]  }
 0x23a   :  { %3393 = vtanh.f32 %v4017_v23 }
 0x244   :  { %v3394_v31 = vpop.eup %3393 }
 0x245   :  { %v1076_v7 = vmul.f32 %v3394_v31, %v1071_v11  ;;  %v4230_v11 = vld [vmem:[%s4418_s2 + $0xc8] ss:$16 sps:$4 sm:$0xff]   ;;  %v4239_v31 = vld [vmem:[%s4418_s2 + $0xe4] ss:$16 sps:$4 sm:$0xff]  }
 0x247   :  { %v1077_v9 = vpack.c.bf16 %v1076_v7, %v1076_v7  ;;  %v4244_v7 = vld [vmem:[%s4418_s2 + $0xec] ss:$16 sps:$4 sm:$0xff]  }
 0x249   :  { %3026 = vst [vmem:[%s4422_s6 + $0x4] sm:$0xf] %v1077_v9  ;;  %1310 = vmatmul.mubr.bf16.vlgmr.msra.gmra.mrb[24].mxu0 %v1077_v9  ;;  %1351 = vmatmul.mubr.bf16.vlgmr.msra.gmra.mrb[24].mxu1 %v1077_v9  ;;  %v4249_v9 = vld [vmem:[%s4418_s2 + $0xe0] ss:$16 sps:$4 sm:$0xff]  }
 0x24a   :  { %1582 = vmatpush1.bf16.msra.mxu0 %v3652_v36  ;;  %1623 = vmatpush1.bf16.msra.mxu1 %v3657_v37 }
 0x24b   :  { %1583 = vmatprep.subr.bf16.mxu0 %v3664_v38  ;;  %1624 = vmatprep.subr.bf16.mxu1 %v3669_v39 }
 0x24c   :  { %1613 = vmatprep.mubr.bf16.mxu0 %v4448_v14  ;;  %1654 = vmatprep.mubr.bf16.mxu1 %v4448_v14 }
 0x24e   :  { %1584 = vmatpush1.bf16.msra.mxu0 %v3674_v40  ;;  %1625 = vmatpush1.bf16.msra.mxu1 %v3681_v41 }
 0x24f   :  { %1585 = vmatprep.subr.bf16.mxu0 %v3688_v42  ;;  %1626 = vmatprep.subr.bf16.mxu1 %v3693_v43  ;;  %v4449_v43 = vld [vmem:[#allocation8_spill] sm:$0xff] }
 0x252   :  { %1586 = vmatpush1.bf16.msra.mxu0 %v3703_v45  ;;  %1627 = vmatpush1.bf16.msra.mxu1 %v3708_v46 }
 0x253   :  { %1587 = vmatprep.subr.bf16.mxu0 %v3715_v47  ;;  %1628 = vmatprep.subr.bf16.mxu1 %v3722_v48 }
 0x256   :  { %1588 = vmatpush1.bf16.msra.mxu0 %v3727_v49  ;;  %1629 = vmatpush1.bf16.msra.mxu1 %v3732_v50 }
 0x257   :  { %1589 = vmatprep.subr.bf16.mxu0 %v3739_v51  ;;  %1630 = vmatprep.subr.bf16.mxu1 %v3746_v52 }
 0x25a   :  { %1590 = vmatpush1.bf16.msra.mxu0 %v3756_v54  ;;  %1631 = vmatpush1.bf16.msra.mxu1 %v3761_v55 }
 0x25b   :  { %1591 = vmatprep.subr.bf16.mxu0 %v3766_v56  ;;  %1632 = vmatprep.subr.bf16.mxu1 %v3771_v57 }
 0x25e   :  { %1592 = vmatpush1.bf16.msra.mxu0 %v3780_v58  ;;  %1633 = vmatpush1.bf16.msra.mxu1 %v3785_v59 }
 0x25f   :  { %1593 = vmatprep.subr.bf16.mxu0 %v3790_v60  ;;  %1634 = vmatprep.subr.bf16.mxu1 %v3795_v61 }
 0x262   :  { %1594 = vmatpush1.bf16.msra.mxu0 %v3809_v63  ;;  %1635 = vmatpush1.bf16.msra.mxu1 %v3814_v1 }
 0x263   :  { %1595 = vmatprep.subr.bf16.mxu0 %v3819_v2  ;;  %1636 = vmatprep.subr.bf16.mxu1 %v3824_v3 }
 0x266   :  { %1596 = vmatpush1.bf16.msra.mxu0 %v3835_v4  ;;  %1637 = vmatpush1.bf16.msra.mxu1 %v3840_v5 }
 0x267   :  { %1926 = vmatprep.subr.bf16.mxu1 %v4076_v8 }
 0x31c   :  { %v1311_v36 = vpop.f32.mrb[24].mxu0  ;;  %v1352_v37 = vpop.f32.mrb[24].mxu1 }
 0x31d   :  { %v1359_v38 = vadd.f32 %v1311_v36, %v3905_v35  ;;  %v1361_v39 = vadd.f32 %v1352_v37, %v3908_v53  ;;  %v1313_v40 = vpop.f32.mrb[25].mxu0  ;;  %v1354_v41 = vpop.f32.mrb[25].mxu1  ;;  %v4254_v36 = vld [vmem:[%s4418_s2 + $0xe8] ss:$16 sps:$4 sm:$0xff]  }
 0x31e   :  { %v1360_v42 = vadd.f32 %v1313_v40, %v3910_v6  ;;  %v1362_v45 = vadd.f32 %v1354_v41, %v4449_v43  ;;  %v1315_v46 = vpop.f32.mrb[26].mxu0  ;;  %v1356_v47 = vpop.f32.mrb[26].mxu1  ;;  %v4071_v6 = vld [vmem:[%s4418_s2 + $0x4] ss:$16 sps:$4 sm:$0xff]  }
 0x31f   :  { %v1363_v48 = vmul.f32 0.5, %v1359_v38  ;;  %v1316_v49 = vpop.f32.mrb[27].mxu0  ;;  %v1357_v50 = vpop.f32.mrb[27].mxu1  ;;  %1885 = vmatprep.subr.bf16.mxu0 %v4071_v6  ;;  %v4451_v41 = vld [vmem:[#allocation10_spill] sm:$0xff]  ;;  %v4452_v46 = vld [vmem:[#allocation11_spill] sm:$0xff] }
 0x320   :  { %v1367_v51 = vmul.f32 0.5, %v1360_v42  ;;  %v1372_v52 = vmul.f32 0.5, %v1362_v45 }
 0x321   :  { %3395 = vtanh.f32 %v1363_v48  ;;  %v4453_v48 = vld [vmem:[#allocation12_spill] sm:$0xff] }
 0x322   :  { %3397 = vtanh.f32 %v1367_v51 }
 0x323   :  { %3399 = vtanh.f32 %v1361_v39  ;;  %v4450_v39 = vld [vmem:[#allocation9_spill] sm:$0xff] }
 0x324   :  { %3401 = vtanh.f32 %v1372_v52 }
 0x32b   :  { %v3396_v54 = vpop.eup %3395 }
 0x32c   :  { %v3398_v55 = vpop.eup %3397  ;;  %v1365_v56 = vmul.f32 0.5, %v3396_v54 }
 0x32d   :  { %v1369_v57 = vmul.f32 0.5, %v3398_v55  ;;  %v3400_v59 = vpop.eup %3399 }
 0x32e   :  { %v1366_v58 = vadd.f32 0.5, %v1365_v56  ;;  %v3402_v2 = vpop.eup %3401 }
 0x32f   :  { %v1370_v60 = vadd.f32 0.5, %v1369_v57  ;;  %v1374_v3 = vmul.f32 0.5, %v3402_v2 }
 0x330   :  { %v1377_v61 = vmul.f32 %v3400_v59, %v1366_v58 }
 0x331   :  { %v1376_v63 = vmul.f32 %v1370_v60, %v4017_v23  ;;  %v1375_v4 = vadd.f32 0.5, %v1374_v3  ;;  %v4215_v23 = vld [vmem:[%s4418_s2 + $0xc4] ss:$16 sps:$4 sm:$0xff]  }
 0x333   :  { %v4060_v1 = vadd.f32 %v1377_v61, %v1376_v63 }
 0x335   :  { %3403 = vtanh.f32 %v4060_v1 }
 0x33f   :  { %v3404_v5 = vpop.eup %3403 }
 0x340   :  { %v1380_v35 = vmul.f32 %v3404_v5, %v1375_v4 }
 0x342   :  { %v1381_v53 = vpack.c.bf16 %v1380_v35, %v1380_v35 }
 0x344   :  { %3059 = vst [vmem:[%s4422_s6 + $0x8] sm:$0xf] %v1381_v53  ;;  %1614 = vmatmul.mubr.bf16.vlgmr.msra.gmra.mrb[28].mxu0 %v1381_v53  ;;  %1655 = vmatmul.mubr.bf16.vlgmr.msra.gmra.mrb[28].mxu1 %v1381_v53 }
 0x345   :  { %1917 = vmatprep.mubr.bf16.mxu0 %v4448_v14  ;;  %1958 = vmatprep.mubr.bf16.mxu1 %v4448_v14 }
 0x346   :  { %1886 = vmatpush1.bf16.msra.mxu0 %v4081_v13  ;;  %1927 = vmatpush1.bf16.msra.mxu1 %v4086_v24 }
 0x347   :  { %1887 = vmatprep.subr.bf16.mxu0 %v4095_v32  ;;  %1928 = vmatprep.subr.bf16.mxu1 %v4100_v16 }
 0x34a   :  { %1888 = vmatpush1.bf16.msra.mxu0 %v4105_v15  ;;  %1929 = vmatpush1.bf16.msra.mxu1 %v4110_v17 }
 0x34b   :  { %1889 = vmatprep.subr.bf16.mxu0 %v4119_v18  ;;  %1930 = vmatprep.subr.bf16.mxu1 %v4124_v19 }
 0x34e   :  { %1890 = vmatpush1.bf16.msra.mxu0 %v4129_v20  ;;  %1931 = vmatpush1.bf16.msra.mxu1 %v4134_v0 }
 0x34f   :  { %1891 = vmatprep.subr.bf16.mxu0 %v4143_v21  ;;  %1932 = vmatprep.subr.bf16.mxu1 %v4148_v33 }
 0x352   :  { %1892 = vmatpush1.bf16.msra.mxu0 %v4153_v34  ;;  %1933 = vmatpush1.bf16.msra.mxu1 %v4158_v22 }
 0x353   :  { %1893 = vmatprep.subr.bf16.mxu0 %v4167_v25  ;;  %1934 = vmatprep.subr.bf16.mxu1 %v4172_v10 }
 0x356   :  { %1894 = vmatpush1.bf16.msra.mxu0 %v4177_v27  ;;  %1935 = vmatpush1.bf16.msra.mxu1 %v4182_v28 }
 0x357   :  { %1895 = vmatprep.subr.bf16.mxu0 %v4191_v62  ;;  %1936 = vmatprep.subr.bf16.mxu1 %v4196_v29 }
 0x35a   :  { %1896 = vmatpush1.bf16.msra.mxu0 %v4201_v12  ;;  %1937 = vmatpush1.bf16.msra.mxu1 %v4206_v30 }
 0x35b   :  { %1897 = vmatprep.subr.bf16.mxu0 %v4215_v23  ;;  %1938 = vmatprep.subr.bf16.mxu1 %v4220_v26 }
 0x35e   :  { %1898 = vmatpush1.bf16.msra.mxu0 %v4225_v44  ;;  %1939 = vmatpush1.bf16.msra.mxu1 %v4230_v11 }
 0x35f   :  { %1899 = vmatprep.subr.bf16.mxu0 %v4239_v31  ;;  %1940 = vmatprep.subr.bf16.mxu1 %v4244_v7 }
 0x362   :  { %1900 = vmatpush1.bf16.msra.mxu0 %v4249_v9  ;;  %1941 = vmatpush1.bf16.msra.mxu1 %v4254_v36 }
 0x363   :  { %2189 = vmatprep.subr.bf16.mxu0 %v4071_v6  ;;  %2230 = vmatprep.subr.bf16.mxu1 %v4076_v8 }
 0x417   :  { %v1615_v37 = vpop.f32.mrb[28].mxu0  ;;  %v1656_v38 = vpop.f32.mrb[28].mxu1 }
 0x418   :  { %v1663_v40 = vadd.f32 %v1615_v37, %v4450_v39  ;;  %v1665_v42 = vadd.f32 %v1656_v38, %v4451_v41  ;;  %v1617_v43 = vpop.f32.mrb[29].mxu0  ;;  %v1658_v45 = vpop.f32.mrb[29].mxu1 }
 0x419   :  { %v1664_v47 = vadd.f32 %v1617_v43, %v4452_v46  ;;  %v1666_v49 = vadd.f32 %v1658_v45, %v4453_v48  ;;  %v1619_v50 = vpop.f32.mrb[30].mxu0  ;;  %v1660_v51 = vpop.f32.mrb[30].mxu1  ;;  %v4454_v43 = vld [vmem:[#allocation13_spill] sm:$0xff]  ;;  %v4455_v46 = vld [vmem:[#allocation14_spill] sm:$0xff] }
 0x41a   :  { %v1667_v52 = vmul.f32 0.5, %v1663_v40  ;;  %v1620_v54 = vpop.f32.mrb[31].mxu0  ;;  %v1661_v55 = vpop.f32.mrb[31].mxu1  ;;  %v4456_v50 = vld [vmem:[#allocation15_spill] sm:$0xff] }
 0x41b   :  { %v1671_v56 = vmul.f32 0.5, %v1664_v47  ;;  %v1676_v57 = vmul.f32 0.5, %v1666_v49 }
 0x41c   :  { %3405 = vtanh.f32 %v1667_v52  ;;  %v4457_v52 = vld [vmem:[#allocation16_spill] sm:$0xff] }
 0x41d   :  { %3407 = vtanh.f32 %v1671_v56 }
 0x41e   :  { %3409 = vtanh.f32 %v1665_v42 }
 0x41f   :  { %3411 = vtanh.f32 %v1676_v57 }
 0x426   :  { %v3406_v58 = vpop.eup %3405 }
 0x427   :  { %v3408_v59 = vpop.eup %3407  ;;  %v1669_v60 = vmul.f32 0.5, %v3406_v58 }
 0x428   :  { %v1673_v61 = vmul.f32 0.5, %v3408_v59  ;;  %v3410_v2 = vpop.eup %3409 }
 0x429   :  { %v1670_v63 = vadd.f32 0.5, %v1669_v60  ;;  %v3412_v53 = vpop.eup %3411 }
 0x42a   :  { %v1674_v3 = vadd.f32 0.5, %v1673_v61  ;;  %v1678_v37 = vmul.f32 0.5, %v3412_v53 }
 0x42b   :  { %v1681_v4 = vmul.f32 %v3410_v2, %v1670_v63 }
 0x42c   :  { %v1680_v5 = vmul.f32 %v1674_v3, %v4060_v1  ;;  %v1679_v38 = vadd.f32 0.5, %v1678_v37 }
 0x42e   :  { %v4267_v35 = vadd.f32 %v1681_v4, %v1680_v5 }
 0x430   :  { %3413 = vtanh.f32 %v4267_v35 }
 0x43a   :  { %v3414_v39 = vpop.eup %3413 }
 0x43b   :  { %v1684_v40 = vmul.f32 %v3414_v39, %v1679_v38 }
 0x43d   :  { %v1685_v41 = vpack.c.bf16 %v1684_v40, %v1684_v40 }
 0x43f   :  { %3092 = vst [vmem:[%s4422_s6 + $0xc] sm:$0xf] %v1685_v41  ;;  %1918 = vmatmul.mubr.bf16.vlgmr.msra.gmra.mrb[32].mxu0 %v1685_v41  ;;  %1959 = vmatmul.mubr.bf16.vlgmr.msra.gmra.mrb[32].mxu1 %v1685_v41 }
 0x440   :  { %2190 = vmatpush1.bf16.msra.mxu0 %v4081_v13  ;;  %2231 = vmatpush1.bf16.msra.mxu1 %v4086_v24 }
 0x441   :  { %2191 = vmatprep.subr.bf16.mxu0 %v4095_v32  ;;  %2232 = vmatprep.subr.bf16.mxu1 %v4100_v16 }
 0x442   :  { %2221 = vmatprep.mubr.bf16.mxu0 %v4448_v14  ;;  %2262 = vmatprep.mubr.bf16.mxu1 %v4448_v14 }
 0x444   :  { %2192 = vmatpush1.bf16.msra.mxu0 %v4105_v15  ;;  %2233 = vmatpush1.bf16.msra.mxu1 %v4110_v17 }
 0x445   :  { %2193 = vmatprep.subr.bf16.mxu0 %v4119_v18  ;;  %2234 = vmatprep.subr.bf16.mxu1 %v4124_v19 }
 0x448   :  { %2194 = vmatpush1.bf16.msra.mxu0 %v4129_v20  ;;  %2235 = vmatpush1.bf16.msra.mxu1 %v4134_v0 }
 0x449   :  { %2195 = vmatprep.subr.bf16.mxu0 %v4143_v21  ;;  %2236 = vmatprep.subr.bf16.mxu1 %v4148_v33 }
 0x44c   :  { %2196 = vmatpush1.bf16.msra.mxu0 %v4153_v34  ;;  %2237 = vmatpush1.bf16.msra.mxu1 %v4158_v22 }
 0x44d   :  { %2197 = vmatprep.subr.bf16.mxu0 %v4167_v25  ;;  %2238 = vmatprep.subr.bf16.mxu1 %v4172_v10 }
 0x450   :  { %2198 = vmatpush1.bf16.msra.mxu0 %v4177_v27  ;;  %2239 = vmatpush1.bf16.msra.mxu1 %v4182_v28 }
 0x451   :  { %2199 = vmatprep.subr.bf16.mxu0 %v4191_v62  ;;  %2240 = vmatprep.subr.bf16.mxu1 %v4196_v29 }
 0x454   :  { %2200 = vmatpush1.bf16.msra.mxu0 %v4201_v12  ;;  %2241 = vmatpush1.bf16.msra.mxu1 %v4206_v30 }
 0x455   :  { %2201 = vmatprep.subr.bf16.mxu0 %v4215_v23  ;;  %2242 = vmatprep.subr.bf16.mxu1 %v4220_v26 }
 0x458   :  { %2202 = vmatpush1.bf16.msra.mxu0 %v4225_v44  ;;  %2243 = vmatpush1.bf16.msra.mxu1 %v4230_v11 }
 0x459   :  { %2203 = vmatprep.subr.bf16.mxu0 %v4239_v31  ;;  %2244 = vmatprep.subr.bf16.mxu1 %v4244_v7 }
 0x45c   :  { %2204 = vmatpush1.bf16.msra.mxu0 %v4249_v9  ;;  %2245 = vmatpush1.bf16.msra.mxu1 %v4254_v36 }
 0x45d   :  { %2493 = vmatprep.subr.bf16.mxu0 %v4071_v6  ;;  %2534 = vmatprep.subr.bf16.mxu1 %v4076_v8 }
 0x512   :  { %v1919_v1 = vpop.f32.mrb[32].mxu0  ;;  %v1960_v42 = vpop.f32.mrb[32].mxu1 }
 0x513   :  { %v1967_v45 = vadd.f32 %v1919_v1, %v4454_v43  ;;  %v1969_v47 = vadd.f32 %v1960_v42, %v4455_v46  ;;  %v1921_v48 = vpop.f32.mrb[33].mxu0  ;;  %v1962_v49 = vpop.f32.mrb[33].mxu1 }
 0x514   :  { %v1968_v51 = vadd.f32 %v1921_v48, %v4456_v50  ;;  %v1970_v54 = vadd.f32 %v1962_v49, %v4457_v52  ;;  %v1923_v55 = vpop.f32.mrb[34].mxu0  ;;  %v1964_v56 = vpop.f32.mrb[34].mxu1  ;;  %v4458_v48 = vld [vmem:[#allocation17_spill] sm:$0xff]  ;;  %v4459_v50 = vld [vmem:[#allocation18_spill] sm:$0xff] }
 0x515   :  { %v1971_v57 = vmul.f32 0.5, %v1967_v45  ;;  %v1924_v58 = vpop.f32.mrb[35].mxu0  ;;  %v1965_v59 = vpop.f32.mrb[35].mxu1  ;;  %v4460_v55 = vld [vmem:[#allocation19_spill] sm:$0xff] }
 0x516   :  { %v1975_v60 = vmul.f32 0.5, %v1968_v51  ;;  %v1980_v61 = vmul.f32 0.5, %v1970_v54 }
 0x517   :  { %3415 = vtanh.f32 %v1971_v57  ;;  %v4461_v57 = vld [vmem:[#allocation20_spill] sm:$0xff] }
 0x518   :  { %3417 = vtanh.f32 %v1975_v60 }
 0x519   :  { %3419 = vtanh.f32 %v1969_v47 }
 0x51a   :  { %3421 = vtanh.f32 %v1980_v61 }
 0x521   :  { %v3416_v63 = vpop.eup %3415 }
 0x522   :  { %v3418_v2 = vpop.eup %3417  ;;  %v1973_v3 = vmul.f32 0.5, %v3416_v63 }
 0x523   :  { %v1977_v4 = vmul.f32 0.5, %v3418_v2  ;;  %v3420_v53 = vpop.eup %3419 }
 0x524   :  { %v1974_v5 = vadd.f32 0.5, %v1973_v3  ;;  %v3422_v41 = vpop.eup %3421 }
 0x525   :  { %v1978_v37 = vadd.f32 0.5, %v1977_v4  ;;  %v1982_v1 = vmul.f32 0.5, %v3422_v41 }
 0x526   :  { %v1985_v38 = vmul.f32 %v3420_v53, %v1974_v5 }
 0x527   :  { %v1984_v39 = vmul.f32 %v1978_v37, %v4267_v35  ;;  %v1983_v42 = vadd.f32 0.5, %v1982_v1 }
 0x529   :  { %v4312_v40 = vadd.f32 %v1985_v38, %v1984_v39 }
 0x52b   :  { %3423 = vtanh.f32 %v4312_v40 }
 0x535   :  { %v3424_v43 = vpop.eup %3423 }
 0x536   :  { %v1988_v45 = vmul.f32 %v3424_v43, %v1983_v42 }
 0x538   :  { %v1989_v46 = vpack.c.bf16 %v1988_v45, %v1988_v45 }
 0x53a   :  { %3125 = vst [vmem:[%s4422_s6 + $0x10] sm:$0xf] %v1989_v46  ;;  %2222 = vmatmul.mubr.bf16.vlgmr.msra.gmra.mrb[36].mxu0 %v1989_v46  ;;  %2263 = vmatmul.mubr.bf16.vlgmr.msra.gmra.mrb[36].mxu1 %v1989_v46 }
 0x53b   :  { %2494 = vmatpush1.bf16.msra.mxu0 %v4081_v13  ;;  %2535 = vmatpush1.bf16.msra.mxu1 %v4086_v24 }
 0x53c   :  { %2495 = vmatprep.subr.bf16.mxu0 %v4095_v32  ;;  %2536 = vmatprep.subr.bf16.mxu1 %v4100_v16 }
 0x53d   :  { %2525 = vmatprep.mubr.bf16.mxu0 %v4448_v14  ;;  %2566 = vmatprep.mubr.bf16.mxu1 %v4448_v14 }
 0x53f   :  { %2496 = vmatpush1.bf16.msra.mxu0 %v4105_v15  ;;  %2537 = vmatpush1.bf16.msra.mxu1 %v4110_v17 }
 0x540   :  { %2497 = vmatprep.subr.bf16.mxu0 %v4119_v18  ;;  %2538 = vmatprep.subr.bf16.mxu1 %v4124_v19 }
 0x543   :  { %2498 = vmatpush1.bf16.msra.mxu0 %v4129_v20  ;;  %2539 = vmatpush1.bf16.msra.mxu1 %v4134_v0 }
 0x544   :  { %2499 = vmatprep.subr.bf16.mxu0 %v4143_v21  ;;  %2540 = vmatprep.subr.bf16.mxu1 %v4148_v33 }
 0x547   :  { %2500 = vmatpush1.bf16.msra.mxu0 %v4153_v34  ;;  %2541 = vmatpush1.bf16.msra.mxu1 %v4158_v22 }
 0x548   :  { %2501 = vmatprep.subr.bf16.mxu0 %v4167_v25  ;;  %2542 = vmatprep.subr.bf16.mxu1 %v4172_v10 }
 0x54b   :  { %2502 = vmatpush1.bf16.msra.mxu0 %v4177_v27  ;;  %2543 = vmatpush1.bf16.msra.mxu1 %v4182_v28 }
 0x54c   :  { %2503 = vmatprep.subr.bf16.mxu0 %v4191_v62  ;;  %2544 = vmatprep.subr.bf16.mxu1 %v4196_v29 }
 0x54f   :  { %2504 = vmatpush1.bf16.msra.mxu0 %v4201_v12  ;;  %2545 = vmatpush1.bf16.msra.mxu1 %v4206_v30 }
 0x550   :  { %2505 = vmatprep.subr.bf16.mxu0 %v4215_v23  ;;  %2546 = vmatprep.subr.bf16.mxu1 %v4220_v26 }
 0x553   :  { %2506 = vmatpush1.bf16.msra.mxu0 %v4225_v44  ;;  %2547 = vmatpush1.bf16.msra.mxu1 %v4230_v11 }
 0x554   :  { %2507 = vmatprep.subr.bf16.mxu0 %v4239_v31  ;;  %2548 = vmatprep.subr.bf16.mxu1 %v4244_v7 }
 0x557   :  { %2508 = vmatpush1.bf16.msra.mxu0 %v4249_v9  ;;  %2549 = vmatpush1.bf16.msra.mxu1 %v4254_v36 }
 0x558   :  { %2797 = vmatprep.subr.bf16.mxu0 %v4071_v6  ;;  %2838 = vmatprep.subr.bf16.mxu1 %v4076_v8 }
 0x60d   :  { %v2223_v35 = vpop.f32.mrb[36].mxu0  ;;  %v2264_v47 = vpop.f32.mrb[36].mxu1 }
 0x60e   :  { %v2271_v49 = vadd.f32 %v2223_v35, %v4458_v48  ;;  %v2273_v51 = vadd.f32 %v2264_v47, %v4459_v50  ;;  %v2225_v52 = vpop.f32.mrb[37].mxu0  ;;  %v2266_v54 = vpop.f32.mrb[37].mxu1 }
 0x60f   :  { %v2272_v56 = vadd.f32 %v2225_v52, %v4460_v55  ;;  %v2274_v58 = vadd.f32 %v2266_v54, %v4461_v57  ;;  %v2227_v59 = vpop.f32.mrb[38].mxu0  ;;  %v2268_v60 = vpop.f32.mrb[38].mxu1  ;;  %v4466_v55 = vld [vmem:[#allocation25_spill] sm:$0xff]  ;;  %v4467_v57 = vld [vmem:[#allocation26_spill] sm:$0xff] }
 0x610   :  { %v2275_v61 = vmul.f32 0.5, %v2271_v49  ;;  %v2228_v63 = vpop.f32.mrb[39].mxu0  ;;  %v2269_v2 = vpop.f32.mrb[39].mxu1 }
 0x611   :  { %v2279_v6 = vmul.f32 0.5, %v2272_v56  ;;  %v2284_v8 = vmul.f32 0.5, %v2274_v58  ;;  %v4469_v2 = vld [vmem:[#allocation28_spill] sm:$0xff] }
 0x612   :  { %3425 = vtanh.f32 %v2275_v61  ;;  %v4468_v61 = vld [vmem:[#allocation27_spill] sm:$0xff] }
 0x613   :  { %3427 = vtanh.f32 %v2279_v6 }
 0x614   :  { %3429 = vtanh.f32 %v2273_v51 }
 0x615   :  { %3431 = vtanh.f32 %v2284_v8 }
 0x61c   :  { %v3426_v3 = vpop.eup %3425 }
 0x61d   :  { %v3428_v4 = vpop.eup %3427  ;;  %v2277_v5 = vmul.f32 0.5, %v3426_v3 }
 0x61e   :  { %v2281_v53 = vmul.f32 0.5, %v3428_v4  ;;  %v3430_v38 = vpop.eup %3429 }
 0x61f   :  { %v2278_v37 = vadd.f32 0.5, %v2277_v5  ;;  %v3432_v43 = vpop.eup %3431 }
 0x620   :  { %v2282_v39 = vadd.f32 0.5, %v2281_v53  ;;  %v2286_v45 = vmul.f32 0.5, %v3432_v43 }
 0x621   :  { %v2289_v41 = vmul.f32 %v3430_v38, %v2278_v37 }
 0x622   :  { %v2288_v1 = vmul.f32 %v2282_v39, %v4312_v40  ;;  %v2287_v46 = vadd.f32 0.5, %v2286_v45 }
 0x624   :  { %v4357_v42 = vadd.f32 %v2289_v41, %v2288_v1 }
 0x626   :  { %3433 = vtanh.f32 %v4357_v42 }
 0x630   :  { %v3434_v35 = vpop.eup %3433 }
 0x631   :  { %v2292_v47 = vmul.f32 %v3434_v35, %v2287_v46 }
 0x633   :  { %v2293_v48 = vpack.c.bf16 %v2292_v47, %v2292_v47 }
 0x635   :  { %3158 = vst [vmem:[%s4422_s6 + $0x14] sm:$0xf] %v2293_v48  ;;  %2526 = vmatmul.mubr.bf16.vlgmr.msra.gmra.mrb[40].mxu0 %v2293_v48  ;;  %2567 = vmatmul.mubr.bf16.vlgmr.msra.gmra.mrb[40].mxu1 %v2293_v48 }
 0x636   :  { %2798 = vmatpush1.bf16.msra.mxu0 %v4081_v13  ;;  %2839 = vmatpush1.bf16.msra.mxu1 %v4086_v24  ;;  %v4462_v24 = vld [vmem:[#allocation21_spill] sm:$0xff] }
 0x637   :  { %2799 = vmatprep.subr.bf16.mxu0 %v4095_v32  ;;  %2840 = vmatprep.subr.bf16.mxu1 %v4100_v16  ;;  %v4463_v16 = vld [vmem:[#allocation22_spill] sm:$0xff] }
 0x638   :  { %2829 = vmatprep.mubr.bf16.mxu0 %v4448_v14  ;;  %2870 = vmatprep.mubr.bf16.mxu1 %v4448_v14 }
 0x63a   :  { %2800 = vmatpush1.bf16.msra.mxu0 %v4105_v15  ;;  %2841 = vmatpush1.bf16.msra.mxu1 %v4110_v17 }
 0x63b   :  { %2801 = vmatprep.subr.bf16.mxu0 %v4119_v18  ;;  %2842 = vmatprep.subr.bf16.mxu1 %v4124_v19  ;;  %v4464_v19 = vld [vmem:[#allocation23_spill] sm:$0xff] }
 0x63e   :  { %2802 = vmatpush1.bf16.msra.mxu0 %v4129_v20  ;;  %2843 = vmatpush1.bf16.msra.mxu1 %v4134_v0  ;;  %v4465_v0 = vld [vmem:[#allocation24_spill] sm:$0xff] }
 0x63f   :  { %2803 = vmatprep.subr.bf16.mxu0 %v4143_v21  ;;  %2844 = vmatprep.subr.bf16.mxu1 %v4148_v33 }
 0x642   :  { %2804 = vmatpush1.bf16.msra.mxu0 %v4153_v34  ;;  %2845 = vmatpush1.bf16.msra.mxu1 %v4158_v22 }
 0x643   :  { %2805 = vmatprep.subr.bf16.mxu0 %v4167_v25  ;;  %2846 = vmatprep.subr.bf16.mxu1 %v4172_v10 }
 0x646   :  { %2806 = vmatpush1.bf16.msra.mxu0 %v4177_v27  ;;  %2847 = vmatpush1.bf16.msra.mxu1 %v4182_v28 }
 0x647   :  { %2807 = vmatprep.subr.bf16.mxu0 %v4191_v62  ;;  %2848 = vmatprep.subr.bf16.mxu1 %v4196_v29 }
 0x64a   :  { %2808 = vmatpush1.bf16.msra.mxu0 %v4201_v12  ;;  %2849 = vmatpush1.bf16.msra.mxu1 %v4206_v30 }
 0x64b   :  { %2809 = vmatprep.subr.bf16.mxu0 %v4215_v23  ;;  %2850 = vmatprep.subr.bf16.mxu1 %v4220_v26 }
 0x64e   :  { %2810 = vmatpush1.bf16.msra.mxu0 %v4225_v44  ;;  %2851 = vmatpush1.bf16.msra.mxu1 %v4230_v11 }
 0x64f   :  { %2811 = vmatprep.subr.bf16.mxu0 %v4239_v31  ;;  %2852 = vmatprep.subr.bf16.mxu1 %v4244_v7 }
 0x652   :  { %2812 = vmatpush1.bf16.msra.mxu0 %v4249_v9  ;;  %2853 = vmatpush1.bf16.msra.mxu1 %v4254_v36 }
 0x708   :  { %v2527_v14 = vpop.f32.mrb[40].mxu0  ;;  %v2568_v13 = vpop.f32.mrb[40].mxu1 }
 0x709   :  { %v2575_v32 = vadd.f32 %v2527_v14, %v4462_v24  ;;  %v2577_v15 = vadd.f32 %v2568_v13, %v4463_v16  ;;  %v2529_v17 = vpop.f32.mrb[41].mxu0  ;;  %v2570_v18 = vpop.f32.mrb[41].mxu1 }
 0x70a   :  { %v2576_v20 = vadd.f32 %v2529_v17, %v4464_v19  ;;  %v2578_v21 = vadd.f32 %v2570_v18, %v4465_v0  ;;  %v2531_v33 = vpop.f32.mrb[42].mxu0  ;;  %v2572_v34 = vpop.f32.mrb[42].mxu1 }
 0x70b   :  { %v2579_v22 = vmul.f32 0.5, %v2575_v32  ;;  %v2532_v25 = vpop.f32.mrb[43].mxu0  ;;  %v2573_v10 = vpop.f32.mrb[43].mxu1 }
 0x70c   :  { %v2583_v27 = vmul.f32 0.5, %v2576_v20  ;;  %v2588_v28 = vmul.f32 0.5, %v2578_v21 }
 0x70d   :  { %3435 = vtanh.f32 %v2579_v22 }
 0x70e   :  { %3437 = vtanh.f32 %v2583_v27 }
 0x70f   :  { %3439 = vtanh.f32 %v2577_v15 }
 0x710   :  { %3441 = vtanh.f32 %v2588_v28 }
 0x717   :  { %v3436_v62 = vpop.eup %3435 }
 0x718   :  { %v3438_v29 = vpop.eup %3437  ;;  %v2581_v12 = vmul.f32 0.5, %v3436_v62 }
 0x719   :  { %v2585_v30 = vmul.f32 0.5, %v3438_v29  ;;  %v3440_v26 = vpop.eup %3439 }
 0x71a   :  { %v2582_v23 = vadd.f32 0.5, %v2581_v12  ;;  %v3442_v9 = vpop.eup %3441 }
 0x71b   :  { %v2586_v44 = vadd.f32 0.5, %v2585_v30  ;;  %v2590_v36 = vmul.f32 0.5, %v3442_v9 }
 0x71c   :  { %v2593_v11 = vmul.f32 %v3440_v26, %v2582_v23 }
 0x71d   :  { %v2592_v31 = vmul.f32 %v2586_v44, %v4357_v42  ;;  %v2591_v40 = vadd.f32 0.5, %v2590_v36 }
 0x71f   :  { %v2594_v7 = vadd.f32 %v2593_v11, %v2592_v31 }
 0x721   :  { %3443 = vtanh.f32 %v2594_v7 }
 0x72b   :  { %v3444_v49 = vpop.eup %3443 }
 0x72c   :  { %v2596_v50 = vmul.f32 %v3444_v49, %v2591_v40 }
 0x72e   :  { %v2597_v51 = vpack.c.bf16 %v2596_v50, %v2596_v50 }
 0x730   :  { %3191 = vst [vmem:[%s4422_s6 + $0x18] sm:$0xf] %v2597_v51  ;;  %2830 = vmatmul.mubr.bf16.vlgmr.msra.gmra.mrb[44].mxu0 %v2597_v51  ;;  %2871 = vmatmul.mubr.bf16.vlgmr.msra.gmra.mrb[44].mxu1 %v2597_v51 }
 0x803   :  { %v2831_v52 = vpop.f32.mrb[44].mxu0  ;;  %v2872_v54 = vpop.f32.mrb[44].mxu1 }
 0x804   :  { %v2879_v56 = vadd.f32 %v2831_v52, %v4466_v55  ;;  %v2881_v58 = vadd.f32 %v2872_v54, %v4467_v57  ;;  %v2833_v59 = vpop.f32.mrb[45].mxu0  ;;  %v2874_v60 = vpop.f32.mrb[45].mxu1 }
 0x805   :  { %v2880_v63 = vadd.f32 %v2833_v59, %v4468_v61  ;;  %v2882_v6 = vadd.f32 %v2874_v60, %v4469_v2  ;;  %v2835_v8 = vpop.f32.mrb[46].mxu0  ;;  %v2876_v3 = vpop.f32.mrb[46].mxu1 }
 0x806   :  { %v2883_v4 = vmul.f32 0.5, %v2879_v56  ;;  %v2836_v5 = vpop.f32.mrb[47].mxu0  ;;  %v2877_v53 = vpop.f32.mrb[47].mxu1 }
 0x807   :  { %v2887_v37 = vmul.f32 0.5, %v2880_v63  ;;  %v2892_v38 = vmul.f32 0.5, %v2882_v6 }
 0x808   :  { %3445 = vtanh.f32 %v2883_v4 }
 0x809   :  { %3447 = vtanh.f32 %v2887_v37 }
 0x80a   :  { %3449 = vtanh.f32 %v2881_v58 }
 0x80b   :  { %3451 = vtanh.f32 %v2892_v38 }
 0x812   :  { %v3446_v39 = vpop.eup %3445 }
 0x813   :  { %v3448_v41 = vpop.eup %3447  ;;  %v2885_v1 = vmul.f32 0.5, %v3446_v39 }
 0x814   :  { %v2889_v42 = vmul.f32 0.5, %v3448_v41  ;;  %v3450_v45 = vpop.eup %3449 }
 0x815   :  { %v2886_v43 = vadd.f32 0.5, %v2885_v1  ;;  %v3452_v14 = vpop.eup %3451 }
 0x816   :  { %v2890_v46 = vadd.f32 0.5, %v2889_v42  ;;  %v2894_v13 = vmul.f32 0.5, %v3452_v14 }
 0x817   :  { %v2897_v35 = vmul.f32 %v3450_v45, %v2886_v43 }
 0x818   :  { %v2896_v47 = vmul.f32 %v2890_v46, %v2594_v7  ;;  %v2895_v24 = vadd.f32 0.5, %v2894_v13 }
 0x81a   :  { %v2898_v48 = vadd.f32 %v2897_v35, %v2896_v47 }
 0x81c   :  { %3453 = vtanh.f32 %v2898_v48  ;;  %2912 = vst [vmem:[%s4424_s8] sm:$0xff] %v2898_v48 }
 0x826   :  { %v3454_v32 = vpop.eup %3453 }
 0x827   :  { %v2900_v16 = vmul.f32 %v3454_v32, %v2895_v24 }
 0x829   :  { %v2901_v15 = vpack.c.bf16 %v2900_v16, %v2900_v16  ;;  %2910 = vst [vmem:[%s4423_s7] sm:$0xff] %v2900_v16 }
 0x82b   :  { %3224 = vst [vmem:[%s4422_s6 + $0x1c] sm:$0xf] %v2901_v15 }
 0x82c   :  { %2925 = vsyncpa [#allocation6], 1 }

</bundles_post_ra>
